<compile_context>
chip_gen: v7x
topology: tpu7x:2x2x1
jax: 0.10.0
libtpu: 0.0.40
codegen_flags: <defaults>
</compile_context>

<pallas_src>
import jax
import jax.numpy as jnp
import numpy as np
from jax.experimental import pallas as pl
from jax.experimental.pallas import tpu as pltpu


# ---------------------------------------------------------------------------
# Pallas kernel
# ---------------------------------------------------------------------------
def _make_deform_roi_pool_kernel(nbins, n_terms, hw):
    """nbins = out_size**2, n_terms = sample_per_part**2 * 4 corners, hw = H*W."""

    def kernel(bidx_ref, data_ref, pix_ref, wgt_ref, out_ref):
        del bidx_ref  # only used by the index_map (selects the ROI's image)
        d = data_ref[0].astype(jnp.float32)   # (C, H*W) lane-dense slab
        pix = pix_ref[0]                      # (nbins, n_terms) int32 pixel ids
        wgt = wgt_ref[0]                      # (nbins, n_terms) f32 weights

        col = jax.lax.broadcasted_iota(jnp.int32, (nbins, hw), 1)
        m = jnp.zeros((nbins, hw), jnp.float32)
        # Build the (nbins, H*W) sampling matrix: each bilinear-corner term
        # scatters its weight onto its pixel column via an iota compare (VPU).
        for j in range(n_terms):
            p_j = pix[:, j:j + 1]             # (nbins, 1)
            w_j = wgt[:, j:j + 1]             # (nbins, 1)
            m = m + jnp.where(col == p_j, w_j, 0.0)

        # (nbins, HW) x (C, HW) contracted over HW -> (nbins, C) on the MXU.
        pooled = jax.lax.dot_general(
            m, d, dimension_numbers=(((1,), (1,)), ((), ())),
            preferred_element_type=jnp.float32)
        out_ref[0] = pooled.astype(out_ref.dtype)

    return kernel


# ---------------------------------------------------------------------------
# Wrapper (geometry + pallas_call + group-sensitive channel selection)
# ---------------------------------------------------------------------------
def deform_roi_pooling(data, rois, offset, spatial_scale, out_size, out_channels,
                       no_trans, group_size=1, part_size=None, sample_per_part=4,
                       trans_std=0.0):
    assert 0.0 <= trans_std <= 1.0
    if part_size is None:
        part_size = out_size

    B, C, H, W = data.shape
    N = rois.shape[0]
    S = sample_per_part
    S2 = S * S
    P = out_size
    nbins = P * P
    n_terms = S2 * 4
    HW = H * W
    f32 = jnp.float32
    assert out_channels * group_size * group_size <= C

    rois_f = rois.astype(f32)
    batch_idx = rois_f[:, 0].astype(jnp.int32)                         # (N,)
    roi_start_w = jnp.round(rois_f[:, 1]) * spatial_scale - 0.5
    roi_start_h = jnp.round(rois_f[:, 2]) * spatial_scale - 0.5
    roi_end_w = (jnp.round(rois_f[:, 3]) + 1.0) * spatial_scale - 0.5
    roi_end_h = (jnp.round(rois_f[:, 4]) + 1.0) * spatial_scale - 0.5
    roi_w = jnp.maximum(roi_end_w - roi_start_w, 0.1)                  # (N,)
    roi_h = jnp.maximum(roi_end_h - roi_start_h, 0.1)
    bin_w = roi_w / P
    bin_h = roi_h / P
    sub_w = bin_w / S
    sub_h = bin_h / S

    ph = jnp.arange(P, dtype=f32)
    pw = jnp.arange(P, dtype=f32)

    if no_trans:
        trans_x = jnp.zeros((N, P, P), f32)
        trans_y = jnp.zeros((N, P, P), f32)
    else:
        num_classes = offset.shape[1] // 2
        # TODO(synk): num_classes > 1 (class/channel-dependent offsets) needs a
        # per-output-channel sampling matrix; only num_classes == 1 is fused here.
        assert num_classes == 1
        off = offset.reshape(N, num_classes, 2, part_size, part_size).astype(f32)
        part_h = jnp.floor(ph / P * part_size).astype(jnp.int32)       # (P,)
        part_w = jnp.floor(pw / P * part_size).astype(jnp.int32)
        trans_x = off[:, 0, 0][:, part_h][:, :, part_w] * trans_std    # (N, P, P)
        trans_y = off[:, 0, 1][:, part_h][:, :, part_w] * trans_std

    # Start of the sampling window per (roi, ph, pw).
    wstart = (pw[None, None, :] * bin_w[:, None, None]
              + roi_start_w[:, None, None] + trans_x * roi_w[:, None, None])
    hstart = (ph[None, :, None] * bin_h[:, None, None]
              + roi_start_h[:, None, None] + trans_y * roi_h[:, None, None])

    iw = jnp.arange(S, dtype=f32)
    ih = jnp.arange(S, dtype=f32)
    # Sample coordinates: (N, P(ph), P(pw), S(ih), S(iw)).
    w = wstart[..., None, None] + iw[None, None, None, None, :] * sub_w[:, None, None, None, None]
    h = hstart[..., None, None] + ih[None, None, None, :, None] * sub_h[:, None, None, None, None]

    valid = (w >= -0.5) & (w <= W - 0.5) & (h >= -0.5) & (h <= H - 0.5)
    w_c = jnp.clip(w, 0.0, W - 1.0)
    h_c = jnp.clip(h, 0.0, H - 1.0)
    x1 = jnp.floor(w_c)
    x2 = jnp.ceil(w_c)
    y1 = jnp.floor(h_c)
    y2 = jnp.ceil(h_c)
    dx = w_c - x1
    dy = h_c - y1

    # Per-bin valid-sample count; fold 1/count (0 when count==0) into the weights.
    cnt = valid.reshape(N, P, P, S2).sum(-1).astype(f32)               # (N, P, P)
    inv = jnp.where(cnt > 0, 1.0 / jnp.maximum(cnt, 1.0), 0.0)
    scale = jnp.where(valid, inv[..., None, None], 0.0)                # (N, P, P, S, S)

    w11 = (1.0 - dx) * (1.0 - dy) * scale
    w12 = (1.0 - dx) * dy * scale
    w21 = dx * (1.0 - dy) * scale
    w22 = dx * dy * scale

    def flat_pix(y, x):
        return y.astype(jnp.int32) * W + x.astype(jnp.int32)

    pix_all = jnp.stack([flat_pix(y1, x1), flat_pix(y2, x1),
                         flat_pix(y1, x2), flat_pix(y2, x2)], axis=-1)  # (N,P,P,S,S,4)
    wgt_all = jnp.stack([w11, w12, w21, w22], axis=-1).astype(f32)

    pix_all = pix_all.reshape(N, nbins, n_terms)
    wgt_all = wgt_all.reshape(N, nbins, n_terms)

    data_flat = data.reshape(B, C, HW)   # contiguous reshape; H*W on the lane axis

    kernel = _make_deform_roi_pool_kernel(nbins, n_terms, HW)
    pooled = pl.pallas_call(
        kernel,
        out_shape=jax.ShapeDtypeStruct((N, nbins, C), data.dtype),
        grid_spec=pltpu.PrefetchScalarGridSpec(
            num_scalar_prefetch=1,          # batch index per ROI, lives in SMEM
            grid=(N,),
            in_specs=[
                pl.BlockSpec((1, C, HW), lambda n, bidx: (bidx[n], 0, 0)),
                pl.BlockSpec((1, nbins, n_terms), lambda n, bidx: (n, 0, 0)),
                pl.BlockSpec((1, nbins, n_terms), lambda n, bidx: (n, 0, 0)),
            ],
            out_specs=pl.BlockSpec((1, nbins, C), lambda n, bidx: (n, 0, 0)),
        ),
        compiler_params=pltpu.CompilerParams(
            dimension_semantics=("parallel",)),
    )(batch_idx, data_flat, pix_all, wgt_all)

    # Group-sensitive (position-sensitive) channel selection:
    #   c_in = (ctop * G + gh) * G + gw   with gh/gw derived from the bin.
    G = group_size
    gh = jnp.clip((jnp.arange(P, dtype=jnp.int32) * G) // P, 0, G - 1)
    gw = gh
    ctop = jnp.arange(out_channels, dtype=jnp.int32)
    c_sel = (ctop[None, None, :] * G + gh[:, None, None]) * G + gw[None, :, None]
    pooled4 = pooled.reshape(N, P, P, C)
    idx = jnp.broadcast_to(c_sel[None], (N, P, P, out_channels))
    out = jnp.take_along_axis(pooled4, idx, axis=-1)                   # (N, P, P, out_c)
    return jnp.transpose(out, (0, 3, 1, 2))                            # (N, out_c, P, P)


class DeformRoIPooling:
    """JAX/Pallas counterpart of the PyTorch DeformRoIPooling module (forward only)."""
    # TODO(synk): backward pass of the autograd Function is not implemented.

    def __init__(self, spatial_scale, out_size, out_channels, no_trans,
                 group_size=1, part_size=None, sample_per_part=4, trans_std=0.0):
        self.spatial_scale = spatial_scale
        self.out_size = out_size
        self.out_channels = out_channels
        self.no_trans = no_trans
        self.group_size = group_size
        self.part_size = out_size if part_size is None else part_size
        self.sample_per_part = sample_per_part
        self.trans_std = trans_std

    def __call__(self, data, rois, offset):
        if self.no_trans:
            offset = jnp.zeros((0, 0, 0, 0), data.dtype)
        return deform_roi_pooling(data, rois, offset, self.spatial_scale,
                                  self.out_size, self.out_channels, self.no_trans,
                                  self.group_size, self.part_size,
                                  self.sample_per_part, self.trans_std)


# ---------------------------------------------------------------------------
# Pure NumPy reference (mirrors the CUDA kernel loop exactly)
# ---------------------------------------------------------------------------
def deform_roi_pooling_ref(data, rois, offset, spatial_scale, out_size, out_channels,
                           no_trans, group_size=1, part_size=None, sample_per_part=4,
                           trans_std=0.0):
    data = np.asarray(data, np.float64)
    rois = np.asarray(rois, np.float64)
    if part_size is None:
        part_size = out_size
    _, _, H, W = data.shape
    N = rois.shape[0]
    out = np.zeros((N, out_channels, out_size, out_size), np.float64)
    if not no_trans:
        off = np.asarray(offset, np.float64)
        num_classes = off.shape[1] // 2
        off = off.reshape(N, num_classes, 2, part_size, part_size)
        channels_each_class = out_channels // num_classes
    for n in range(N):
        b = int(rois[n, 0])
        rsw = np.round(rois[n, 1]) * spatial_scale - 0.5
        rsh = np.round(rois[n, 2]) * spatial_scale - 0.5
        rew = (np.round(rois[n, 3]) + 1.0) * spatial_scale - 0.5
        reh = (np.round(rois[n, 4]) + 1.0) * spatial_scale - 0.5
        rw, rh = max(rew - rsw, 0.1), max(reh - rsh, 0.1)
        bw, bh = rw / out_size, rh / out_size
        sw, sh = bw / sample_per_part, bh / sample_per_part
        for ctop in range(out_channels):
            for ph in range(out_size):
                for pw in range(out_size):
                    if no_trans:
                        tx = ty = 0.0
                    else:
                        part_h = int(np.floor(ph / out_size * part_size))
                        part_w = int(np.floor(pw / out_size * part_size))
                        cls = ctop // channels_each_class
                        tx = off[n, cls, 0, part_h, part_w] * trans_std
                        ty = off[n, cls, 1, part_h, part_w] * trans_std
                    wstart = pw * bw + rsw + tx * rw
                    hstart = ph * bh + rsh + ty * rh
                    gw = min(max(int(np.floor(pw * group_size / out_size)), 0), group_size - 1)
                    gh = min(max(int(np.floor(ph * group_size / out_size)), 0), group_size - 1)
                    c = (ctop * group_size + gh) * group_size + gw
                    acc, cnt = 0.0, 0
                    for iy in range(sample_per_part):
                        for ix in range(sample_per_part):
                            wc = wstart + ix * sw
                            hc = hstart + iy * sh
                            if wc < -0.5 or wc > W - 0.5 or hc < -0.5 or hc > H - 0.5:
                                continue
                            wc = min(max(wc, 0.0), W - 1.0)
                            hc = min(max(hc, 0.0), H - 1.0)
                            x1, x2 = int(np.floor(wc)), int(np.ceil(wc))
                            y1, y2 = int(np.floor(hc)), int(np.ceil(hc))
                            dx, dy = wc - x1, hc - y1
                            v = ((1 - dx) * (1 - dy) * data[b, c, y1, x1]
                                 + (1 - dx) * dy * data[b, c, y2, x1]
                                 + dx * (1 - dy) * data[b, c, y1, x2]
                                 + dx * dy * data[b, c, y2, x2])
                            acc += v
                            cnt += 1
                    out[n, ctop, ph, pw] = 0.0 if cnt == 0 else acc / cnt
    return out


if __name__ == "__main__":
    key = jax.random.PRNGKey(0)
    k_data, k_xy, k_wh, k_off = jax.random.split(key, 4)

    B, C, H, W = 2, 4, 16, 16
    out_size, out_channels = 4, 4
    spatial_scale = 1.0
    n_rois = 4

    data = jax.random.normal(k_data, (B, C, H, W), dtype=jnp.float32)
    batch_col = jnp.array([0.0, 0.0, 1.0, 1.0], dtype=jnp.float32)
    xy1 = jax.random.uniform(k_xy, (n_rois, 2), minval=0.0, maxval=8.0)
    wh = jax.random.uniform(k_wh, (n_rois, 2), minval=2.0, maxval=14.0)
    xy2 = xy1 + wh  # may extend past the feature map -> exercises the valid mask
    rois = jnp.concatenate([batch_col[:, None], xy1, xy2], axis=1)     # (N, 5)

    # Case 1: no_trans=True (offset unused), the DeformRoIPooling.forward path.
    pool = DeformRoIPooling(spatial_scale, out_size, out_channels, no_trans=True)
    y = pool(data, rois, None)
    jax.block_until_ready(y)
    y_ref = deform_roi_pooling_ref(np.asarray(data), np.asarray(rois), None,
                                   spatial_scale, out_size, out_channels, True)
    assert y.shape == (n_rois, out_channels, out_size, out_size)
    np.testing.assert_allclose(np.asarray(y, np.float64), y_ref, rtol=1e-4, atol=1e-4)

    # Case 2: no_trans=False with learned per-ROI offsets (deformable path).
    offset = 0.5 * jax.random.normal(k_off, (n_rois, 2, out_size, out_size),
                                     dtype=jnp.float32)
    pool_d = DeformRoIPooling(spatial_scale, out_size, out_channels,
                              no_trans=False, trans_std=0.1)
    y2 = pool_d(data, rois, offset)
    jax.block_until_ready(y2)
    y2_ref = deform_roi_pooling_ref(np.asarray(data), np.asarray(rois),
                                    np.asarray(offset), spatial_scale, out_size,
                                    out_channels, False, trans_std=0.1)
    np.testing.assert_allclose(np.asarray(y2, np.float64), y2_ref, rtol=1e-4, atol=1e-4)

    print("KERNEL_OK")
</pallas_src>

<mosaic_0001>
module attributes {stable_mosaic.version = 11 : i64} {
  func.func @kernel(%arg0: i32, %arg1: memref<4xi32, #tpu.memory_space<smem>>, %arg2: memref<1x4x256xf32, #tpu.memory_space<vmem>>, %arg3: memref<1x16x64xi32, #tpu.memory_space<vmem>>, %arg4: memref<1x16x64xf32, #tpu.memory_space<vmem>>, %arg5: memref<1x16x4xf32, #tpu.memory_space<vmem>>) attributes {dimension_semantics = [#tpu.dimension_semantics<parallel>], iteration_bounds = array<i64: 4>, scalar_prefetch = 1 : i64, scratch_operands = 0 : i64, tpu.core_type = #tpu.core_type<tc>, window_params = [{transform_indices = @transform_0, window_bounds = array<i64: 1, 4, 256>}, {transform_indices = @transform_1, window_bounds = array<i64: 1, 16, 64>}, {transform_indices = @transform_2, window_bounds = array<i64: 1, 16, 64>}, {transform_indices = @transform_3, window_bounds = array<i64: 1, 16, 4>}]} {
    %c0 = arith.constant 0 : index
    %c0_0 = arith.constant 0 : index
    %c0_1 = arith.constant 0 : index
    %0 = vector.load %arg2[%c0, %c0_0, %c0_1] : memref<1x4x256xf32, #tpu.memory_space<vmem>>, vector<1x4x256xf32>
    %1 = vector.shape_cast %0 : vector<1x4x256xf32> to vector<4x256xf32>
    %c0_2 = arith.constant 0 : index
    %c0_3 = arith.constant 0 : index
    %c0_4 = arith.constant 0 : index
    %2 = vector.load %arg3[%c0_2, %c0_3, %c0_4] : memref<1x16x64xi32, #tpu.memory_space<vmem>>, vector<1x16x64xi32>
    %3 = vector.shape_cast %2 : vector<1x16x64xi32> to vector<16x64xi32>
    %c0_5 = arith.constant 0 : index
    %c0_6 = arith.constant 0 : index
    %c0_7 = arith.constant 0 : index
    %4 = vector.load %arg4[%c0_5, %c0_6, %c0_7] : memref<1x16x64xf32, #tpu.memory_space<vmem>>, vector<1x16x64xf32>
    %5 = vector.shape_cast %4 : vector<1x16x64xf32> to vector<16x64xf32>
    %6 = tpu.iota {dimensions = array<i32: 1>} : vector<16x256xi32>
    %cst = arith.constant 0.000000e+00 : f32
    %7 = vector.broadcast %cst : f32 to vector<16x256xf32>
    %8 = vector.extract_strided_slice %3 {offsets = [0, 0], sizes = [16, 1], strides = [1, 1]} : vector<16x64xi32> to vector<16x1xi32>
    %9 = vector.extract_strided_slice %5 {offsets = [0, 0], sizes = [16, 1], strides = [1, 1]} : vector<16x64xf32> to vector<16x1xf32>
    %10 = vector.broadcast %8 : vector<16x1xi32> to vector<16x256xi32>
    %11 = arith.cmpi eq, %6, %10 : vector<16x256xi32>
    %cst_8 = arith.constant 0.000000e+00 : f32
    %12 = vector.shape_cast %9 : vector<16x1xf32> to vector<16x1xf32>
    %13 = vector.broadcast %12 : vector<16x1xf32> to vector<16x256xf32>
    %14 = vector.broadcast %cst_8 : f32 to vector<16x256xf32>
    %15 = arith.select %11, %13, %14 : vector<16x256xi1>, vector<16x256xf32>
    %16 = arith.addf %7, %15 : vector<16x256xf32>
    %17 = vector.extract_strided_slice %3 {offsets = [0, 1], sizes = [16, 1], strides = [1, 1]} : vector<16x64xi32> to vector<16x1xi32>
    %18 = vector.extract_strided_slice %5 {offsets = [0, 1], sizes = [16, 1], strides = [1, 1]} : vector<16x64xf32> to vector<16x1xf32>
    %19 = vector.broadcast %17 : vector<16x1xi32> to vector<16x256xi32>
    %20 = arith.cmpi eq, %6, %19 : vector<16x256xi32>
    %cst_9 = arith.constant 0.000000e+00 : f32
    %21 = vector.shape_cast %18 : vector<16x1xf32> to vector<16x1xf32>
    %22 = vector.broadcast %21 : vector<16x1xf32> to vector<16x256xf32>
    %23 = vector.broadcast %cst_9 : f32 to vector<16x256xf32>
    %24 = arith.select %20, %22, %23 : vector<16x256xi1>, vector<16x256xf32>
    %25 = arith.addf %16, %24 : vector<16x256xf32>
    %26 = vector.extract_strided_slice %3 {offsets = [0, 2], sizes = [16, 1], strides = [1, 1]} : vector<16x64xi32> to vector<16x1xi32>
    %27 = vector.extract_strided_slice %5 {offsets = [0, 2], sizes = [16, 1], strides = [1, 1]} : vector<16x64xf32> to vector<16x1xf32>
    %28 = vector.broadcast %26 : vector<16x1xi32> to vector<16x256xi32>
    %29 = arith.cmpi eq, %6, %28 : vector<16x256xi32>
    %cst_10 = arith.constant 0.000000e+00 : f32
    %30 = vector.shape_cast %27 : vector<16x1xf32> to vector<16x1xf32>
    %31 = vector.broadcast %30 : vector<16x1xf32> to vector<16x256xf32>
    %32 = vector.broadcast %cst_10 : f32 to vector<16x256xf32>
    %33 = arith.select %29, %31, %32 : vector<16x256xi1>, vector<16x256xf32>
    %34 = arith.addf %25, %33 : vector<16x256xf32>
    %35 = vector.extract_strided_slice %3 {offsets = [0, 3], sizes = [16, 1], strides = [1, 1]} : vector<16x64xi32> to vector<16x1xi32>
    %36 = vector.extract_strided_slice %5 {offsets = [0, 3], sizes = [16, 1], strides = [1, 1]} : vector<16x64xf32> to vector<16x1xf32>
    %37 = vector.broadcast %35 : vector<16x1xi32> to vector<16x256xi32>
    %38 = arith.cmpi eq, %6, %37 : vector<16x256xi32>
    %cst_11 = arith.constant 0.000000e+00 : f32
    %39 = vector.shape_cast %36 : vector<16x1xf32> to vector<16x1xf32>
    %40 = vector.broadcast %39 : vector<16x1xf32> to vector<16x256xf32>
    %41 = vector.broadcast %cst_11 : f32 to vector<16x256xf32>
    %42 = arith.select %38, %40, %41 : vector<16x256xi1>, vector<16x256xf32>
    %43 = arith.addf %34, %42 : vector<16x256xf32>
    %44 = vector.extract_strided_slice %3 {offsets = [0, 4], sizes = [16, 1], strides = [1, 1]} : vector<16x64xi32> to vector<16x1xi32>
    %45 = vector.extract_strided_slice %5 {offsets = [0, 4], sizes = [16, 1], strides = [1, 1]} : vector<16x64xf32> to vector<16x1xf32>
    %46 = vector.broadcast %44 : vector<16x1xi32> to vector<16x256xi32>
    %47 = arith.cmpi eq, %6, %46 : vector<16x256xi32>
    %cst_12 = arith.constant 0.000000e+00 : f32
    %48 = vector.shape_cast %45 : vector<16x1xf32> to vector<16x1xf32>
    %49 = vector.broadcast %48 : vector<16x1xf32> to vector<16x256xf32>
    %50 = vector.broadcast %cst_12 : f32 to vector<16x256xf32>
    %51 = arith.select %47, %49, %50 : vector<16x256xi1>, vector<16x256xf32>
    %52 = arith.addf %43, %51 : vector<16x256xf32>
    %53 = vector.extract_strided_slice %3 {offsets = [0, 5], sizes = [16, 1], strides = [1, 1]} : vector<16x64xi32> to vector<16x1xi32>
    %54 = vector.extract_strided_slice %5 {offsets = [0, 5], sizes = [16, 1], strides = [1, 1]} : vector<16x64xf32> to vector<16x1xf32>
    %55 = vector.broadcast %53 : vector<16x1xi32> to vector<16x256xi32>
    %56 = arith.cmpi eq, %6, %55 : vector<16x256xi32>
    %cst_13 = arith.constant 0.000000e+00 : f32
    %57 = vector.shape_cast %54 : vector<16x1xf32> to vector<16x1xf32>
    %58 = vector.broadcast %57 : vector<16x1xf32> to vector<16x256xf32>
    %59 = vector.broadcast %cst_13 : f32 to vector<16x256xf32>
    %60 = arith.select %56, %58, %59 : vector<16x256xi1>, vector<16x256xf32>
    %61 = arith.addf %52, %60 : vector<16x256xf32>
    %62 = vector.extract_strided_slice %3 {offsets = [0, 6], sizes = [16, 1], strides = [1, 1]} : vector<16x64xi32> to vector<16x1xi32>
    %63 = vector.extract_strided_slice %5 {offsets = [0, 6], sizes = [16, 1], strides = [1, 1]} : vector<16x64xf32> to vector<16x1xf32>
    %64 = vector.broadcast %62 : vector<16x1xi32> to vector<16x256xi32>
    %65 = arith.cmpi eq, %6, %64 : vector<16x256xi32>
    %cst_14 = arith.constant 0.000000e+00 : f32
    %66 = vector.shape_cast %63 : vector<16x1xf32> to vector<16x1xf32>
    %67 = vector.broadcast %66 : vector<16x1xf32> to vector<16x256xf32>
    %68 = vector.broadcast %cst_14 : f32 to vector<16x256xf32>
    %69 = arith.select %65, %67, %68 : vector<16x256xi1>, vector<16x256xf32>
    %70 = arith.addf %61, %69 : vector<16x256xf32>
    %71 = vector.extract_strided_slice %3 {offsets = [0, 7], sizes = [16, 1], strides = [1, 1]} : vector<16x64xi32> to vector<16x1xi32>
    %72 = vector.extract_strided_slice %5 {offsets = [0, 7], sizes = [16, 1], strides = [1, 1]} : vector<16x64xf32> to vector<16x1xf32>
    %73 = vector.broadcast %71 : vector<16x1xi32> to vector<16x256xi32>
    %74 = arith.cmpi eq, %6, %73 : vector<16x256xi32>
    %cst_15 = arith.constant 0.000000e+00 : f32
    %75 = vector.shape_cast %72 : vector<16x1xf32> to vector<16x1xf32>
    %76 = vector.broadcast %75 : vector<16x1xf32> to vector<16x256xf32>
    %77 = vector.broadcast %cst_15 : f32 to vector<16x256xf32>
    %78 = arith.select %74, %76, %77 : vector<16x256xi1>, vector<16x256xf32>
    %79 = arith.addf %70, %78 : vector<16x256xf32>
    %80 = vector.extract_strided_slice %3 {offsets = [0, 8], sizes = [16, 1], strides = [1, 1]} : vector<16x64xi32> to vector<16x1xi32>
    %81 = vector.extract_strided_slice %5 {offsets = [0, 8], sizes = [16, 1], strides = [1, 1]} : vector<16x64xf32> to vector<16x1xf32>
    %82 = vector.broadcast %80 : vector<16x1xi32> to vector<16x256xi32>
    %83 = arith.cmpi eq, %6, %82 : vector<16x256xi32>
    %cst_16 = arith.constant 0.000000e+00 : f32
    %84 = vector.shape_cast %81 : vector<16x1xf32> to vector<16x1xf32>
    %85 = vector.broadcast %84 : vector<16x1xf32> to vector<16x256xf32>
    %86 = vector.broadcast %cst_16 : f32 to vector<16x256xf32>
    %87 = arith.select %83, %85, %86 : vector<16x256xi1>, vector<16x256xf32>
    %88 = arith.addf %79, %87 : vector<16x256xf32>
    %89 = vector.extract_strided_slice %3 {offsets = [0, 9], sizes = [16, 1], strides = [1, 1]} : vector<16x64xi32> to vector<16x1xi32>
    %90 = vector.extract_strided_slice %5 {offsets = [0, 9], sizes = [16, 1], strides = [1, 1]} : vector<16x64xf32> to vector<16x1xf32>
    %91 = vector.broadcast %89 : vector<16x1xi32> to vector<16x256xi32>
    %92 = arith.cmpi eq, %6, %91 : vector<16x256xi32>
    %cst_17 = arith.constant 0.000000e+00 : f32
    %93 = vector.shape_cast %90 : vector<16x1xf32> to vector<16x1xf32>
    %94 = vector.broadcast %93 : vector<16x1xf32> to vector<16x256xf32>
    %95 = vector.broadcast %cst_17 : f32 to vector<16x256xf32>
    %96 = arith.select %92, %94, %95 : vector<16x256xi1>, vector<16x256xf32>
    %97 = arith.addf %88, %96 : vector<16x256xf32>
    %98 = vector.extract_strided_slice %3 {offsets = [0, 10], sizes = [16, 1], strides = [1, 1]} : vector<16x64xi32> to vector<16x1xi32>
    %99 = vector.extract_strided_slice %5 {offsets = [0, 10], sizes = [16, 1], strides = [1, 1]} : vector<16x64xf32> to vector<16x1xf32>
    %100 = vector.broadcast %98 : vector<16x1xi32> to vector<16x256xi32>
    %101 = arith.cmpi eq, %6, %100 : vector<16x256xi32>
    %cst_18 = arith.constant 0.000000e+00 : f32
    %102 = vector.shape_cast %99 : vector<16x1xf32> to vector<16x1xf32>
    %103 = vector.broadcast %102 : vector<16x1xf32> to vector<16x256xf32>
    %104 = vector.broadcast %cst_18 : f32 to vector<16x256xf32>
    %105 = arith.select %101, %103, %104 : vector<16x256xi1>, vector<16x256xf32>
    %106 = arith.addf %97, %105 : vector<16x256xf32>
    %107 = vector.extract_strided_slice %3 {offsets = [0, 11], sizes = [16, 1], strides = [1, 1]} : vector<16x64xi32> to vector<16x1xi32>
    %108 = vector.extract_strided_slice %5 {offsets = [0, 11], sizes = [16, 1], strides = [1, 1]} : vector<16x64xf32> to vector<16x1xf32>
    %109 = vector.broadcast %107 : vector<16x1xi32> to vector<16x256xi32>
    %110 = arith.cmpi eq, %6, %109 : vector<16x256xi32>
    %cst_19 = arith.constant 0.000000e+00 : f32
    %111 = vector.shape_cast %108 : vector<16x1xf32> to vector<16x1xf32>
    %112 = vector.broadcast %111 : vector<16x1xf32> to vector<16x256xf32>
    %113 = vector.broadcast %cst_19 : f32 to vector<16x256xf32>
    %114 = arith.select %110, %112, %113 : vector<16x256xi1>, vector<16x256xf32>
    %115 = arith.addf %106, %114 : vector<16x256xf32>
    %116 = vector.extract_strided_slice %3 {offsets = [0, 12], sizes = [16, 1], strides = [1, 1]} : vector<16x64xi32> to vector<16x1xi32>
    %117 = vector.extract_strided_slice %5 {offsets = [0, 12], sizes = [16, 1], strides = [1, 1]} : vector<16x64xf32> to vector<16x1xf32>
    %118 = vector.broadcast %116 : vector<16x1xi32> to vector<16x256xi32>
    %119 = arith.cmpi eq, %6, %118 : vector<16x256xi32>
    %cst_20 = arith.constant 0.000000e+00 : f32
    %120 = vector.shape_cast %117 : vector<16x1xf32> to vector<16x1xf32>
    %121 = vector.broadcast %120 : vector<16x1xf32> to vector<16x256xf32>
    %122 = vector.broadcast %cst_20 : f32 to vector<16x256xf32>
    %123 = arith.select %119, %121, %122 : vector<16x256xi1>, vector<16x256xf32>
    %124 = arith.addf %115, %123 : vector<16x256xf32>
    %125 = vector.extract_strided_slice %3 {offsets = [0, 13], sizes = [16, 1], strides = [1, 1]} : vector<16x64xi32> to vector<16x1xi32>
    %126 = vector.extract_strided_slice %5 {offsets = [0, 13], sizes = [16, 1], strides = [1, 1]} : vector<16x64xf32> to vector<16x1xf32>
    %127 = vector.broadcast %125 : vector<16x1xi32> to vector<16x256xi32>
    %128 = arith.cmpi eq, %6, %127 : vector<16x256xi32>
    %cst_21 = arith.constant 0.000000e+00 : f32
    %129 = vector.shape_cast %126 : vector<16x1xf32> to vector<16x1xf32>
    %130 = vector.broadcast %129 : vector<16x1xf32> to vector<16x256xf32>
    %131 = vector.broadcast %cst_21 : f32 to vector<16x256xf32>
    %132 = arith.select %128, %130, %131 : vector<16x256xi1>, vector<16x256xf32>
    %133 = arith.addf %124, %132 : vector<16x256xf32>
    %134 = vector.extract_strided_slice %3 {offsets = [0, 14], sizes = [16, 1], strides = [1, 1]} : vector<16x64xi32> to vector<16x1xi32>
    %135 = vector.extract_strided_slice %5 {offsets = [0, 14], sizes = [16, 1], strides = [1, 1]} : vector<16x64xf32> to vector<16x1xf32>
    %136 = vector.broadcast %134 : vector<16x1xi32> to vector<16x256xi32>
    %137 = arith.cmpi eq, %6, %136 : vector<16x256xi32>
    %cst_22 = arith.constant 0.000000e+00 : f32
    %138 = vector.shape_cast %135 : vector<16x1xf32> to vector<16x1xf32>
    %139 = vector.broadcast %138 : vector<16x1xf32> to vector<16x256xf32>
    %140 = vector.broadcast %cst_22 : f32 to vector<16x256xf32>
    %141 = arith.select %137, %139, %140 : vector<16x256xi1>, vector<16x256xf32>
    %142 = arith.addf %133, %141 : vector<16x256xf32>
    %143 = vector.extract_strided_slice %3 {offsets = [0, 15], sizes = [16, 1], strides = [1, 1]} : vector<16x64xi32> to vector<16x1xi32>
    %144 = vector.extract_strided_slice %5 {offsets = [0, 15], sizes = [16, 1], strides = [1, 1]} : vector<16x64xf32> to vector<16x1xf32>
    %145 = vector.broadcast %143 : vector<16x1xi32> to vector<16x256xi32>
    %146 = arith.cmpi eq, %6, %145 : vector<16x256xi32>
    %cst_23 = arith.constant 0.000000e+00 : f32
    %147 = vector.shape_cast %144 : vector<16x1xf32> to vector<16x1xf32>
    %148 = vector.broadcast %147 : vector<16x1xf32> to vector<16x256xf32>
    %149 = vector.broadcast %cst_23 : f32 to vector<16x256xf32>
    %150 = arith.select %146, %148, %149 : vector<16x256xi1>, vector<16x256xf32>
    %151 = arith.addf %142, %150 : vector<16x256xf32>
    %152 = vector.extract_strided_slice %3 {offsets = [0, 16], sizes = [16, 1], strides = [1, 1]} : vector<16x64xi32> to vector<16x1xi32>
    %153 = vector.extract_strided_slice %5 {offsets = [0, 16], sizes = [16, 1], strides = [1, 1]} : vector<16x64xf32> to vector<16x1xf32>
    %154 = vector.broadcast %152 : vector<16x1xi32> to vector<16x256xi32>
    %155 = arith.cmpi eq, %6, %154 : vector<16x256xi32>
    %cst_24 = arith.constant 0.000000e+00 : f32
    %156 = vector.shape_cast %153 : vector<16x1xf32> to vector<16x1xf32>
    %157 = vector.broadcast %156 : vector<16x1xf32> to vector<16x256xf32>
    %158 = vector.broadcast %cst_24 : f32 to vector<16x256xf32>
    %159 = arith.select %155, %157, %158 : vector<16x256xi1>, vector<16x256xf32>
    %160 = arith.addf %151, %159 : vector<16x256xf32>
    %161 = vector.extract_strided_slice %3 {offsets = [0, 17], sizes = [16, 1], strides = [1, 1]} : vector<16x64xi32> to vector<16x1xi32>
    %162 = vector.extract_strided_slice %5 {offsets = [0, 17], sizes = [16, 1], strides = [1, 1]} : vector<16x64xf32> to vector<16x1xf32>
    %163 = vector.broadcast %161 : vector<16x1xi32> to vector<16x256xi32>
    %164 = arith.cmpi eq, %6, %163 : vector<16x256xi32>
    %cst_25 = arith.constant 0.000000e+00 : f32
    %165 = vector.shape_cast %162 : vector<16x1xf32> to vector<16x1xf32>
    %166 = vector.broadcast %165 : vector<16x1xf32> to vector<16x256xf32>
    %167 = vector.broadcast %cst_25 : f32 to vector<16x256xf32>
    %168 = arith.select %164, %166, %167 : vector<16x256xi1>, vector<16x256xf32>
    %169 = arith.addf %160, %168 : vector<16x256xf32>
    %170 = vector.extract_strided_slice %3 {offsets = [0, 18], sizes = [16, 1], strides = [1, 1]} : vector<16x64xi32> to vector<16x1xi32>
    %171 = vector.extract_strided_slice %5 {offsets = [0, 18], sizes = [16, 1], strides = [1, 1]} : vector<16x64xf32> to vector<16x1xf32>
    %172 = vector.broadcast %170 : vector<16x1xi32> to vector<16x256xi32>
    %173 = arith.cmpi eq, %6, %172 : vector<16x256xi32>
    %cst_26 = arith.constant 0.000000e+00 : f32
    %174 = vector.shape_cast %171 : vector<16x1xf32> to vector<16x1xf32>
    %175 = vector.broadcast %174 : vector<16x1xf32> to vector<16x256xf32>
    %176 = vector.broadcast %cst_26 : f32 to vector<16x256xf32>
    %177 = arith.select %173, %175, %176 : vector<16x256xi1>, vector<16x256xf32>
    %178 = arith.addf %169, %177 : vector<16x256xf32>
    %179 = vector.extract_strided_slice %3 {offsets = [0, 19], sizes = [16, 1], strides = [1, 1]} : vector<16x64xi32> to vector<16x1xi32>
    %180 = vector.extract_strided_slice %5 {offsets = [0, 19], sizes = [16, 1], strides = [1, 1]} : vector<16x64xf32> to vector<16x1xf32>
    %181 = vector.broadcast %179 : vector<16x1xi32> to vector<16x256xi32>
    %182 = arith.cmpi eq, %6, %181 : vector<16x256xi32>
    %cst_27 = arith.constant 0.000000e+00 : f32
    %183 = vector.shape_cast %180 : vector<16x1xf32> to vector<16x1xf32>
    %184 = vector.broadcast %183 : vector<16x1xf32> to vector<16x256xf32>
    %185 = vector.broadcast %cst_27 : f32 to vector<16x256xf32>
    %186 = arith.select %182, %184, %185 : vector<16x256xi1>, vector<16x256xf32>
    %187 = arith.addf %178, %186 : vector<16x256xf32>
    %188 = vector.extract_strided_slice %3 {offsets = [0, 20], sizes = [16, 1], strides = [1, 1]} : vector<16x64xi32> to vector<16x1xi32>
    %189 = vector.extract_strided_slice %5 {offsets = [0, 20], sizes = [16, 1], strides = [1, 1]} : vector<16x64xf32> to vector<16x1xf32>
    %190 = vector.broadcast %188 : vector<16x1xi32> to vector<16x256xi32>
    %191 = arith.cmpi eq, %6, %190 : vector<16x256xi32>
    %cst_28 = arith.constant 0.000000e+00 : f32
    %192 = vector.shape_cast %189 : vector<16x1xf32> to vector<16x1xf32>
    %193 = vector.broadcast %192 : vector<16x1xf32> to vector<16x256xf32>
    %194 = vector.broadcast %cst_28 : f32 to vector<16x256xf32>
    %195 = arith.select %191, %193, %194 : vector<16x256xi1>, vector<16x256xf32>
    %196 = arith.addf %187, %195 : vector<16x256xf32>
    %197 = vector.extract_strided_slice %3 {offsets = [0, 21], sizes = [16, 1], strides = [1, 1]} : vector<16x64xi32> to vector<16x1xi32>
    %198 = vector.extract_strided_slice %5 {offsets = [0, 21], sizes = [16, 1], strides = [1, 1]} : vector<16x64xf32> to vector<16x1xf32>
    %199 = vector.broadcast %197 : vector<16x1xi32> to vector<16x256xi32>
    %200 = arith.cmpi eq, %6, %199 : vector<16x256xi32>
    %cst_29 = arith.constant 0.000000e+00 : f32
    %201 = vector.shape_cast %198 : vector<16x1xf32> to vector<16x1xf32>
    %202 = vector.broadcast %201 : vector<16x1xf32> to vector<16x256xf32>
    %203 = vector.broadcast %cst_29 : f32 to vector<16x256xf32>
    %204 = arith.select %200, %202, %203 : vector<16x256xi1>, vector<16x256xf32>
    %205 = arith.addf %196, %204 : vector<16x256xf32>
    %206 = vector.extract_strided_slice %3 {offsets = [0, 22], sizes = [16, 1], strides = [1, 1]} : vector<16x64xi32> to vector<16x1xi32>
    %207 = vector.extract_strided_slice %5 {offsets = [0, 22], sizes = [16, 1], strides = [1, 1]} : vector<16x64xf32> to vector<16x1xf32>
    %208 = vector.broadcast %206 : vector<16x1xi32> to vector<16x256xi32>
    %209 = arith.cmpi eq, %6, %208 : vector<16x256xi32>
    %cst_30 = arith.constant 0.000000e+00 : f32
    %210 = vector.shape_cast %207 : vector<16x1xf32> to vector<16x1xf32>
    %211 = vector.broadcast %210 : vector<16x1xf32> to vector<16x256xf32>
    %212 = vector.broadcast %cst_30 : f32 to vector<16x256xf32>
    %213 = arith.select %209, %211, %212 : vector<16x256xi1>, vector<16x256xf32>
    %214 = arith.addf %205, %213 : vector<16x256xf32>
    %215 = vector.extract_strided_slice %3 {offsets = [0, 23], sizes = [16, 1], strides = [1, 1]} : vector<16x64xi32> to vector<16x1xi32>
    %216 = vector.extract_strided_slice %5 {offsets = [0, 23], sizes = [16, 1], strides = [1, 1]} : vector<16x64xf32> to vector<16x1xf32>
    %217 = vector.broadcast %215 : vector<16x1xi32> to vector<16x256xi32>
    %218 = arith.cmpi eq, %6, %217 : vector<16x256xi32>
    %cst_31 = arith.constant 0.000000e+00 : f32
    %219 = vector.shape_cast %216 : vector<16x1xf32> to vector<16x1xf32>
    %220 = vector.broadcast %219 : vector<16x1xf32> to vector<16x256xf32>
    %221 = vector.broadcast %cst_31 : f32 to vector<16x256xf32>
    %222 = arith.select %218, %220, %221 : vector<16x256xi1>, vector<16x256xf32>
    %223 = arith.addf %214, %222 : vector<16x256xf32>
    %224 = vector.extract_strided_slice %3 {offsets = [0, 24], sizes = [16, 1], strides = [1, 1]} : vector<16x64xi32> to vector<16x1xi32>
    %225 = vector.extract_strided_slice %5 {offsets = [0, 24], sizes = [16, 1], strides = [1, 1]} : vector<16x64xf32> to vector<16x1xf32>
    %226 = vector.broadcast %224 : vector<16x1xi32> to vector<16x256xi32>
    %227 = arith.cmpi eq, %6, %226 : vector<16x256xi32>
    %cst_32 = arith.constant 0.000000e+00 : f32
    %228 = vector.shape_cast %225 : vector<16x1xf32> to vector<16x1xf32>
    %229 = vector.broadcast %228 : vector<16x1xf32> to vector<16x256xf32>
    %230 = vector.broadcast %cst_32 : f32 to vector<16x256xf32>
    %231 = arith.select %227, %229, %230 : vector<16x256xi1>, vector<16x256xf32>
    %232 = arith.addf %223, %231 : vector<16x256xf32>
    %233 = vector.extract_strided_slice %3 {offsets = [0, 25], sizes = [16, 1], strides = [1, 1]} : vector<16x64xi32> to vector<16x1xi32>
    %234 = vector.extract_strided_slice %5 {offsets = [0, 25], sizes = [16, 1], strides = [1, 1]} : vector<16x64xf32> to vector<16x1xf32>
    %235 = vector.broadcast %233 : vector<16x1xi32> to vector<16x256xi32>
    %236 = arith.cmpi eq, %6, %235 : vector<16x256xi32>
    %cst_33 = arith.constant 0.000000e+00 : f32
    %237 = vector.shape_cast %234 : vector<16x1xf32> to vector<16x1xf32>
    %238 = vector.broadcast %237 : vector<16x1xf32> to vector<16x256xf32>
    %239 = vector.broadcast %cst_33 : f32 to vector<16x256xf32>
    %240 = arith.select %236, %238, %239 : vector<16x256xi1>, vector<16x256xf32>
    %241 = arith.addf %232, %240 : vector<16x256xf32>
    %242 = vector.extract_strided_slice %3 {offsets = [0, 26], sizes = [16, 1], strides = [1, 1]} : vector<16x64xi32> to vector<16x1xi32>
    %243 = vector.extract_strided_slice %5 {offsets = [0, 26], sizes = [16, 1], strides = [1, 1]} : vector<16x64xf32> to vector<16x1xf32>
    %244 = vector.broadcast %242 : vector<16x1xi32> to vector<16x256xi32>
    %245 = arith.cmpi eq, %6, %244 : vector<16x256xi32>
    %cst_34 = arith.constant 0.000000e+00 : f32
    %246 = vector.shape_cast %243 : vector<16x1xf32> to vector<16x1xf32>
    %247 = vector.broadcast %246 : vector<16x1xf32> to vector<16x256xf32>
    %248 = vector.broadcast %cst_34 : f32 to vector<16x256xf32>
    %249 = arith.select %245, %247, %248 : vector<16x256xi1>, vector<16x256xf32>
    %250 = arith.addf %241, %249 : vector<16x256xf32>
    %251 = vector.extract_strided_slice %3 {offsets = [0, 27], sizes = [16, 1], strides = [1, 1]} : vector<16x64xi32> to vector<16x1xi32>
    %252 = vector.extract_strided_slice %5 {offsets = [0, 27], sizes = [16, 1], strides = [1, 1]} : vector<16x64xf32> to vector<16x1xf32>
    %253 = vector.broadcast %251 : vector<16x1xi32> to vector<16x256xi32>
    %254 = arith.cmpi eq, %6, %253 : vector<16x256xi32>
    %cst_35 = arith.constant 0.000000e+00 : f32
    %255 = vector.shape_cast %252 : vector<16x1xf32> to vector<16x1xf32>
    %256 = vector.broadcast %255 : vector<16x1xf32> to vector<16x256xf32>
    %257 = vector.broadcast %cst_35 : f32 to vector<16x256xf32>
    %258 = arith.select %254, %256, %257 : vector<16x256xi1>, vector<16x256xf32>
    %259 = arith.addf %250, %258 : vector<16x256xf32>
    %260 = vector.extract_strided_slice %3 {offsets = [0, 28], sizes = [16, 1], strides = [1, 1]} : vector<16x64xi32> to vector<16x1xi32>
    %261 = vector.extract_strided_slice %5 {offsets = [0, 28], sizes = [16, 1], strides = [1, 1]} : vector<16x64xf32> to vector<16x1xf32>
    %262 = vector.broadcast %260 : vector<16x1xi32> to vector<16x256xi32>
    %263 = arith.cmpi eq, %6, %262 : vector<16x256xi32>
    %cst_36 = arith.constant 0.000000e+00 : f32
    %264 = vector.shape_cast %261 : vector<16x1xf32> to vector<16x1xf32>
    %265 = vector.broadcast %264 : vector<16x1xf32> to vector<16x256xf32>
    %266 = vector.broadcast %cst_36 : f32 to vector<16x256xf32>
    %267 = arith.select %263, %265, %266 : vector<16x256xi1>, vector<16x256xf32>
    %268 = arith.addf %259, %267 : vector<16x256xf32>
    %269 = vector.extract_strided_slice %3 {offsets = [0, 29], sizes = [16, 1], strides = [1, 1]} : vector<16x64xi32> to vector<16x1xi32>
    %270 = vector.extract_strided_slice %5 {offsets = [0, 29], sizes = [16, 1], strides = [1, 1]} : vector<16x64xf32> to vector<16x1xf32>
    %271 = vector.broadcast %269 : vector<16x1xi32> to vector<16x256xi32>
    %272 = arith.cmpi eq, %6, %271 : vector<16x256xi32>
    %cst_37 = arith.constant 0.000000e+00 : f32
    %273 = vector.shape_cast %270 : vector<16x1xf32> to vector<16x1xf32>
    %274 = vector.broadcast %273 : vector<16x1xf32> to vector<16x256xf32>
    %275 = vector.broadcast %cst_37 : f32 to vector<16x256xf32>
    %276 = arith.select %272, %274, %275 : vector<16x256xi1>, vector<16x256xf32>
    %277 = arith.addf %268, %276 : vector<16x256xf32>
    %278 = vector.extract_strided_slice %3 {offsets = [0, 30], sizes = [16, 1], strides = [1, 1]} : vector<16x64xi32> to vector<16x1xi32>
    %279 = vector.extract_strided_slice %5 {offsets = [0, 30], sizes = [16, 1], strides = [1, 1]} : vector<16x64xf32> to vector<16x1xf32>
    %280 = vector.broadcast %278 : vector<16x1xi32> to vector<16x256xi32>
    %281 = arith.cmpi eq, %6, %280 : vector<16x256xi32>
    %cst_38 = arith.constant 0.000000e+00 : f32
    %282 = vector.shape_cast %279 : vector<16x1xf32> to vector<16x1xf32>
    %283 = vector.broadcast %282 : vector<16x1xf32> to vector<16x256xf32>
    %284 = vector.broadcast %cst_38 : f32 to vector<16x256xf32>
    %285 = arith.select %281, %283, %284 : vector<16x256xi1>, vector<16x256xf32>
    %286 = arith.addf %277, %285 : vector<16x256xf32>
    %287 = vector.extract_strided_slice %3 {offsets = [0, 31], sizes = [16, 1], strides = [1, 1]} : vector<16x64xi32> to vector<16x1xi32>
    %288 = vector.extract_strided_slice %5 {offsets = [0, 31], sizes = [16, 1], strides = [1, 1]} : vector<16x64xf32> to vector<16x1xf32>
    %289 = vector.broadcast %287 : vector<16x1xi32> to vector<16x256xi32>
    %290 = arith.cmpi eq, %6, %289 : vector<16x256xi32>
    %cst_39 = arith.constant 0.000000e+00 : f32
    %291 = vector.shape_cast %288 : vector<16x1xf32> to vector<16x1xf32>
    %292 = vector.broadcast %291 : vector<16x1xf32> to vector<16x256xf32>
    %293 = vector.broadcast %cst_39 : f32 to vector<16x256xf32>
    %294 = arith.select %290, %292, %293 : vector<16x256xi1>, vector<16x256xf32>
    %295 = arith.addf %286, %294 : vector<16x256xf32>
    %296 = vector.extract_strided_slice %3 {offsets = [0, 32], sizes = [16, 1], strides = [1, 1]} : vector<16x64xi32> to vector<16x1xi32>
    %297 = vector.extract_strided_slice %5 {offsets = [0, 32], sizes = [16, 1], strides = [1, 1]} : vector<16x64xf32> to vector<16x1xf32>
    %298 = vector.broadcast %296 : vector<16x1xi32> to vector<16x256xi32>
    %299 = arith.cmpi eq, %6, %298 : vector<16x256xi32>
    %cst_40 = arith.constant 0.000000e+00 : f32
    %300 = vector.shape_cast %297 : vector<16x1xf32> to vector<16x1xf32>
    %301 = vector.broadcast %300 : vector<16x1xf32> to vector<16x256xf32>
    %302 = vector.broadcast %cst_40 : f32 to vector<16x256xf32>
    %303 = arith.select %299, %301, %302 : vector<16x256xi1>, vector<16x256xf32>
    %304 = arith.addf %295, %303 : vector<16x256xf32>
    %305 = vector.extract_strided_slice %3 {offsets = [0, 33], sizes = [16, 1], strides = [1, 1]} : vector<16x64xi32> to vector<16x1xi32>
    %306 = vector.extract_strided_slice %5 {offsets = [0, 33], sizes = [16, 1], strides = [1, 1]} : vector<16x64xf32> to vector<16x1xf32>
    %307 = vector.broadcast %305 : vector<16x1xi32> to vector<16x256xi32>
    %308 = arith.cmpi eq, %6, %307 : vector<16x256xi32>
    %cst_41 = arith.constant 0.000000e+00 : f32
    %309 = vector.shape_cast %306 : vector<16x1xf32> to vector<16x1xf32>
    %310 = vector.broadcast %309 : vector<16x1xf32> to vector<16x256xf32>
    %311 = vector.broadcast %cst_41 : f32 to vector<16x256xf32>
    %312 = arith.select %308, %310, %311 : vector<16x256xi1>, vector<16x256xf32>
    %313 = arith.addf %304, %312 : vector<16x256xf32>
    %314 = vector.extract_strided_slice %3 {offsets = [0, 34], sizes = [16, 1], strides = [1, 1]} : vector<16x64xi32> to vector<16x1xi32>
    %315 = vector.extract_strided_slice %5 {offsets = [0, 34], sizes = [16, 1], strides = [1, 1]} : vector<16x64xf32> to vector<16x1xf32>
    %316 = vector.broadcast %314 : vector<16x1xi32> to vector<16x256xi32>
    %317 = arith.cmpi eq, %6, %316 : vector<16x256xi32>
    %cst_42 = arith.constant 0.000000e+00 : f32
    %318 = vector.shape_cast %315 : vector<16x1xf32> to vector<16x1xf32>
    %319 = vector.broadcast %318 : vector<16x1xf32> to vector<16x256xf32>
    %320 = vector.broadcast %cst_42 : f32 to vector<16x256xf32>
    %321 = arith.select %317, %319, %320 : vector<16x256xi1>, vector<16x256xf32>
    %322 = arith.addf %313, %321 : vector<16x256xf32>
    %323 = vector.extract_strided_slice %3 {offsets = [0, 35], sizes = [16, 1], strides = [1, 1]} : vector<16x64xi32> to vector<16x1xi32>
    %324 = vector.extract_strided_slice %5 {offsets = [0, 35], sizes = [16, 1], strides = [1, 1]} : vector<16x64xf32> to vector<16x1xf32>
    %325 = vector.broadcast %323 : vector<16x1xi32> to vector<16x256xi32>
    %326 = arith.cmpi eq, %6, %325 : vector<16x256xi32>
    %cst_43 = arith.constant 0.000000e+00 : f32
    %327 = vector.shape_cast %324 : vector<16x1xf32> to vector<16x1xf32>
    %328 = vector.broadcast %327 : vector<16x1xf32> to vector<16x256xf32>
    %329 = vector.broadcast %cst_43 : f32 to vector<16x256xf32>
    %330 = arith.select %326, %328, %329 : vector<16x256xi1>, vector<16x256xf32>
    %331 = arith.addf %322, %330 : vector<16x256xf32>
    %332 = vector.extract_strided_slice %3 {offsets = [0, 36], sizes = [16, 1], strides = [1, 1]} : vector<16x64xi32> to vector<16x1xi32>
    %333 = vector.extract_strided_slice %5 {offsets = [0, 36], sizes = [16, 1], strides = [1, 1]} : vector<16x64xf32> to vector<16x1xf32>
    %334 = vector.broadcast %332 : vector<16x1xi32> to vector<16x256xi32>
    %335 = arith.cmpi eq, %6, %334 : vector<16x256xi32>
    %cst_44 = arith.constant 0.000000e+00 : f32
    %336 = vector.shape_cast %333 : vector<16x1xf32> to vector<16x1xf32>
    %337 = vector.broadcast %336 : vector<16x1xf32> to vector<16x256xf32>
    %338 = vector.broadcast %cst_44 : f32 to vector<16x256xf32>
    %339 = arith.select %335, %337, %338 : vector<16x256xi1>, vector<16x256xf32>
    %340 = arith.addf %331, %339 : vector<16x256xf32>
    %341 = vector.extract_strided_slice %3 {offsets = [0, 37], sizes = [16, 1], strides = [1, 1]} : vector<16x64xi32> to vector<16x1xi32>
    %342 = vector.extract_strided_slice %5 {offsets = [0, 37], sizes = [16, 1], strides = [1, 1]} : vector<16x64xf32> to vector<16x1xf32>
    %343 = vector.broadcast %341 : vector<16x1xi32> to vector<16x256xi32>
    %344 = arith.cmpi eq, %6, %343 : vector<16x256xi32>
    %cst_45 = arith.constant 0.000000e+00 : f32
    %345 = vector.shape_cast %342 : vector<16x1xf32> to vector<16x1xf32>
    %346 = vector.broadcast %345 : vector<16x1xf32> to vector<16x256xf32>
    %347 = vector.broadcast %cst_45 : f32 to vector<16x256xf32>
    %348 = arith.select %344, %346, %347 : vector<16x256xi1>, vector<16x256xf32>
    %349 = arith.addf %340, %348 : vector<16x256xf32>
    %350 = vector.extract_strided_slice %3 {offsets = [0, 38], sizes = [16, 1], strides = [1, 1]} : vector<16x64xi32> to vector<16x1xi32>
    %351 = vector.extract_strided_slice %5 {offsets = [0, 38], sizes = [16, 1], strides = [1, 1]} : vector<16x64xf32> to vector<16x1xf32>
    %352 = vector.broadcast %350 : vector<16x1xi32> to vector<16x256xi32>
    %353 = arith.cmpi eq, %6, %352 : vector<16x256xi32>
    %cst_46 = arith.constant 0.000000e+00 : f32
    %354 = vector.shape_cast %351 : vector<16x1xf32> to vector<16x1xf32>
    %355 = vector.broadcast %354 : vector<16x1xf32> to vector<16x256xf32>
    %356 = vector.broadcast %cst_46 : f32 to vector<16x256xf32>
    %357 = arith.select %353, %355, %356 : vector<16x256xi1>, vector<16x256xf32>
    %358 = arith.addf %349, %357 : vector<16x256xf32>
    %359 = vector.extract_strided_slice %3 {offsets = [0, 39], sizes = [16, 1], strides = [1, 1]} : vector<16x64xi32> to vector<16x1xi32>
    %360 = vector.extract_strided_slice %5 {offsets = [0, 39], sizes = [16, 1], strides = [1, 1]} : vector<16x64xf32> to vector<16x1xf32>
    %361 = vector.broadcast %359 : vector<16x1xi32> to vector<16x256xi32>
    %362 = arith.cmpi eq, %6, %361 : vector<16x256xi32>
    %cst_47 = arith.constant 0.000000e+00 : f32
    %363 = vector.shape_cast %360 : vector<16x1xf32> to vector<16x1xf32>
    %364 = vector.broadcast %363 : vector<16x1xf32> to vector<16x256xf32>
    %365 = vector.broadcast %cst_47 : f32 to vector<16x256xf32>
    %366 = arith.select %362, %364, %365 : vector<16x256xi1>, vector<16x256xf32>
    %367 = arith.addf %358, %366 : vector<16x256xf32>
    %368 = vector.extract_strided_slice %3 {offsets = [0, 40], sizes = [16, 1], strides = [1, 1]} : vector<16x64xi32> to vector<16x1xi32>
    %369 = vector.extract_strided_slice %5 {offsets = [0, 40], sizes = [16, 1], strides = [1, 1]} : vector<16x64xf32> to vector<16x1xf32>
    %370 = vector.broadcast %368 : vector<16x1xi32> to vector<16x256xi32>
    %371 = arith.cmpi eq, %6, %370 : vector<16x256xi32>
    %cst_48 = arith.constant 0.000000e+00 : f32
    %372 = vector.shape_cast %369 : vector<16x1xf32> to vector<16x1xf32>
    %373 = vector.broadcast %372 : vector<16x1xf32> to vector<16x256xf32>
    %374 = vector.broadcast %cst_48 : f32 to vector<16x256xf32>
    %375 = arith.select %371, %373, %374 : vector<16x256xi1>, vector<16x256xf32>
    %376 = arith.addf %367, %375 : vector<16x256xf32>
    %377 = vector.extract_strided_slice %3 {offsets = [0, 41], sizes = [16, 1], strides = [1, 1]} : vector<16x64xi32> to vector<16x1xi32>
    %378 = vector.extract_strided_slice %5 {offsets = [0, 41], sizes = [16, 1], strides = [1, 1]} : vector<16x64xf32> to vector<16x1xf32>
    %379 = vector.broadcast %377 : vector<16x1xi32> to vector<16x256xi32>
    %380 = arith.cmpi eq, %6, %379 : vector<16x256xi32>
    %cst_49 = arith.constant 0.000000e+00 : f32
    %381 = vector.shape_cast %378 : vector<16x1xf32> to vector<16x1xf32>
    %382 = vector.broadcast %381 : vector<16x1xf32> to vector<16x256xf32>
    %383 = vector.broadcast %cst_49 : f32 to vector<16x256xf32>
    %384 = arith.select %380, %382, %383 : vector<16x256xi1>, vector<16x256xf32>
    %385 = arith.addf %376, %384 : vector<16x256xf32>
    %386 = vector.extract_strided_slice %3 {offsets = [0, 42], sizes = [16, 1], strides = [1, 1]} : vector<16x64xi32> to vector<16x1xi32>
    %387 = vector.extract_strided_slice %5 {offsets = [0, 42], sizes = [16, 1], strides = [1, 1]} : vector<16x64xf32> to vector<16x1xf32>
    %388 = vector.broadcast %386 : vector<16x1xi32> to vector<16x256xi32>
    %389 = arith.cmpi eq, %6, %388 : vector<16x256xi32>
    %cst_50 = arith.constant 0.000000e+00 : f32
    %390 = vector.shape_cast %387 : vector<16x1xf32> to vector<16x1xf32>
    %391 = vector.broadcast %390 : vector<16x1xf32> to vector<16x256xf32>
    %392 = vector.broadcast %cst_50 : f32 to vector<16x256xf32>
    %393 = arith.select %389, %391, %392 : vector<16x256xi1>, vector<16x256xf32>
    %394 = arith.addf %385, %393 : vector<16x256xf32>
    %395 = vector.extract_strided_slice %3 {offsets = [0, 43], sizes = [16, 1], strides = [1, 1]} : vector<16x64xi32> to vector<16x1xi32>
    %396 = vector.extract_strided_slice %5 {offsets = [0, 43], sizes = [16, 1], strides = [1, 1]} : vector<16x64xf32> to vector<16x1xf32>
    %397 = vector.broadcast %395 : vector<16x1xi32> to vector<16x256xi32>
    %398 = arith.cmpi eq, %6, %397 : vector<16x256xi32>
    %cst_51 = arith.constant 0.000000e+00 : f32
    %399 = vector.shape_cast %396 : vector<16x1xf32> to vector<16x1xf32>
    %400 = vector.broadcast %399 : vector<16x1xf32> to vector<16x256xf32>
    %401 = vector.broadcast %cst_51 : f32 to vector<16x256xf32>
    %402 = arith.select %398, %400, %401 : vector<16x256xi1>, vector<16x256xf32>
    %403 = arith.addf %394, %402 : vector<16x256xf32>
    %404 = vector.extract_strided_slice %3 {offsets = [0, 44], sizes = [16, 1], strides = [1, 1]} : vector<16x64xi32> to vector<16x1xi32>
    %405 = vector.extract_strided_slice %5 {offsets = [0, 44], sizes = [16, 1], strides = [1, 1]} : vector<16x64xf32> to vector<16x1xf32>
    %406 = vector.broadcast %404 : vector<16x1xi32> to vector<16x256xi32>
    %407 = arith.cmpi eq, %6, %406 : vector<16x256xi32>
    %cst_52 = arith.constant 0.000000e+00 : f32
    %408 = vector.shape_cast %405 : vector<16x1xf32> to vector<16x1xf32>
    %409 = vector.broadcast %408 : vector<16x1xf32> to vector<16x256xf32>
    %410 = vector.broadcast %cst_52 : f32 to vector<16x256xf32>
    %411 = arith.select %407, %409, %410 : vector<16x256xi1>, vector<16x256xf32>
    %412 = arith.addf %403, %411 : vector<16x256xf32>
    %413 = vector.extract_strided_slice %3 {offsets = [0, 45], sizes = [16, 1], strides = [1, 1]} : vector<16x64xi32> to vector<16x1xi32>
    %414 = vector.extract_strided_slice %5 {offsets = [0, 45], sizes = [16, 1], strides = [1, 1]} : vector<16x64xf32> to vector<16x1xf32>
    %415 = vector.broadcast %413 : vector<16x1xi32> to vector<16x256xi32>
    %416 = arith.cmpi eq, %6, %415 : vector<16x256xi32>
    %cst_53 = arith.constant 0.000000e+00 : f32
    %417 = vector.shape_cast %414 : vector<16x1xf32> to vector<16x1xf32>
    %418 = vector.broadcast %417 : vector<16x1xf32> to vector<16x256xf32>
    %419 = vector.broadcast %cst_53 : f32 to vector<16x256xf32>
    %420 = arith.select %416, %418, %419 : vector<16x256xi1>, vector<16x256xf32>
    %421 = arith.addf %412, %420 : vector<16x256xf32>
    %422 = vector.extract_strided_slice %3 {offsets = [0, 46], sizes = [16, 1], strides = [1, 1]} : vector<16x64xi32> to vector<16x1xi32>
    %423 = vector.extract_strided_slice %5 {offsets = [0, 46], sizes = [16, 1], strides = [1, 1]} : vector<16x64xf32> to vector<16x1xf32>
    %424 = vector.broadcast %422 : vector<16x1xi32> to vector<16x256xi32>
    %425 = arith.cmpi eq, %6, %424 : vector<16x256xi32>
    %cst_54 = arith.constant 0.000000e+00 : f32
    %426 = vector.shape_cast %423 : vector<16x1xf32> to vector<16x1xf32>
    %427 = vector.broadcast %426 : vector<16x1xf32> to vector<16x256xf32>
    %428 = vector.broadcast %cst_54 : f32 to vector<16x256xf32>
    %429 = arith.select %425, %427, %428 : vector<16x256xi1>, vector<16x256xf32>
    %430 = arith.addf %421, %429 : vector<16x256xf32>
    %431 = vector.extract_strided_slice %3 {offsets = [0, 47], sizes = [16, 1], strides = [1, 1]} : vector<16x64xi32> to vector<16x1xi32>
    %432 = vector.extract_strided_slice %5 {offsets = [0, 47], sizes = [16, 1], strides = [1, 1]} : vector<16x64xf32> to vector<16x1xf32>
    %433 = vector.broadcast %431 : vector<16x1xi32> to vector<16x256xi32>
    %434 = arith.cmpi eq, %6, %433 : vector<16x256xi32>
    %cst_55 = arith.constant 0.000000e+00 : f32
    %435 = vector.shape_cast %432 : vector<16x1xf32> to vector<16x1xf32>
    %436 = vector.broadcast %435 : vector<16x1xf32> to vector<16x256xf32>
    %437 = vector.broadcast %cst_55 : f32 to vector<16x256xf32>
    %438 = arith.select %434, %436, %437 : vector<16x256xi1>, vector<16x256xf32>
    %439 = arith.addf %430, %438 : vector<16x256xf32>
    %440 = vector.extract_strided_slice %3 {offsets = [0, 48], sizes = [16, 1], strides = [1, 1]} : vector<16x64xi32> to vector<16x1xi32>
    %441 = vector.extract_strided_slice %5 {offsets = [0, 48], sizes = [16, 1], strides = [1, 1]} : vector<16x64xf32> to vector<16x1xf32>
    %442 = vector.broadcast %440 : vector<16x1xi32> to vector<16x256xi32>
    %443 = arith.cmpi eq, %6, %442 : vector<16x256xi32>
    %cst_56 = arith.constant 0.000000e+00 : f32
    %444 = vector.shape_cast %441 : vector<16x1xf32> to vector<16x1xf32>
    %445 = vector.broadcast %444 : vector<16x1xf32> to vector<16x256xf32>
    %446 = vector.broadcast %cst_56 : f32 to vector<16x256xf32>
    %447 = arith.select %443, %445, %446 : vector<16x256xi1>, vector<16x256xf32>
    %448 = arith.addf %439, %447 : vector<16x256xf32>
    %449 = vector.extract_strided_slice %3 {offsets = [0, 49], sizes = [16, 1], strides = [1, 1]} : vector<16x64xi32> to vector<16x1xi32>
    %450 = vector.extract_strided_slice %5 {offsets = [0, 49], sizes = [16, 1], strides = [1, 1]} : vector<16x64xf32> to vector<16x1xf32>
    %451 = vector.broadcast %449 : vector<16x1xi32> to vector<16x256xi32>
    %452 = arith.cmpi eq, %6, %451 : vector<16x256xi32>
    %cst_57 = arith.constant 0.000000e+00 : f32
    %453 = vector.shape_cast %450 : vector<16x1xf32> to vector<16x1xf32>
    %454 = vector.broadcast %453 : vector<16x1xf32> to vector<16x256xf32>
    %455 = vector.broadcast %cst_57 : f32 to vector<16x256xf32>
    %456 = arith.select %452, %454, %455 : vector<16x256xi1>, vector<16x256xf32>
    %457 = arith.addf %448, %456 : vector<16x256xf32>
    %458 = vector.extract_strided_slice %3 {offsets = [0, 50], sizes = [16, 1], strides = [1, 1]} : vector<16x64xi32> to vector<16x1xi32>
    %459 = vector.extract_strided_slice %5 {offsets = [0, 50], sizes = [16, 1], strides = [1, 1]} : vector<16x64xf32> to vector<16x1xf32>
    %460 = vector.broadcast %458 : vector<16x1xi32> to vector<16x256xi32>
    %461 = arith.cmpi eq, %6, %460 : vector<16x256xi32>
    %cst_58 = arith.constant 0.000000e+00 : f32
    %462 = vector.shape_cast %459 : vector<16x1xf32> to vector<16x1xf32>
    %463 = vector.broadcast %462 : vector<16x1xf32> to vector<16x256xf32>
    %464 = vector.broadcast %cst_58 : f32 to vector<16x256xf32>
    %465 = arith.select %461, %463, %464 : vector<16x256xi1>, vector<16x256xf32>
    %466 = arith.addf %457, %465 : vector<16x256xf32>
    %467 = vector.extract_strided_slice %3 {offsets = [0, 51], sizes = [16, 1], strides = [1, 1]} : vector<16x64xi32> to vector<16x1xi32>
    %468 = vector.extract_strided_slice %5 {offsets = [0, 51], sizes = [16, 1], strides = [1, 1]} : vector<16x64xf32> to vector<16x1xf32>
    %469 = vector.broadcast %467 : vector<16x1xi32> to vector<16x256xi32>
    %470 = arith.cmpi eq, %6, %469 : vector<16x256xi32>
    %cst_59 = arith.constant 0.000000e+00 : f32
    %471 = vector.shape_cast %468 : vector<16x1xf32> to vector<16x1xf32>
    %472 = vector.broadcast %471 : vector<16x1xf32> to vector<16x256xf32>
    %473 = vector.broadcast %cst_59 : f32 to vector<16x256xf32>
    %474 = arith.select %470, %472, %473 : vector<16x256xi1>, vector<16x256xf32>
    %475 = arith.addf %466, %474 : vector<16x256xf32>
    %476 = vector.extract_strided_slice %3 {offsets = [0, 52], sizes = [16, 1], strides = [1, 1]} : vector<16x64xi32> to vector<16x1xi32>
    %477 = vector.extract_strided_slice %5 {offsets = [0, 52], sizes = [16, 1], strides = [1, 1]} : vector<16x64xf32> to vector<16x1xf32>
    %478 = vector.broadcast %476 : vector<16x1xi32> to vector<16x256xi32>
    %479 = arith.cmpi eq, %6, %478 : vector<16x256xi32>
    %cst_60 = arith.constant 0.000000e+00 : f32
    %480 = vector.shape_cast %477 : vector<16x1xf32> to vector<16x1xf32>
    %481 = vector.broadcast %480 : vector<16x1xf32> to vector<16x256xf32>
    %482 = vector.broadcast %cst_60 : f32 to vector<16x256xf32>
    %483 = arith.select %479, %481, %482 : vector<16x256xi1>, vector<16x256xf32>
    %484 = arith.addf %475, %483 : vector<16x256xf32>
    %485 = vector.extract_strided_slice %3 {offsets = [0, 53], sizes = [16, 1], strides = [1, 1]} : vector<16x64xi32> to vector<16x1xi32>
    %486 = vector.extract_strided_slice %5 {offsets = [0, 53], sizes = [16, 1], strides = [1, 1]} : vector<16x64xf32> to vector<16x1xf32>
    %487 = vector.broadcast %485 : vector<16x1xi32> to vector<16x256xi32>
    %488 = arith.cmpi eq, %6, %487 : vector<16x256xi32>
    %cst_61 = arith.constant 0.000000e+00 : f32
    %489 = vector.shape_cast %486 : vector<16x1xf32> to vector<16x1xf32>
    %490 = vector.broadcast %489 : vector<16x1xf32> to vector<16x256xf32>
    %491 = vector.broadcast %cst_61 : f32 to vector<16x256xf32>
    %492 = arith.select %488, %490, %491 : vector<16x256xi1>, vector<16x256xf32>
    %493 = arith.addf %484, %492 : vector<16x256xf32>
    %494 = vector.extract_strided_slice %3 {offsets = [0, 54], sizes = [16, 1], strides = [1, 1]} : vector<16x64xi32> to vector<16x1xi32>
    %495 = vector.extract_strided_slice %5 {offsets = [0, 54], sizes = [16, 1], strides = [1, 1]} : vector<16x64xf32> to vector<16x1xf32>
    %496 = vector.broadcast %494 : vector<16x1xi32> to vector<16x256xi32>
    %497 = arith.cmpi eq, %6, %496 : vector<16x256xi32>
    %cst_62 = arith.constant 0.000000e+00 : f32
    %498 = vector.shape_cast %495 : vector<16x1xf32> to vector<16x1xf32>
    %499 = vector.broadcast %498 : vector<16x1xf32> to vector<16x256xf32>
    %500 = vector.broadcast %cst_62 : f32 to vector<16x256xf32>
    %501 = arith.select %497, %499, %500 : vector<16x256xi1>, vector<16x256xf32>
    %502 = arith.addf %493, %501 : vector<16x256xf32>
    %503 = vector.extract_strided_slice %3 {offsets = [0, 55], sizes = [16, 1], strides = [1, 1]} : vector<16x64xi32> to vector<16x1xi32>
    %504 = vector.extract_strided_slice %5 {offsets = [0, 55], sizes = [16, 1], strides = [1, 1]} : vector<16x64xf32> to vector<16x1xf32>
    %505 = vector.broadcast %503 : vector<16x1xi32> to vector<16x256xi32>
    %506 = arith.cmpi eq, %6, %505 : vector<16x256xi32>
    %cst_63 = arith.constant 0.000000e+00 : f32
    %507 = vector.shape_cast %504 : vector<16x1xf32> to vector<16x1xf32>
    %508 = vector.broadcast %507 : vector<16x1xf32> to vector<16x256xf32>
    %509 = vector.broadcast %cst_63 : f32 to vector<16x256xf32>
    %510 = arith.select %506, %508, %509 : vector<16x256xi1>, vector<16x256xf32>
    %511 = arith.addf %502, %510 : vector<16x256xf32>
    %512 = vector.extract_strided_slice %3 {offsets = [0, 56], sizes = [16, 1], strides = [1, 1]} : vector<16x64xi32> to vector<16x1xi32>
    %513 = vector.extract_strided_slice %5 {offsets = [0, 56], sizes = [16, 1], strides = [1, 1]} : vector<16x64xf32> to vector<16x1xf32>
    %514 = vector.broadcast %512 : vector<16x1xi32> to vector<16x256xi32>
    %515 = arith.cmpi eq, %6, %514 : vector<16x256xi32>
    %cst_64 = arith.constant 0.000000e+00 : f32
    %516 = vector.shape_cast %513 : vector<16x1xf32> to vector<16x1xf32>
    %517 = vector.broadcast %516 : vector<16x1xf32> to vector<16x256xf32>
    %518 = vector.broadcast %cst_64 : f32 to vector<16x256xf32>
    %519 = arith.select %515, %517, %518 : vector<16x256xi1>, vector<16x256xf32>
    %520 = arith.addf %511, %519 : vector<16x256xf32>
    %521 = vector.extract_strided_slice %3 {offsets = [0, 57], sizes = [16, 1], strides = [1, 1]} : vector<16x64xi32> to vector<16x1xi32>
    %522 = vector.extract_strided_slice %5 {offsets = [0, 57], sizes = [16, 1], strides = [1, 1]} : vector<16x64xf32> to vector<16x1xf32>
    %523 = vector.broadcast %521 : vector<16x1xi32> to vector<16x256xi32>
    %524 = arith.cmpi eq, %6, %523 : vector<16x256xi32>
    %cst_65 = arith.constant 0.000000e+00 : f32
    %525 = vector.shape_cast %522 : vector<16x1xf32> to vector<16x1xf32>
    %526 = vector.broadcast %525 : vector<16x1xf32> to vector<16x256xf32>
    %527 = vector.broadcast %cst_65 : f32 to vector<16x256xf32>
    %528 = arith.select %524, %526, %527 : vector<16x256xi1>, vector<16x256xf32>
    %529 = arith.addf %520, %528 : vector<16x256xf32>
    %530 = vector.extract_strided_slice %3 {offsets = [0, 58], sizes = [16, 1], strides = [1, 1]} : vector<16x64xi32> to vector<16x1xi32>
    %531 = vector.extract_strided_slice %5 {offsets = [0, 58], sizes = [16, 1], strides = [1, 1]} : vector<16x64xf32> to vector<16x1xf32>
    %532 = vector.broadcast %530 : vector<16x1xi32> to vector<16x256xi32>
    %533 = arith.cmpi eq, %6, %532 : vector<16x256xi32>
    %cst_66 = arith.constant 0.000000e+00 : f32
    %534 = vector.shape_cast %531 : vector<16x1xf32> to vector<16x1xf32>
    %535 = vector.broadcast %534 : vector<16x1xf32> to vector<16x256xf32>
    %536 = vector.broadcast %cst_66 : f32 to vector<16x256xf32>
    %537 = arith.select %533, %535, %536 : vector<16x256xi1>, vector<16x256xf32>
    %538 = arith.addf %529, %537 : vector<16x256xf32>
    %539 = vector.extract_strided_slice %3 {offsets = [0, 59], sizes = [16, 1], strides = [1, 1]} : vector<16x64xi32> to vector<16x1xi32>
    %540 = vector.extract_strided_slice %5 {offsets = [0, 59], sizes = [16, 1], strides = [1, 1]} : vector<16x64xf32> to vector<16x1xf32>
    %541 = vector.broadcast %539 : vector<16x1xi32> to vector<16x256xi32>
    %542 = arith.cmpi eq, %6, %541 : vector<16x256xi32>
    %cst_67 = arith.constant 0.000000e+00 : f32
    %543 = vector.shape_cast %540 : vector<16x1xf32> to vector<16x1xf32>
    %544 = vector.broadcast %543 : vector<16x1xf32> to vector<16x256xf32>
    %545 = vector.broadcast %cst_67 : f32 to vector<16x256xf32>
    %546 = arith.select %542, %544, %545 : vector<16x256xi1>, vector<16x256xf32>
    %547 = arith.addf %538, %546 : vector<16x256xf32>
    %548 = vector.extract_strided_slice %3 {offsets = [0, 60], sizes = [16, 1], strides = [1, 1]} : vector<16x64xi32> to vector<16x1xi32>
    %549 = vector.extract_strided_slice %5 {offsets = [0, 60], sizes = [16, 1], strides = [1, 1]} : vector<16x64xf32> to vector<16x1xf32>
    %550 = vector.broadcast %548 : vector<16x1xi32> to vector<16x256xi32>
    %551 = arith.cmpi eq, %6, %550 : vector<16x256xi32>
    %cst_68 = arith.constant 0.000000e+00 : f32
    %552 = vector.shape_cast %549 : vector<16x1xf32> to vector<16x1xf32>
    %553 = vector.broadcast %552 : vector<16x1xf32> to vector<16x256xf32>
    %554 = vector.broadcast %cst_68 : f32 to vector<16x256xf32>
    %555 = arith.select %551, %553, %554 : vector<16x256xi1>, vector<16x256xf32>
    %556 = arith.addf %547, %555 : vector<16x256xf32>
    %557 = vector.extract_strided_slice %3 {offsets = [0, 61], sizes = [16, 1], strides = [1, 1]} : vector<16x64xi32> to vector<16x1xi32>
    %558 = vector.extract_strided_slice %5 {offsets = [0, 61], sizes = [16, 1], strides = [1, 1]} : vector<16x64xf32> to vector<16x1xf32>
    %559 = vector.broadcast %557 : vector<16x1xi32> to vector<16x256xi32>
    %560 = arith.cmpi eq, %6, %559 : vector<16x256xi32>
    %cst_69 = arith.constant 0.000000e+00 : f32
    %561 = vector.shape_cast %558 : vector<16x1xf32> to vector<16x1xf32>
    %562 = vector.broadcast %561 : vector<16x1xf32> to vector<16x256xf32>
    %563 = vector.broadcast %cst_69 : f32 to vector<16x256xf32>
    %564 = arith.select %560, %562, %563 : vector<16x256xi1>, vector<16x256xf32>
    %565 = arith.addf %556, %564 : vector<16x256xf32>
    %566 = vector.extract_strided_slice %3 {offsets = [0, 62], sizes = [16, 1], strides = [1, 1]} : vector<16x64xi32> to vector<16x1xi32>
    %567 = vector.extract_strided_slice %5 {offsets = [0, 62], sizes = [16, 1], strides = [1, 1]} : vector<16x64xf32> to vector<16x1xf32>
    %568 = vector.broadcast %566 : vector<16x1xi32> to vector<16x256xi32>
    %569 = arith.cmpi eq, %6, %568 : vector<16x256xi32>
    %cst_70 = arith.constant 0.000000e+00 : f32
    %570 = vector.shape_cast %567 : vector<16x1xf32> to vector<16x1xf32>
    %571 = vector.broadcast %570 : vector<16x1xf32> to vector<16x256xf32>
    %572 = vector.broadcast %cst_70 : f32 to vector<16x256xf32>
    %573 = arith.select %569, %571, %572 : vector<16x256xi1>, vector<16x256xf32>
    %574 = arith.addf %565, %573 : vector<16x256xf32>
    %575 = vector.extract_strided_slice %3 {offsets = [0, 63], sizes = [16, 1], strides = [1, 1]} : vector<16x64xi32> to vector<16x1xi32>
    %576 = vector.extract_strided_slice %5 {offsets = [0, 63], sizes = [16, 1], strides = [1, 1]} : vector<16x64xf32> to vector<16x1xf32>
    %577 = vector.broadcast %575 : vector<16x1xi32> to vector<16x256xi32>
    %578 = arith.cmpi eq, %6, %577 : vector<16x256xi32>
    %cst_71 = arith.constant 0.000000e+00 : f32
    %579 = vector.shape_cast %576 : vector<16x1xf32> to vector<16x1xf32>
    %580 = vector.broadcast %579 : vector<16x1xf32> to vector<16x256xf32>
    %581 = vector.broadcast %cst_71 : f32 to vector<16x256xf32>
    %582 = arith.select %578, %580, %581 : vector<16x256xi1>, vector<16x256xf32>
    %583 = arith.addf %574, %582 : vector<16x256xf32>
    %cst_72 = arith.constant dense<0.000000e+00> : vector<16x4xf32>
    %584 = tpu.matmul %583, %1, %cst_72 {dimension_numbers = #tpu.dot_dimension_numbers<[1], [1], [0], [0], [0, 0, 1, 0], [], []>} : vector<16x256xf32>, vector<4x256xf32>, vector<16x4xf32> -> vector<16x4xf32>
    %c0_73 = arith.constant 0 : index
    %c0_74 = arith.constant 0 : index
    %c0_75 = arith.constant 0 : index
    %585 = vector.load %arg5[%c0_73, %c0_74, %c0_75] : memref<1x16x4xf32, #tpu.memory_space<vmem>>, vector<1x16x4xf32>
    %586 = vector.shape_cast %585 : vector<1x16x4xf32> to vector<16x4xf32>
    %587 = vector.shape_cast %584 : vector<16x4xf32> to vector<1x16x4xf32>
    tpu.vector_store %arg5[%c0_73, %c0_74, %c0_75], %587 {strides = array<i32>} : memref<1x16x4xf32, #tpu.memory_space<vmem>>, vector<1x16x4xf32>,
    return
  }
  func.func @transform_0(%arg0: i32, %arg1: memref<4xi32, #tpu.memory_space<smem>>) -> (i32, i32, i32) {
    %0 = arith.index_cast %arg0 : i32 to index
    %1 = memref.load %arg1[%0] : memref<4xi32, #tpu.memory_space<smem>>
    %c0_i32 = arith.constant 0 : i32
    %c0_i32_0 = arith.constant 0 : i32
    %c0_i32_1 = arith.constant 0 : i32
    return %1, %c0_i32, %c0_i32_0 : i32, i32, i32
  }
  func.func @transform_1(%arg0: i32, %arg1: memref<4xi32, #tpu.memory_space<smem>>) -> (i32, i32, i32) {
    %c0_i32 = arith.constant 0 : i32
    %c0_i32_0 = arith.constant 0 : i32
    %c0_i32_1 = arith.constant 0 : i32
    return %arg0, %c0_i32, %c0_i32_0 : i32, i32, i32
  }
  func.func @transform_2(%arg0: i32, %arg1: memref<4xi32, #tpu.memory_space<smem>>) -> (i32, i32, i32) {
    %c0_i32 = arith.constant 0 : i32
    %c0_i32_0 = arith.constant 0 : i32
    %c0_i32_1 = arith.constant 0 : i32
    return %arg0, %c0_i32, %c0_i32_0 : i32, i32, i32
  }
  func.func @transform_3(%arg0: i32, %arg1: memref<4xi32, #tpu.memory_space<smem>>) -> (i32, i32, i32) {
    %c0_i32 = arith.constant 0 : i32
    %c0_i32_0 = arith.constant 0 : i32
    %c0_i32_1 = arith.constant 0 : i32
    return %arg0, %c0_i32, %c0_i32_0 : i32, i32, i32
  }
}

</mosaic_0001>

<bundles_post_ra>
// kernel: tpu_custom_call.1
= control target key start
LH: loop header
LB: loop body
LE: loop exit
PB: predicated region body
PF: predicated region fallthrough
CT: control target
= control target key end

     0   :  { %s4461_s0 = inlined_call_operand.hbm [shape: s32[4], index: 0, kind: input, shape index: {}]   ;;  %s4462_s1 = inlined_call_operand.hbm [shape: f32[2,4,256], index: 1, kind: input, shape index: {}]   ;;  %s4463_s2 = inlined_call_operand.hbm [shape: s32[4,16,64], index: 2, kind: input, shape index: {}]   ;;  %s4464_s3 = inlined_call_operand.hbm [shape: f32[4,16,64], index: 3, kind: input, shape index: {}]   ;;  %s4465_s4 = inlined_call_operand.vmem [shape: f32[4,16,4], index: 4, kind: output, shape index: {}]  }
   0x1   :  { %4543 = sst [smem:[#allocation64_spill]] %s4463_s2  ;;  %s2447_s17 = scalar_lea.hbm %s4461_s0, 16 }
   0x2   :  { %p2448_p0 = scmp.ne.s32.totalorder %s4461_s0, %s2447_s17  ;;  %p2451_p1 = scmp.lt.u32.totalorder %s2447_s17, %s4461_s0 }
   0x4   :  { %p2453_p2 = pnand %p2451_p1, %p2448_p0 }
   0x6   :  { %2456 = shalt.err (!%p2453_p2)  }
   0x7   :  { %s2613_s22 = smov [#allocation3]  }
   0x8   :  { %10 = dma.hbm_to_smem %s4461_s0, 16, %s2613_s22, [#allocation2] }
   0x9   :  { %2575 = dma.done.wait [#allocation2], 16 }
   0xa   :  { %2576 = vsyncadd [#allocation2], 4294967280 }
   0xb   :  { %12 = sfence }
   0xc   :  { %13 = vsyncpa [#allocation5], 0 }
   0xd   :  { %15 = vsyncpa [#allocation5 + $0x1], 0 }
   0xe   :  { %16 = vsyncpa [#allocation7], 0 }
   0xf   :  { %18 = vsyncpa [#allocation7 + $0x1], 0  ;;  %s2720_s25 = smov 0   ;;  %s2722_s26 = smov 0  }
  0x10   :  { %s2724_s27 = smov 0   ;;  %s2726_s28 = smov 0  }
  0x11   :  { %s2728_s29 = smov 0   ;;  %s2730_s30 = smov 0  }
  0x12   :  { %s2732_s0 = smov 0  }
  0x13 LB: > { %s2756_s5 = sadd.s32 1, %s2611_s0   ;;  %s59_s7 = sadd.s32 1, %s2595_s27  ;;  %s2611_s0 = sphi %s2732_s0, %s4687_s0   ;;  %s2607_s30 = sphi %s2730_s30, %s4686_s30   ;;  %s2603_s29 = sphi %s2728_s29, %s4685_s29   ;;  %s2599_s28 = sphi %s2726_s28, %s4684_s28   ;;  %s2595_s27 = sphi %s2724_s27, %s4683_s27   ;;  %s2591_s26 = sphi %s2722_s26, %s4682_s26   ;;  %s2587_s25 = sphi %s2720_s25, %s4681_s25  }
  0x14   : > { %s56_s6 = ssub.s32 %s2611_s0, %s2756_s5  ;;  %p66_p4 = scmp.ne.s32.totalorder %s2595_s27, %s2591_s26 }
  0x15   : > { %p57_p3 = scmp.eq.s32.totalorder %s56_s6, 0  ;;  %p41_p5 = scmp.eq.s32.totalorder %s2611_s0, 0 }
  0x16   : > { %p4466_p7 = scmp.lt.s32.totalorder %s2611_s0, 4  ;;  %s168_s9 = sand.u32 1, %s2611_s0  }
  0x17   : > { %s2765_s8 = scalar_select %p57_p3, %s2595_s27, %s59_s7  }
  0x18   : > { %p68_p6 = por %p66_p4, %p41_p5  ;;  %s170_s10 = sand.u32 1, %s2595_s27  }
  0x19   : > { %s2772_s11 = sshll.u32 %s170_s10, 4  ;;  %s2161_s12 = sshll.u32 %s2611_s0, 8 }
  0x1a   : > { %s4544_s2 = sld [smem:[#allocation64_spill]]  ;;  %s172_s16 = scalar_lea.vmem [#allocation6], %s2772_s11 }
  0x1b   : > { %s179_s17 = sshll.u32 %s172_s16, 4  ;;  %p2787_p8 = pnand %p4466_p7, %p68_p6  ;;  %s2783_s17 = int_to_ptr.vmem [resolvable:$true] %s179_s17 }
  0x1c   : > { %s2791_s19 = scalar_lea.sflag [#allocation7], %s168_s9 }
  0x1d   : > { %p2459_p10 = pneg %p2787_p8 }
  0x20   : > { %s2780_s15 = scalar_lea.hbm %s4544_s2, %s2161_s12  ;;  %s2462_s23 = scalar_lea.hbm %s4544_s2, 1024 }
  0x21   : > { %s2457_s20 = scalar_lea.hbm %s2780_s15, 256  ;;  %p2463_p13 = scmp.lt.u32.totalorder %s2780_s15, %s4544_s2 }
  0x22   : > { %p2458_p9 = scmp.ne.s32.totalorder %s2780_s15, %s2457_s20  ;;  %p2464_p0 = scmp.lt.u32.totalorder %s2462_s23, %s2457_s20 }
  0x23   : > { %p2466_p2 = scmp.lt.u32.totalorder %s2457_s20, %s2780_s15 }
  0x24   : > { %p2460_p11 = pnand %p2459_p10, %p2458_p9  ;;  %p2465_p1 = por %p2464_p0, %p2463_p13 }
  0x26   : > { %p2461_p12 = pneg %p2460_p11  ;;  %p2467_p3 = por %p2466_p2, %p2465_p1 }
  0x28   : > { %p2468_p4 = pnand %p2467_p3, %p2461_p12 }
  0x2a   : > { %2471 = shalt.err (!%p2468_p4)
}
  0x2b   : > { %s2472_s7 = scalar_lea.vmem %s2783_s17, 256  ;;  %s2614_s9 = smov [#allocation6]  }
  0x2c   : > { %p2473_p6 = scmp.ne.s32.totalorder %s2783_s17, %s2472_s7  ;;  %s2477_s10 = sshll.u32 %s2614_s9, 4  ;;  %s2478_s10 = int_to_ptr.vmem [resolvable:$false] %s2477_s10 }
  0x2d   : > { %s2479_s13 = scalar_lea.vmem %s2478_s10, 512  ;;  %p2480_p7 = scmp.lt.s32.totalorder %s2783_s17, %s2478_s10 }
  0x2e   : > { %p2475_p9 = pnand %p2473_p6, %p2459_p10  ;;  %p2481_p13 = scmp.lt.s32.totalorder %s2479_s13, %s2472_s7 }
  0x30   : > { %p2476_p11 = pneg %p2475_p9  ;;  %p2482_p0 = por %p2481_p13, %p2480_p7 }
  0x32   : > { %p2483_p1 = pnand %p2482_p0, %p2476_p11 }
  0x34   : > { %2486 = shalt.err (!%p2483_p1)
}
  0x35   : > { %s4467_s14 = smov 128   ;;  %s4469_s16 = smov 8  }
  0x36   : > { %2182 = dma.hbm_to_vmem [thread:$0]  (!%p2787_p8), %s2780_s15, 256, %s2783_s17, %s2791_s19, %s4467_s14, %s4467_s14, %s4469_s16  }
  0x37   : > { %p72_p7 = scmp.ne.s32.totalorder %s2591_s26, %s2587_s25  ;;  %p2152_p12 = scmp.ge.s32.totalorder %s2611_s0, 1 }
  0x38   : > { %p208_p2 = scmp.lt.s32.totalorder %s2611_s0, 5  ;;  %s2831_s21 = sadd.s32 4294967295, %s2611_s0  }
  0x39   : > { %s28_s22 = sld [smem:[#allocation3 + %s2611_s0]]  ;;  %s2839_s15 = scalar_lea.hbm %s4464_s3, %s2161_s12 }
  0x3a   : > { %p2826_p3 = pnand %p2152_p12, %p208_p2  ;;  %s29_s17 = sld [smem:[#allocation3 + %s2756_s5]] }
  0x3b   : > { %p40_p4 = scmp.ne.s32.totalorder %s2607_s30, %s2603_s29  ;;  %p46_p6 = scmp.ne.s32.totalorder %s2603_s29, %s2599_s28 }
  0x3c   : > { %s4546_s20 = scalar_select %p2826_p3, 1, 0 }
  0x3d   : > { %s193_s6 = scalar_lea.vmem [#allocation8], %s2772_s11  ;;  %p47_p9 = scmp.eq.s32.totalorder %s2831_s21, 0 }
  0x3e   : > { %s200_s7 = sshll.u32 %s193_s6, 4  ;;  %p2850_p11 = por %p41_p5, %p40_p4  ;;  %s2866_s7 = int_to_ptr.vmem [resolvable:$true] %s200_s7 }
  0x3f   : > { %s4468_s12 = sand.u32 1, %s2607_s30   ;;  %p2855_p13 = por %p47_p9, %p46_p6 }
  0x40   : > { %p2862_p0 = por %p72_p7, %p47_p9  ;;  %s33_s11 = sadd.s32 1, %s2607_s30 }
  0x41   : > { %s4548_s10 = scalar_select %p2855_p13, 1, 0 }
  0x42   : > { %s4549_s28 = scalar_select %p2862_p0, 1, 0 }
  0x43   : > { %s30_s13 = ssub.s32 %s28_s22, %s29_s17  ;;  %s2871_s23 = sshll.u32 %s4468_s12, 3 }
  0x44   : > { %p31_p5 = scmp.eq.s32.totalorder %s30_s13, 0  ;;  %p4550_p1 = scmp.lt.s32.totalorder %s2611_s0, 4 }
  0x45   : > { %s2166_s25 = scalar_select %p2850_p11, [#allocation3], [#allocation9] }
  0x46   : > { %p2877_p12 = pnand %p4550_p1, %p2850_p11  ;;  %p4552_p7 = pmov %p4550_p1 }
  0x47   : > { %s2884_s6 = scalar_select %p31_p5, %s2607_s30, %s33_s11  }
  0x48   : > { %s2167_s14 = scalar_select %p2850_p11, %s2611_s0, 0 }
  0x49   : > { %s4689_s25 = smov (!%p4552_p7, %s2166_s25), [#allocation10]  ;;  %p4553_p2 = pmov %p4550_p1 }
  0x4a   : > { %s2487_s17 = scalar_lea.hbm %s2839_s15, 256  ;;  %s2492_s16 = scalar_lea.hbm %s4464_s3, 1024 }
  0x4b   : > { %s4691_s14 = smov (!%p4553_p2, %s2167_s14), 0  ;;  %p2488_p4 = scmp.ne.s32.totalorder %s2839_s15, %s2487_s17 }
  0x4c   : > { %s2893_s22 = sld [smem:[%s4689_s25 + %s4691_s14]]  ;;  %p2493_p11 = scmp.lt.u32.totalorder %s2839_s15, %s4464_s3 }
  0x4d   : > { %p2490_p6 = pnand %p2488_p4, %p2459_p10  ;;  %p2494_p5 = scmp.lt.u32.totalorder %s2492_s16, %s2487_s17 }
  0x4e   : > { %p2496_p7 = scmp.lt.u32.totalorder %s2487_s17, %s2839_s15 }
  0x4f   : > { %p2491_p9 = pneg %p2490_p6  ;;  %p2495_p1 = por %p2494_p5, %p2493_p11 }
  0x51   : > { %p2497_p2 = por %p2496_p7, %p2495_p1 }
  0x53   : > { %p2498_p0 = pnand %p2497_p2, %p2491_p9 }
  0x55   : > { %2501 = shalt.err (!%p2498_p0)
}
  0x56   : > { %s2502_s0 = scalar_lea.vmem %s2866_s7, 256  ;;  %s2617_s14 = smov [#allocation8]  }
  0x57   : > { %p2503_p4 = scmp.ne.s32.totalorder %s2866_s7, %s2502_s0  ;;  %s2507_s9 = sshll.u32 %s2617_s14, 4  ;;  %s2508_s9 = int_to_ptr.vmem [resolvable:$false] %s2507_s9 }
  0x58   : > { %s2509_s2 = scalar_lea.vmem %s2508_s9, 512  ;;  %p2510_p3 = scmp.lt.s32.totalorder %s2866_s7, %s2508_s9 }
  0x59   : > { %p2505_p6 = pnand %p2503_p4, %p2459_p10  ;;  %p2511_p11 = scmp.lt.s32.totalorder %s2509_s2, %s2502_s0 }
  0x5b   : > { %p2506_p13 = pneg %p2505_p6  ;;  %p2512_p5 = por %p2511_p11, %p2510_p3 }
  0x5d   : > { %p2513_p1 = pnand %p2512_p5, %p2506_p13 }
  0x5f   : > { %2516 = shalt.err (!%p2513_p1)
}
  0x60   : > { %s4554_s16 = smov 8   ;;  %s4555_s12 = smov 128  }
  0x61   : > { %2185 = dma.hbm_to_vmem [thread:$0]  (!%p2787_p8), %s2839_s15, 256, %s2866_s7, %s2791_s19, %s4555_s12, %s4555_s12, %s4554_s16  }
  0x62   : > { %s152_s25 = scalar_lea.vmem [#allocation4], %s2871_s23  ;;  %s2160_s13 = sshll.u32 %s2893_s22, 7 }
  0x63   : > { %s161_s17 = sshll.u32 %s152_s25, 4  ;;  %s2929_s18 = scalar_lea.hbm %s4462_s1, %s2160_s13  ;;  %s2923_s17 = int_to_ptr.vmem [resolvable:$true] %s161_s17 }
  0x64   : > { %s4556_s14 = sand.u32 1, %s2607_s30   ;;  %s2517_s2 = scalar_lea.hbm %s2929_s18, 128 }
  0x65   : > { %s149_s9 = scalar_lea.sflag [#allocation5], %s4556_s14  ;;  %p2518_p10 = scmp.ne.s32.totalorder %s2929_s18, %s2517_s2 }
  0x66   : > { %p2519_p8 = pneg %p2877_p12  ;;  %s2522_s7 = scalar_lea.hbm %s4462_s1, 256 }
  0x67   : > { %p2523_p0 = scmp.lt.u32.totalorder %s2929_s18, %s4462_s1  ;;  %p2524_p9 = scmp.lt.u32.totalorder %s2522_s7, %s2517_s2 }
  0x68   : > { %p2520_p3 = pnand %p2519_p8, %p2518_p10  ;;  %p2526_p2 = scmp.lt.u32.totalorder %s2517_s2, %s2929_s18 }
  0x69   : > { %p2525_p7 = por %p2524_p9, %p2523_p0 }
  0x6a   : > { %p2521_p13 = pneg %p2520_p3 }
  0x6b   : > { %p2527_p4 = por %p2526_p2, %p2525_p7 }
  0x6d   : > { %p2528_p6 = pnand %p2527_p4, %p2521_p13 }
  0x6f   : > { %2531 = shalt.err (!%p2528_p6)
}
  0x70   : > { %s2532_s16 = scalar_lea.vmem %s2923_s17, 128  ;;  %s2618_s12 = smov [#allocation4]  }
  0x71   : > { %p2533_p11 = scmp.ne.s32.totalorder %s2923_s17, %s2532_s16  ;;  %s2537_s25 = sshll.u32 %s2618_s12, 4  ;;  %s2538_s25 = int_to_ptr.vmem [resolvable:$false] %s2537_s25 }
  0x72   : > { %s2539_s13 = scalar_lea.vmem %s2538_s25, 256  ;;  %p2540_p10 = scmp.lt.s32.totalorder %s2923_s17, %s2538_s25 }
  0x73   : > { %p2535_p5 = pnand %p2533_p11, %p2519_p8  ;;  %p2541_p3 = scmp.lt.s32.totalorder %s2539_s13, %s2532_s16 }
  0x75   : > { %p2536_p1 = pneg %p2535_p5  ;;  %p2542_p0 = por %p2541_p3, %p2540_p10 }
  0x77   : > { %p2543_p9 = pnand %p2542_p0, %p2536_p1 }
  0x79   : > { %2546 = shalt.err (!%p2543_p9)
}
  0x7a   : > { %2179 = dma.hbm_to_vmem [thread:$0]  (!%p2877_p12), %s2929_s18, 128, %s2923_s17, %s149_s9  }
  0x7b   : > { %p4557_p13 = scmp.ne.s32.totalorder %s4546_s20, 0 }
  0x7d   : > { %212 = sbr.rel (%p4557_p13) target bundleno = 1183 (0x49f), region = 32 }
  0x84   : > { %s214_s11 = sand.u32 1, %s2603_s29   ;;  %p4558_p8 = scmp.ne.s32.totalorder %s4548_s10, 0 }
  0x85   : > { %s2961_s0 = sshll.u32 %s214_s11, 3  ;;  %s215_s14 = scalar_lea.sflag [#allocation5], %s214_s11 }
  0x86   : > { %s218_s2 = scalar_lea.vmem [#allocation4], %s2961_s0 }
  0x87   : > { %2578 = dma.done.wait (%p4558_p8), %s215_s14, 128  }
  0x88   : > { %2580 = vsyncadd (%p4558_p8), %s215_s14, 4294967168  ;;  %s223_s24 = sand.u32 1, %s2831_s21   ;;  %s225_s17 = sand.u32 1, %s2591_s26  }
  0x89   : > { %s2154_s20 = sshll.u32 %s225_s17, 4  ;;  %s224_s18 = scalar_lea.sflag [#allocation7], %s223_s24 }
  0x8a   : > { %s2970_s9 = scalar_lea.vmem [#allocation6], %s2154_s20  ;;  %p4559_p12 = scmp.ne.s32.totalorder %s4549_s28, 0 }
  0x8c   : > { %2582 = dma.done.wait (%p4559_p12), %s224_s18, 512  }
  0x8d   : > { %2584 = vsyncadd (%p4559_p12), %s224_s18, 4294966784  ;;  %v2619_v0 = vmov 0   ;;  %v2977_v1 = vld [vmem:[%s2970_s9] sm:$0xff]  ;;  %s2979_s10 = scalar_lea.vmem [#allocation8], %s2154_s20  ;;  %v2987_v3 = vld [vmem:[%s2970_s9 + $0x8] sm:$0xff]  ;;  %v2620_v5 = vmov 1  }
  0x8e   : > { %2311 = vset.pattern.permute.xlu1 %v2619_v0  ;;  %2310 = vset.pattern.permute.xlu0 %v2619_v0  ;;  %v2982_v2 = vld [vmem:[%s2979_s10] sm:$0xff]  ;;  %v2990_v4 = vld [vmem:[%s2979_s10 + $0x8] sm:$0xff]  ;;  %v2621_v6 = vmov 2   ;;  %v2622_v7 = vmov 3   ;;  %v2623_v8 = vmov 4   ;;  %v2624_v9 = vmov 5  }
  0x8f   : > { %295 = vperm.xlu1 %2311, %v2982_v2   ;;  %284 = vperm.xlu0 %2310, %v2977_v1   ;;  %v2625_v10 = vmov 6   ;;  %v2626_v11 = vmov 7   ;;  %v2627_v12 = vmov 8   ;;  %v2628_v13 = vmov 9   ;;  %p270_p7 = scmp.lt.s32.totalorder %s2831_s21, 3 }
  0x90   : > { %v2629_v14 = vmov 10   ;;  %v2630_v15 = vmov 11   ;;  %v2631_v16 = vmov 12   ;;  %v2632_v17 = vmov 13  }
  0x91   : > { %v2633_v18 = vmov 14   ;;  %v2634_v19 = vmov 15   ;;  %v2635_v20 = vmov 16   ;;  %v2636_v21 = vmov 17   ;;  %s4693_s21 = smov (!%p270_p7, %s2831_s21), 3 }
  0x92   : > { %v2637_v23 = vmov 18   ;;  %v2638_v25 = vmov 19   ;;  %v2639_v28 = vmov 20   ;;  %v2640_v30 = vmov 21   ;;  %s2163_s28 = sshll.u32 %s4693_s21, 4 }
  0x93   : > { %300 = vperm.xlu1 %2311, %v2990_v4   ;;  %287 = vperm.xlu0 %2310, %v2987_v3   ;;  %v2641_v33 = vmov 22   ;;  %v2642_v36 = vmov 23   ;;  %v2643_v39 = vmov 24   ;;  %v2644_v41 = vmov 25   ;;  %s274_s7 = scalar_lea.vmem %s4465_s4, %s2163_s28 }
  0x94   : > { %v2645_v44 = vmov 26   ;;  %v2646_v46 = vmov 27   ;;  %v2647_v49 = vmov 28   ;;  %v4481_v51 = vmov 29  }
  0x95   : > { %v4480_v54 = vmov 30   ;;  %v4479_v56 = vmov 31   ;;  %v4478_v60 = vmov 32   ;;  %v4476_v63 = vmov 33  }
  0x97   : > { %2313 = vset.pattern.permute.xlu1 %v2620_v5  ;;  %2312 = vset.pattern.permute.xlu0 %v2620_v5 }
  0x98   : > { %315 = vperm.xlu1 %2313, %v2987_v3   ;;  %312 = vperm.xlu0 %2312, %v2977_v1  }
  0x9c   : > { %322 = vperm.xlu1 %2313, %v2982_v2   ;;  %326 = vperm.xlu0 %2312, %v2990_v4  }
  0xa0   : > { %2314 = vset.pattern.permute.xlu1 %v2621_v6  ;;  %2315 = vset.pattern.permute.xlu0 %v2621_v6 }
  0xa1   : > { %338 = vperm.xlu1 %2314, %v2977_v1   ;;  %341 = vperm.xlu0 %2315, %v2987_v3  }
  0xa5   : > { %348 = vperm.xlu1 %2314, %v2982_v2   ;;  %2316 = vset.pattern.permute.xlu0 %v2622_v7 }
  0xa6   : > { %364 = vperm.xlu0 %2316, %v2977_v1  }
  0xa9   : > { %352 = vperm.xlu1 %2314, %v2990_v4  }
  0xaa   : > { %378 = vperm.xlu0 %2316, %v2990_v4  }
  0xad   : > { %2317 = vset.pattern.permute.xlu1 %v2622_v7 }
  0xae   : > { %367 = vperm.xlu1 %2317, %v2987_v3   ;;  %2319 = vset.pattern.permute.xlu0 %v2623_v8 }
  0xaf   : > { %393 = vperm.xlu0 %2319, %v2987_v3  }
  0xb2   : > { %374 = vperm.xlu1 %2317, %v2982_v2  }
  0xb3   : > { %2320 = vset.pattern.permute.xlu0 %v2624_v9 }
  0xb4   : > { %416 = vperm.xlu0 %2320, %v2977_v1  }
  0xb6   : > { %2318 = vset.pattern.permute.xlu1 %v2623_v8 }
  0xb7   : > { %390 = vperm.xlu1 %2318, %v2977_v1  }
  0xb8   : > { %430 = vperm.xlu0 %2320, %v2990_v4  }
  0xbb   : > { %400 = vperm.xlu1 %2318, %v2982_v2  }
  0xbc   : > { %2323 = vset.pattern.permute.xlu0 %v2625_v10 }
  0xbd   : > { %445 = vperm.xlu0 %2323, %v2987_v3  }
  0xbf   : > { %404 = vperm.xlu1 %2318, %v2990_v4  }
  0xc1   : > { %2324 = vset.pattern.permute.xlu0 %v2626_v11 }
  0xc2   : > { %468 = vperm.xlu0 %2324, %v2977_v1  }
  0xc3   : > { %2321 = vset.pattern.permute.xlu1 %v2624_v9  ;;  %v4475_v9 = vmov 34  }
  0xc4   : > { %419 = vperm.xlu1 %2321, %v2987_v3  }
  0xc6   : > { %482 = vperm.xlu0 %2324, %v2990_v4  }
  0xc8   : > { %426 = vperm.xlu1 %2321, %v2982_v2  }
  0xca   : > { %2327 = vset.pattern.permute.xlu0 %v2627_v12 }
  0xcb   : > { %497 = vperm.xlu0 %2327, %v2987_v3  }
  0xcc   : > { %2322 = vset.pattern.permute.xlu1 %v2625_v10 }
  0xcd   : > { %442 = vperm.xlu1 %2322, %v2977_v1  }
  0xcf   : > { %2328 = vset.pattern.permute.xlu0 %v2628_v13 }
  0xd0   : > { %520 = vperm.xlu0 %2328, %v2977_v1  }
  0xd1   : > { %452 = vperm.xlu1 %2322, %v2982_v2  }
  0xd4   : > { %534 = vperm.xlu0 %2328, %v2990_v4  }
  0xd5   : > { %456 = vperm.xlu1 %2322, %v2990_v4  }
  0xd8   : > { %2331 = vset.pattern.permute.xlu0 %v2629_v14 }
  0xd9   : > { %2325 = vset.pattern.permute.xlu1 %v2626_v11  ;;  %549 = vperm.xlu0 %2331, %v2987_v3  }
  0xda   : > { %471 = vperm.xlu1 %2325, %v2987_v3  }
  0xdd   : > { %2332 = vset.pattern.permute.xlu0 %v2630_v15 }
  0xde   : > { %478 = vperm.xlu1 %2325, %v2982_v2   ;;  %572 = vperm.xlu0 %2332, %v2977_v1  }
  0xe2   : > { %2326 = vset.pattern.permute.xlu1 %v2627_v12  ;;  %586 = vperm.xlu0 %2332, %v2990_v4  }
  0xe3   : > { %494 = vperm.xlu1 %2326, %v2977_v1  }
  0xe6   : > { %2335 = vset.pattern.permute.xlu0 %v2631_v16 }
  0xe7   : > { %504 = vperm.xlu1 %2326, %v2982_v2   ;;  %601 = vperm.xlu0 %2335, %v2987_v3  }
  0xeb   : > { %508 = vperm.xlu1 %2326, %v2990_v4   ;;  %2336 = vset.pattern.permute.xlu0 %v2632_v17 }
  0xec   : > { %624 = vperm.xlu0 %2336, %v2977_v1  }
  0xef   : > { %2329 = vset.pattern.permute.xlu1 %v2628_v13 }
  0xf0   : > { %523 = vperm.xlu1 %2329, %v2987_v3   ;;  %638 = vperm.xlu0 %2336, %v2990_v4  }
  0xf4   : > { %530 = vperm.xlu1 %2329, %v2982_v2   ;;  %2339 = vset.pattern.permute.xlu0 %v2633_v18 }
  0xf5   : > { %653 = vperm.xlu0 %2339, %v2987_v3  }
  0xf8   : > { %2330 = vset.pattern.permute.xlu1 %v2629_v14  ;;  %v4474_v14 = vmov 35  }
  0xf9   : > { %546 = vperm.xlu1 %2330, %v2977_v1   ;;  %2340 = vset.pattern.permute.xlu0 %v2634_v19 }
  0xfa   : > { %676 = vperm.xlu0 %2340, %v2977_v1  }
  0xfd   : > { %556 = vperm.xlu1 %2330, %v2982_v2  }
  0xfe   : > { %690 = vperm.xlu0 %2340, %v2990_v4  }
 0x101   : > { %560 = vperm.xlu1 %2330, %v2990_v4  }
 0x102   : > { %2343 = vset.pattern.permute.xlu0 %v2635_v20 }
 0x103   : > { %705 = vperm.xlu0 %2343, %v2987_v3  }
 0x105   : > { %2333 = vset.pattern.permute.xlu1 %v2630_v15 }
 0x106   : > { %575 = vperm.xlu1 %2333, %v2987_v3  }
 0x107   : > { %2344 = vset.pattern.permute.xlu0 %v2636_v21 }
 0x108   : > { %728 = vperm.xlu0 %2344, %v2977_v1  }
 0x10a   : > { %582 = vperm.xlu1 %2333, %v2982_v2  }
 0x10c   : > { %742 = vperm.xlu0 %2344, %v2990_v4  }
 0x10e   : > { %v3048_v22 = vpop.permute.xlu1 %295  ;;  %2334 = vset.pattern.permute.xlu1 %v2631_v16  ;;  %v3152_v58 = vpop.permute.xlu0 %284 }
 0x10f   : > { %598 = vperm.xlu1 %2334, %v2977_v1  }
 0x110   : > { %2347 = vset.pattern.permute.xlu0 %v2637_v23 }
 0x111   : > { %757 = vperm.xlu0 %2347, %v2987_v3  }
 0x112   : > { %v3053_v24 = vpop.permute.xlu1 %300  ;;  %v3159_v61 = vpop.permute.xlu0 %287 }
 0x113   : > { %608 = vperm.xlu1 %2334, %v2982_v2  }
 0x115   : > { %2348 = vset.pattern.permute.xlu0 %v2638_v25 }
 0x116   : > { %780 = vperm.xlu0 %2348, %v2977_v1  }
 0x117   : > { %v3058_v26 = vpop.permute.xlu1 %315  ;;  %612 = vperm.xlu1 %2334, %v2990_v4   ;;  %v3171_v5 = vpop.permute.xlu0 %312 }
 0x11a   : > { %794 = vperm.xlu0 %2348, %v2990_v4  }
 0x11b   : > { %v3062_v27 = vpop.permute.xlu1 %322  ;;  %2337 = vset.pattern.permute.xlu1 %v2632_v17  ;;  %v3178_v7 = vpop.permute.xlu0 %326 }
 0x11c   : > { %627 = vperm.xlu1 %2337, %v2987_v3  }
 0x11e   : > { %2351 = vset.pattern.permute.xlu0 %v2639_v28 }
 0x11f   : > { %809 = vperm.xlu0 %2351, %v2987_v3  }
 0x120   : > { %634 = vperm.xlu1 %2337, %v2982_v2   ;;  %v3068_v29 = vpop.permute.xlu1 %338  ;;  %v3185_v10 = vpop.permute.xlu0 %341 }
 0x123   : > { %2352 = vset.pattern.permute.xlu0 %v2640_v30 }
 0x124   : > { %2338 = vset.pattern.permute.xlu1 %v2633_v18  ;;  %v3071_v31 = vpop.permute.xlu1 %348  ;;  %832 = vperm.xlu0 %2352, %v2977_v1  }
 0x125   : > { %650 = vperm.xlu1 %2338, %v2977_v1   ;;  %v3190_v12 = vpop.permute.xlu0 %364 }
 0x128   : > { %v3075_v32 = vpop.permute.xlu1 %352  ;;  %846 = vperm.xlu0 %2352, %v2990_v4  }
 0x129   : > { %660 = vperm.xlu1 %2338, %v2982_v2   ;;  %v3201_v16 = vpop.permute.xlu0 %378 }
 0x12c   : > { %2355 = vset.pattern.permute.xlu0 %v2641_v33 }
 0x12d   : > { %664 = vperm.xlu1 %2338, %v2990_v4   ;;  %v3081_v34 = vpop.permute.xlu1 %367  ;;  %861 = vperm.xlu0 %2355, %v2987_v3  }
 0x12e   : > { %v3207_v18 = vpop.permute.xlu0 %393 }
 0x131   : > { %2341 = vset.pattern.permute.xlu1 %v2634_v19  ;;  %v3084_v35 = vpop.permute.xlu1 %374  ;;  %2356 = vset.pattern.permute.xlu0 %v2642_v36  ;;  %v4472_v19 = vmov 36  }
 0x132   : > { %679 = vperm.xlu1 %2341, %v2987_v3   ;;  %884 = vperm.xlu0 %2356, %v2977_v1  }
 0x136   : > { %686 = vperm.xlu1 %2341, %v2982_v2   ;;  %v3090_v37 = vpop.permute.xlu1 %390  ;;  %898 = vperm.xlu0 %2356, %v2990_v4  }
 0x13a   : > { %2342 = vset.pattern.permute.xlu1 %v2635_v20  ;;  %v3093_v38 = vpop.permute.xlu1 %400  ;;  %2359 = vset.pattern.permute.xlu0 %v2643_v39 }
 0x13b   : > { %702 = vperm.xlu1 %2342, %v2977_v1   ;;  %913 = vperm.xlu0 %2359, %v2987_v3  }
 0x13e   : > { %v3098_v40 = vpop.permute.xlu1 %404 }
 0x13f   : > { %712 = vperm.xlu1 %2342, %v2982_v2   ;;  %2360 = vset.pattern.permute.xlu0 %v2644_v41 }
 0x140   : > { %936 = vperm.xlu0 %2360, %v2977_v1  }
 0x143   : > { %716 = vperm.xlu1 %2342, %v2990_v4   ;;  %v3104_v42 = vpop.permute.xlu1 %419 }
 0x144   : > { %950 = vperm.xlu0 %2360, %v2990_v4  }
 0x147   : > { %2345 = vset.pattern.permute.xlu1 %v2636_v21  ;;  %v3108_v43 = vpop.permute.xlu1 %426  ;;  %v3215_v21 = vpop.permute.xlu0 %416 }
 0x148   : > { %731 = vperm.xlu1 %2345, %v2987_v3   ;;  %2363 = vset.pattern.permute.xlu0 %v2645_v44 }
 0x149   : > { %965 = vperm.xlu0 %2363, %v2987_v3  }
 0x14c   : > { %738 = vperm.xlu1 %2345, %v2982_v2   ;;  %v3114_v45 = vpop.permute.xlu1 %442 }
 0x14d   : > { %2364 = vset.pattern.permute.xlu0 %v2646_v46 }
 0x14e   : > { %988 = vperm.xlu0 %2364, %v2977_v1  }
 0x150   : > { %2346 = vset.pattern.permute.xlu1 %v2637_v23  ;;  %v3119_v47 = vpop.permute.xlu1 %452 }
 0x151   : > { %754 = vperm.xlu1 %2346, %v2977_v1  }
 0x152   : > { %1002 = vperm.xlu0 %2364, %v2990_v4  }
 0x154   : > { %v3123_v48 = vpop.permute.xlu1 %456 }
 0x155   : > { %764 = vperm.xlu1 %2346, %v2982_v2  }
 0x156   : > { %2367 = vset.pattern.permute.xlu0 %v2647_v49 }
 0x157   : > { %1017 = vperm.xlu0 %2367, %v2987_v3  }
 0x159   : > { %768 = vperm.xlu1 %2346, %v2990_v4   ;;  %v3129_v50 = vpop.permute.xlu1 %471 }
 0x15b   : > { %2368 = vset.pattern.permute.xlu0 %v4481_v51  ;;  %v4487_v51 = vmov 40  }
 0x15c   : > { %1040 = vperm.xlu0 %2368, %v2977_v1  }
 0x15d   : > { %2349 = vset.pattern.permute.xlu1 %v2638_v25  ;;  %v3134_v52 = vpop.permute.xlu1 %478  ;;  %v3220_v25 = vpop.permute.xlu0 %430 }
 0x15e   : > { %783 = vperm.xlu1 %2349, %v2987_v3  }
 0x160   : > { %1054 = vperm.xlu0 %2368, %v2990_v4  }
 0x162   : > { %790 = vperm.xlu1 %2349, %v2982_v2   ;;  %v3139_v53 = vpop.permute.xlu1 %494 }
 0x164   : > { %2371 = vset.pattern.permute.xlu0 %v4480_v54 }
 0x165   : > { %1069 = vperm.xlu0 %2371, %v2987_v3  }
 0x166   : > { %2350 = vset.pattern.permute.xlu1 %v2639_v28  ;;  %v3144_v55 = vpop.permute.xlu1 %504 }
 0x167   : > { %806 = vperm.xlu1 %2350, %v2977_v1  }
 0x169   : > { %2372 = vset.pattern.permute.xlu0 %v4479_v56 }
 0x16a   : > { %v3148_v57 = vpop.permute.xlu1 %508  ;;  %1092 = vperm.xlu0 %2372, %v2977_v1  }
 0x16b   : > { %816 = vperm.xlu1 %2350, %v2982_v2  }
 0x16e   : > { %1106 = vperm.xlu0 %2372, %v2990_v4  }
 0x16f   : > { %820 = vperm.xlu1 %2350, %v2990_v4   ;;  %v3156_v59 = vpop.permute.xlu1 %523 }
 0x172   : > { %2375 = vset.pattern.permute.xlu0 %v4478_v60 }
 0x173   : > { %2353 = vset.pattern.permute.xlu1 %v2640_v30  ;;  %v3162_v62 = vpop.permute.xlu1 %530  ;;  %1121 = vperm.xlu0 %2375, %v2987_v3   ;;  %v4473_v30 = vmov 37  }
 0x174   : > { %835 = vperm.xlu1 %2353, %v2987_v3  }
 0x177   : > { %2376 = vset.pattern.permute.xlu0 %v4476_v63 }
 0x178   : > { %842 = vperm.xlu1 %2353, %v2982_v2   ;;  %v3168_v0 = vpop.permute.xlu1 %546  ;;  %1144 = vperm.xlu0 %2376, %v2977_v1  }
 0x17c   : > { %2354 = vset.pattern.permute.xlu1 %v2641_v33  ;;  %v3174_v6 = vpop.permute.xlu1 %556  ;;  %1158 = vperm.xlu0 %2376, %v2990_v4   ;;  %v3228_v33 = vpop.permute.xlu0 %445 }
 0x17d   : > { %858 = vperm.xlu1 %2354, %v2977_v1  }
 0x180   : > { %v3180_v8 = vpop.permute.xlu1 %560  ;;  %2379 = vset.pattern.permute.xlu0 %v4475_v9 }
 0x181   : > { %868 = vperm.xlu1 %2354, %v2982_v2   ;;  %1173 = vperm.xlu0 %2379, %v2987_v3  }
 0x185   : > { %872 = vperm.xlu1 %2354, %v2990_v4   ;;  %v3188_v11 = vpop.permute.xlu1 %575  ;;  %2380 = vset.pattern.permute.xlu0 %v4474_v14 }
 0x186   : > { %1196 = vperm.xlu0 %2380, %v2977_v1  }
 0x189   : > { %2357 = vset.pattern.permute.xlu1 %v2642_v36  ;;  %v3193_v13 = vpop.permute.xlu1 %582 }
 0x18a   : > { %887 = vperm.xlu1 %2357, %v2987_v3   ;;  %1210 = vperm.xlu0 %2380, %v2990_v4  }
 0x18e   : > { %894 = vperm.xlu1 %2357, %v2982_v2   ;;  %v3199_v15 = vpop.permute.xlu1 %598  ;;  %2383 = vset.pattern.permute.xlu0 %v4472_v19  ;;  %v4477_v19 = vmov 38  }
 0x18f   : > { %4560 = vst [vmem:[#allocation14_spill] sm:$0xff] %v3199_v15  ;;  %1225 = vperm.xlu0 %2383, %v2987_v3  }
 0x192   : > { %2358 = vset.pattern.permute.xlu1 %v2643_v39  ;;  %v3205_v17 = vpop.permute.xlu1 %608 }
 0x193   : > { %4561 = vst [vmem:[#allocation15_spill] sm:$0xff] %v3205_v17  ;;  %910 = vperm.xlu1 %2358, %v2977_v1   ;;  %2384 = vset.pattern.permute.xlu0 %v4473_v30 }
 0x194   : > { %1248 = vperm.xlu0 %2384, %v2977_v1  }
 0x196   : > { %v3212_v20 = vpop.permute.xlu1 %612 }
 0x197   : > { %4562 = vst [vmem:[#allocation16_spill] sm:$0xff] %v3212_v20  ;;  %920 = vperm.xlu1 %2358, %v2982_v2  }
 0x198   : > { %1262 = vperm.xlu0 %2384, %v2990_v4  }
 0x19b   : > { %924 = vperm.xlu1 %2358, %v2990_v4   ;;  %v3218_v23 = vpop.permute.xlu1 %627 }
 0x19c   : > { %4563 = vst [vmem:[#allocation17_spill] sm:$0xff] %v3218_v23  ;;  %2387 = vset.pattern.permute.xlu0 %v4477_v19  ;;  %v4482_v19 = vmov 39  }
 0x19d   : > { %1277 = vperm.xlu0 %2387, %v2987_v3  }
 0x19f   : > { %2361 = vset.pattern.permute.xlu1 %v2644_v41  ;;  %v3223_v28 = vpop.permute.xlu1 %634  ;;  %v3237_v41 = vpop.permute.xlu0 %468 }
 0x1a0   : > { %4564 = vst [vmem:[#allocation18_spill] sm:$0xff] %v3223_v28  ;;  %939 = vperm.xlu1 %2361, %v2987_v3  }
 0x1a1   : > { %2388 = vset.pattern.permute.xlu0 %v4482_v19 }
 0x1a2   : > { %1300 = vperm.xlu0 %2388, %v2977_v1  }
 0x1a3   : > { %v3245_v14 = vpop.permute.xlu0 %482 }
 0x1a4   : > { %946 = vperm.xlu1 %2361, %v2982_v2   ;;  %v3231_v36 = vpop.permute.xlu1 %650 }
 0x1a5   : > { %4565 = vst [vmem:[#allocation19_spill] sm:$0xff] %v3231_v36 }
 0x1a6   : > { %1314 = vperm.xlu0 %2388, %v2990_v4  }
 0x1a7   : > { %v3250_v9 = vpop.permute.xlu0 %497 }
 0x1a8   : > { %2362 = vset.pattern.permute.xlu1 %v2645_v44  ;;  %v3235_v39 = vpop.permute.xlu1 %660 }
 0x1a9   : > { %4566 = vst [vmem:[#allocation20_spill] sm:$0xff] %v3235_v39  ;;  %962 = vperm.xlu1 %2362, %v2977_v1   ;;  %v4498_v39 = vmov 42  }
 0x1aa   : > { %2391 = vset.pattern.permute.xlu0 %v4487_v51  ;;  %v4493_v51 = vmov 41  }
 0x1ab   : > { %v3258_v60 = vpop.permute.xlu0 %520  ;;  %1329 = vperm.xlu0 %2391, %v2987_v3  }
 0x1ac   : > { %v3242_v30 = vpop.permute.xlu1 %664 }
 0x1ad   : > { %4567 = vst [vmem:[#allocation21_spill] sm:$0xff] %v3242_v30  ;;  %972 = vperm.xlu1 %2362, %v2982_v2  }
 0x1af   : > { %v3267_v54 = vpop.permute.xlu0 %534  ;;  %2392 = vset.pattern.permute.xlu0 %v4493_v51 }
 0x1b0   : > { %1352 = vperm.xlu0 %2392, %v2977_v1  }
 0x1b1   : > { %976 = vperm.xlu1 %2362, %v2990_v4   ;;  %v3248_v44 = vpop.permute.xlu1 %679 }
 0x1b2   : > { %4568 = vst [vmem:[#allocation22_spill] sm:$0xff] %v3248_v44 }
 0x1b4   : > { %1366 = vperm.xlu0 %2392, %v2990_v4  }
 0x1b5   : > { %2365 = vset.pattern.permute.xlu1 %v2646_v46  ;;  %v3253_v63 = vpop.permute.xlu1 %686 }
 0x1b6   : > { %4569 = vst [vmem:[#allocation23_spill] sm:$0xff] %v3253_v63  ;;  %991 = vperm.xlu1 %2365, %v2987_v3   ;;  %v3274_v63 = vpop.permute.xlu0 %549 }
 0x1b8   : > { %2395 = vset.pattern.permute.xlu0 %v4498_v39  ;;  %v4504_v39 = vmov 43  }
 0x1b9   : > { %1381 = vperm.xlu0 %2395, %v2987_v3  }
 0x1ba   : > { %998 = vperm.xlu1 %2365, %v2982_v2   ;;  %v3261_v56 = vpop.permute.xlu1 %702 }
 0x1bb   : > { %4570 = vst [vmem:[#allocation24_spill] sm:$0xff] %v3261_v56  ;;  %v4574_v56 = vmov 29  }
 0x1bd   : > { %2396 = vset.pattern.permute.xlu0 %v4504_v39 }
 0x1be   : > { %2366 = vset.pattern.permute.xlu1 %v2647_v49  ;;  %v3265_v46 = vpop.permute.xlu1 %712  ;;  %1404 = vperm.xlu0 %2396, %v2977_v1  }
 0x1bf   : > { %4571 = vst [vmem:[#allocation25_spill] sm:$0xff] %v3265_v46  ;;  %1014 = vperm.xlu1 %2366, %v2977_v1   ;;  %v3280_v46 = vpop.permute.xlu0 %572 }
 0x1c2   : > { %v3272_v19 = vpop.permute.xlu1 %716  ;;  %1418 = vperm.xlu0 %2396, %v2990_v4  }
 0x1c3   : > { %4572 = vst [vmem:[#allocation26_spill] sm:$0xff] %v3272_v19  ;;  %1024 = vperm.xlu1 %2366, %v2982_v2   ;;  %v3288_v19 = vpop.permute.xlu0 %586 }
 0x1c4   : > { %4576 = vst [vmem:[#allocation29_spill] sm:$0xff] %v3288_v19 }
 0x1c7   : > { %1028 = vperm.xlu1 %2366, %v2990_v4   ;;  %v3278_v49 = vpop.permute.xlu1 %731 }
 0x1c8   : > { %4573 = vst [vmem:[#allocation27_spill] sm:$0xff] %v3278_v49  ;;  %v3294_v49 = vpop.permute.xlu0 %601 }
 0x1cb   : > { %2369 = vset.pattern.permute.xlu1 %v4574_v56  ;;  %v3283_v44 = vpop.permute.xlu1 %738  ;;  %v4578_v56 = vmov 30  }
 0x1cc   : > { %4575 = vst [vmem:[#allocation28_spill] sm:$0xff] %v3283_v44  ;;  %1043 = vperm.xlu1 %2369, %v2987_v3   ;;  %v3304_v36 = vpop.permute.xlu0 %624 }
 0x1d0   : > { %1050 = vperm.xlu1 %2369, %v2982_v2   ;;  %v3291_v30 = vpop.permute.xlu1 %754 }
 0x1d1   : > { %4577 = vst [vmem:[#allocation30_spill] sm:$0xff] %v3291_v30 }
 0x1d4   : > { %2370 = vset.pattern.permute.xlu1 %v4578_v56  ;;  %v3297_v44 = vpop.permute.xlu1 %764  ;;  %v3310_v56 = vpop.permute.xlu0 %638 }
 0x1d5   : > { %4579 = vst [vmem:[#allocation31_spill] sm:$0xff] %v3297_v44  ;;  %1066 = vperm.xlu1 %2370, %v2977_v1   ;;  %4582 = vst [vmem:[#allocation34_spill] sm:$0xff] %v3310_v56  ;;  %v4583_v44 = vmov 31   ;;  %v4509_v56 = vmov 44  }
 0x1d6   : > { %2399 = vset.pattern.permute.xlu0 %v4509_v56  ;;  %v4515_v56 = vmov 45  }
 0x1d7   : > { %1433 = vperm.xlu0 %2399, %v2987_v3  }
 0x1d8   : > { %v3302_v51 = vpop.permute.xlu1 %768 }
 0x1d9   : > { %4580 = vst [vmem:[#allocation32_spill] sm:$0xff] %v3302_v51  ;;  %1076 = vperm.xlu1 %2370, %v2982_v2   ;;  %v3317_v51 = vpop.permute.xlu0 %653 }
 0x1db   : > { %2400 = vset.pattern.permute.xlu0 %v4515_v56 }
 0x1dc   : > { %1456 = vperm.xlu0 %2400, %v2977_v1  }
 0x1dd   : > { %1080 = vperm.xlu1 %2370, %v2990_v4   ;;  %v3308_v30 = vpop.permute.xlu1 %783 }
 0x1de   : > { %4581 = vst [vmem:[#allocation33_spill] sm:$0xff] %v3308_v30  ;;  %v3324_v30 = vpop.permute.xlu0 %676 }
 0x1e0   : > { %1470 = vperm.xlu0 %2400, %v2990_v4  }
 0x1e1   : > { %2373 = vset.pattern.permute.xlu1 %v4583_v44  ;;  %v3313_v28 = vpop.permute.xlu1 %790  ;;  %v4586_v44 = vmov 32  }
 0x1e2   : > { %4584 = vst [vmem:[#allocation35_spill] sm:$0xff] %v3313_v28  ;;  %1095 = vperm.xlu1 %2373, %v2987_v3   ;;  %v3334_v23 = vpop.permute.xlu0 %690 }
 0x1e3   : > { %4589 = vst [vmem:[#allocation39_spill] sm:$0xff] %v3334_v23 }
 0x1e6   : > { %1102 = vperm.xlu1 %2373, %v2982_v2   ;;  %v3321_v20 = vpop.permute.xlu1 %806 }
 0x1e7   : > { %4585 = vst [vmem:[#allocation36_spill] sm:$0xff] %v3321_v20  ;;  %v3337_v20 = vpop.permute.xlu0 %705 }
 0x1e8   : > { %4590 = vst [vmem:[#allocation40_spill] sm:$0xff] %v3337_v20  ;;  %v4520_v20 = vmov 46  }
 0x1e9   : > { %2403 = vset.pattern.permute.xlu0 %v4520_v20  ;;  %v4526_v20 = vmov 47  }
 0x1ea   : > { %2374 = vset.pattern.permute.xlu1 %v4586_v44  ;;  %v3327_v28 = vpop.permute.xlu1 %816  ;;  %1485 = vperm.xlu0 %2403, %v2987_v3  }
 0x1eb   : > { %4587 = vst [vmem:[#allocation37_spill] sm:$0xff] %v3327_v28  ;;  %1118 = vperm.xlu1 %2374, %v2977_v1   ;;  %v4592_v28 = vmov 33  }
 0x1ee   : > { %v3332_v39 = vpop.permute.xlu1 %820  ;;  %2404 = vset.pattern.permute.xlu0 %v4526_v20 }
 0x1ef   : > { %4588 = vst [vmem:[#allocation38_spill] sm:$0xff] %v3332_v39  ;;  %1128 = vperm.xlu1 %2374, %v2982_v2   ;;  %v3347_v39 = vpop.permute.xlu0 %728  ;;  %1508 = vperm.xlu0 %2404, %v2977_v1  }
 0x1f0   : > { %4594 = vst [vmem:[#allocation43_spill] sm:$0xff] %v3347_v39 }
 0x1f3   : > { %1132 = vperm.xlu1 %2374, %v2990_v4   ;;  %v3340_v44 = vpop.permute.xlu1 %835  ;;  %1522 = vperm.xlu0 %2404, %v2990_v4  }
 0x1f4   : > { %4591 = vst [vmem:[#allocation41_spill] sm:$0xff] %v3340_v44  ;;  %v3354_v44 = vpop.permute.xlu0 %742 }
 0x1f5   : > { %4596 = vst [vmem:[#allocation45_spill] sm:$0xff] %v3354_v44 }
 0x1f7   : > { %2377 = vset.pattern.permute.xlu1 %v4592_v28  ;;  %v3343_v17 = vpop.permute.xlu1 %842  ;;  %v4597_v28 = vmov 34  }
 0x1f8   : > { %4593 = vst [vmem:[#allocation42_spill] sm:$0xff] %v3343_v17  ;;  %1147 = vperm.xlu1 %2377, %v2987_v3   ;;  %v3361_v56 = vpop.permute.xlu0 %757 }
 0x1f9   : > { %4599 = vst [vmem:[#allocation47_spill] sm:$0xff] %v3361_v56 }
 0x1fc   : > { %1154 = vperm.xlu1 %2377, %v2982_v2   ;;  %v3351_v23 = vpop.permute.xlu1 %858 }
 0x1fd   : > { %4595 = vst [vmem:[#allocation44_spill] sm:$0xff] %v3351_v23  ;;  %v3367_v23 = vpop.permute.xlu0 %780 }
 0x1fe   : > { %4601 = vst [vmem:[#allocation49_spill] sm:$0xff] %v3367_v23 }
 0x200   : > { %2378 = vset.pattern.permute.xlu1 %v4597_v28  ;;  %v3357_v17 = vpop.permute.xlu1 %868 }
 0x201   : > { %4598 = vst [vmem:[#allocation46_spill] sm:$0xff] %v3357_v17  ;;  %1170 = vperm.xlu1 %2378, %v2977_v1   ;;  %v4603_v17 = vmov 35   ;;  %v3377_v56 = vpop.permute.xlu0 %794 }
 0x202   : > { %4605 = vst [vmem:[#allocation52_spill] sm:$0xff] %v3377_v56 }
 0x204   : > { %v3364_v39 = vpop.permute.xlu1 %872 }
 0x205   : > { %4600 = vst [vmem:[#allocation48_spill] sm:$0xff] %v3364_v39  ;;  %1180 = vperm.xlu1 %2378, %v2982_v2   ;;  %v3383_v23 = vpop.permute.xlu0 %809 }
 0x206   : > { %4607 = vst [vmem:[#allocation54_spill] sm:$0xff] %v3383_v23 }
 0x209   : > { %1184 = vperm.xlu1 %2378, %v2990_v4   ;;  %v3370_v28 = vpop.permute.xlu1 %887  ;;  %v3391_v20 = vpop.permute.xlu0 %832 }
 0x20a   : > { %4602 = vst [vmem:[#allocation50_spill] sm:$0xff] %v3370_v28  ;;  %v4532_v28 = vmov 48   ;;  %4610 = vst [vmem:[#allocation56_spill] sm:$0xff] %v3391_v20 }
 0x20b   : > { %2407 = vset.pattern.permute.xlu0 %v4532_v28  ;;  %v4615_v28 = vmov 37  }
 0x20c   : > { %1537 = vperm.xlu0 %2407, %v2987_v3  }
 0x20d   : > { %2381 = vset.pattern.permute.xlu1 %v4603_v17  ;;  %v3373_v44 = vpop.permute.xlu1 %894  ;;  %v4608_v17 = vmov 36   ;;  %v3397_v23 = vpop.permute.xlu0 %846 }
 0x20e   : > { %4604 = vst [vmem:[#allocation51_spill] sm:$0xff] %v3373_v44  ;;  %1199 = vperm.xlu1 %2381, %v2987_v3   ;;  %4612 = vst [vmem:[#allocation58_spill] sm:$0xff] %v3397_v23 }
 0x211   : > { %v3404_v15 = vpop.permute.xlu0 %861 }
 0x212   : > { %1206 = vperm.xlu1 %2381, %v2982_v2   ;;  %v3381_v39 = vpop.permute.xlu1 %910  ;;  %4614 = vst [vmem:[#allocation60_spill] sm:$0xff] %v3404_v15  ;;  %v2669_v15 = vmov 50  }
 0x213   : > { %4606 = vst [vmem:[#allocation53_spill] sm:$0xff] %v3381_v39  ;;  %v280_v39 = vlaneseq }
 0x216   : > { %2382 = vset.pattern.permute.xlu1 %v4608_v17  ;;  %v3387_v44 = vpop.permute.xlu1 %920 }
 0x217   : > { %4609 = vst [vmem:[#allocation55_spill] sm:$0xff] %v3387_v44  ;;  %1222 = vperm.xlu1 %2382, %v2977_v1   ;;  %v3402_v44 = vand.u32 127, %v280_v39 }
 0x219   : > { %v3410_v19 = vadd.s32 128, %v3402_v44  ;;  %vm289_vm0 = vcmp.eq.s32.totalorder %v3402_v44, %v3152_v58  ;;  %vm291_vm2 = vcmp.eq.s32.totalorder %v3402_v44, %v3159_v61  ;;  %vm317_vm3 = vcmp.eq.s32.totalorder %v3402_v44, %v3171_v5 }
 0x21a   : > { %v3394_v56 = vpop.permute.xlu1 %924  ;;  %vm319_vm6 = vcmp.eq.s32.totalorder %v3402_v44, %v3058_v26  ;;  %vm345_vm8 = vcmp.eq.s32.totalorder %v3402_v44, %v3185_v10  ;;  %vm343_vm10 = vcmp.eq.s32.totalorder %v3402_v44, %v3068_v29  ;;  %vm369_vm12 = vcmp.eq.s32.totalorder %v3402_v44, %v3190_v12 }
 0x21b   : > { %4611 = vst [vmem:[#allocation57_spill] sm:$0xff] %v3394_v56  ;;  %1232 = vperm.xlu1 %2382, %v2982_v2   ;;  %v4536_v56 = vmov 49   ;;  %vm290_vm1 = vcmp.eq.s32.totalorder %v3410_v19, %v3152_v58  ;;  %vm318_vm4 = vcmp.eq.s32.totalorder %v3410_v19, %v3171_v5  ;;  %vm292_vm5 = vcmp.eq.s32.totalorder %v3410_v19, %v3159_v61 }
 0x21c   : > { %2408 = vset.pattern.permute.xlu0 %v4536_v56  ;;  %v303_v56 = vsel %vm289_vm0, %v3048_v22, 0.0  ;;  %v304_v58 = vsel %vm290_vm1, %v3048_v22, 0.0  ;;  %v330_v5 = vsel %vm318_vm4, %v3062_v27, 0.0  ;;  %vm320_vm7 = vcmp.eq.s32.totalorder %v3410_v19, %v3058_v26 }
 0x21d   : > { %1560 = vperm.xlu0 %2408, %v2977_v1   ;;  %vm346_vm9 = vcmp.eq.s32.totalorder %v3410_v19, %v3185_v10  ;;  %v4619_v61 = vmov 38   ;;  %v332_v23 = vsel %vm320_vm7, %v3178_v7, 0.0  ;;  %v334_v26 = vadd.f32 %v330_v5, %v304_v58 }
 0x21e   : > { %vm344_vm11 = vcmp.eq.s32.totalorder %v3410_v19, %v3068_v29  ;;  %vm370_vm13 = vcmp.eq.s32.totalorder %v3410_v19, %v3190_v12  ;;  %vm371_vm14 = vcmp.eq.s32.totalorder %v3402_v44, %v3081_v34  ;;  %vm372_vm15 = vcmp.eq.s32.totalorder %v3410_v19, %v3081_v34 }
 0x21f   : > { %1236 = vperm.xlu1 %2382, %v2990_v4   ;;  %v3400_v17 = vpop.permute.xlu1 %939  ;;  %v382_v5 = vsel %vm370_vm13, %v3084_v35, 0.0  ;;  %vm397_vm0 = vcmp.eq.s32.totalorder %v3402_v44, %v3207_v18  ;;  %vm398_vm1 = vcmp.eq.s32.totalorder %v3410_v19, %v3207_v18  ;;  %v383_v34 = vsel %vm371_vm14, %v3201_v16, 0.0 }
 0x220   : > { %4613 = vst [vmem:[#allocation59_spill] sm:$0xff] %v3400_v17  ;;  %v329_v17 = vsel %vm317_vm3, %v3062_v27, 0.0  ;;  %v331_v27 = vsel %vm319_vm6, %v3178_v7, 0.0  ;;  %v357_v7 = vsel %vm345_vm8, %v3075_v32, 0.0  ;;  %vm396_vm3 = vcmp.eq.s32.totalorder %v3410_v19, %v3090_v37 }
 0x221   : > { %1574 = vperm.xlu0 %2408, %v2990_v4   ;;  %vm423_vm4 = vcmp.eq.s32.totalorder %v3402_v44, %v3104_v42  ;;  %vm421_vm6 = vcmp.eq.s32.totalorder %v3402_v44, %v3215_v21  ;;  %vm422_vm7 = vcmp.eq.s32.totalorder %v3410_v19, %v3215_v21  ;;  %vm449_vm8 = vcmp.eq.s32.totalorder %v3402_v44, %v3228_v33 }
 0x222   : > { %vm448_vm13 = vcmp.eq.s32.totalorder %v3410_v19, %v3114_v45  ;;  %vm475_vm14 = vcmp.eq.s32.totalorder %v3402_v44, %v3129_v50 }
 0x223   : > { %2385 = vset.pattern.permute.xlu1 %v4615_v28  ;;  %v3407_v20 = vpop.permute.xlu1 %946  ;;  %v3428_v28 = vpop.permute.xlu0 %884  ;;  %v460_v21 = vsel %vm448_vm13, %v3119_v47, 0.0  ;;  %vm606_vm13 = vcmp.eq.s32.totalorder %v3410_v19, %v3294_v49 }
 0x224   : > { %4616 = vst [vmem:[#allocation61_spill] sm:$0xff] %v3407_v20  ;;  %1251 = vperm.xlu1 %2385, %v2987_v3   ;;  %4618 = vst [vmem:[#allocation63_spill] sm:$0xff] %v3428_v28  ;;  %v305_v20 = vsel %vm291_vm2, %v3053_v24, 0.0  ;;  %v333_v28 = vadd.f32 %v329_v17, %v303_v56  ;;  %v358_v56 = vsel %vm346_vm9, %v3075_v32, 0.0  ;;  %vm395_vm2 = vcmp.eq.s32.totalorder %v3402_v44, %v3090_v37 }
 0x225   : > { %2411 = vset.pattern.permute.xlu0 %v2669_v15  ;;  %v335_v29 = vadd.f32 %v331_v27, %v305_v20  ;;  %v410_v37 = vsel %vm398_vm1, %v3098_v40, 0.0  ;;  %vm450_vm9 = vcmp.eq.s32.totalorder %v3410_v19, %v3228_v33  ;;  %vm502_vm1 = vcmp.eq.s32.totalorder %v3410_v19, %v3250_v9  ;;  %v3574_v33 = vld [vmem:[%s2979_s10 + $0x8] sm:$0xff] }
 0x226   : > { %1589 = vperm.xlu0 %2411, %v2987_v3  }
 0x227   : > { %v3468_v17 = vpop.permute.xlu0 %898  ;;  %v361_v20 = vadd.f32 %v357_v7, %v335_v29 }
 0x228   : > { %1258 = vperm.xlu1 %2385, %v2982_v2   ;;  %v3426_v39 = vpop.permute.xlu1 %962 }
 0x229   : > { %4617 = vst [vmem:[#allocation62_spill] sm:$0xff] %v3426_v39  ;;  %v306_v39 = vsel %vm292_vm5, %v3053_v24, 0.0  ;;  %v356_v24 = vsel %vm344_vm11, %v3071_v31, 0.0  ;;  %vm424_vm5 = vcmp.eq.s32.totalorder %v3410_v19, %v3104_v42  ;;  %vm474_vm11 = vcmp.eq.s32.totalorder %v3410_v19, %v3237_v41 }
 0x22a   : > { %v336_v58 = vadd.f32 %v332_v23, %v306_v39  ;;  %v360_v10 = vadd.f32 %v356_v24, %v334_v26  ;;  %v381_v39 = vsel %vm369_vm12, %v3084_v35, 0.0  ;;  %v407_v35 = vsel %vm395_vm2, %v3093_v38, 0.0 }
 0x22b   : > { %v3488_v12 = vpop.permute.xlu0 %913  ;;  %v409_v26 = vsel %vm397_vm0, %v3098_v40, 0.0  ;;  %v436_v7 = vsel %vm424_vm5, %v3220_v25, 0.0  ;;  %vm447_vm12 = vcmp.eq.s32.totalorder %v3402_v44, %v3114_v45  ;;  %vm501_vm0 = vcmp.eq.s32.totalorder %v3402_v44, %v3250_v9 }
 0x22c   : > { %2386 = vset.pattern.permute.xlu1 %v4619_v61  ;;  %v3447_v22 = vpop.permute.xlu1 %972  ;;  %v355_v61 = vsel %vm343_vm10, %v3071_v31, 0.0  ;;  %v362_v23 = vadd.f32 %v358_v56, %v336_v58  ;;  %v386_v27 = vadd.f32 %v382_v5, %v360_v10  ;;  %v4620_v58 = vmov 39  }
 0x22d   : > { %1274 = vperm.xlu1 %2386, %v2977_v1   ;;  %v359_v32 = vadd.f32 %v355_v61, %v333_v28  ;;  %v408_v28 = vsel %vm396_vm3, %v3093_v38, 0.0  ;;  %v387_v61 = vadd.f32 %v383_v34, %v361_v20  ;;  %vm473_vm10 = vcmp.eq.s32.totalorder %v3402_v44, %v3237_v41 }
 0x22e   : > { %v412_v42 = vadd.f32 %v408_v28, %v386_v27  ;;  %v487_v34 = vsel %vm475_vm14, %v3245_v14, 0.0  ;;  %vm525_vm2 = vcmp.eq.s32.totalorder %v3402_v44, %v3258_v60  ;;  %vm526_vm3 = vcmp.eq.s32.totalorder %v3410_v19, %v3258_v60 }
 0x22f   : > { %v413_v56 = vadd.f32 %v409_v26, %v387_v61  ;;  %v3515_v40 = vpop.permute.xlu0 %936  ;;  %v486_v26 = vsel %vm474_vm11, %v3134_v52, 0.0  ;;  %vm554_vm5 = vcmp.eq.s32.totalorder %v3410_v19, %v3274_v63  ;;  %vm578_vm11 = vcmp.eq.s32.totalorder %v3410_v19, %v3280_v46 }
 0x230   : > { %v3475_v31 = vpop.permute.xlu1 %976  ;;  %vm551_vm14 = vcmp.eq.s32.totalorder %v3402_v44, %v3168_v0 }
 0x231   : > { %1284 = vperm.xlu1 %2386, %v2982_v2   ;;  %v384_v2 = vsel %vm372_vm15, %v3201_v16, 0.0  ;;  %v385_v16 = vadd.f32 %v381_v39, %v359_v32  ;;  %v434_v39 = vsel %vm422_vm7, %v3108_v43, 0.0  ;;  %vm476_vm15 = vcmp.eq.s32.totalorder %v3410_v19, %v3129_v50  ;;  %v3560_v50 = vld [vmem:[%s2979_s10] sm:$0xff] }
 0x232   : > { %v388_v24 = vadd.f32 %v384_v2, %v362_v23  ;;  %v433_v23 = vsel %vm421_vm6, %v3108_v43, 0.0  ;;  %v462_v43 = vsel %vm450_vm9, %v3123_v48, 0.0  ;;  %v438_v5 = vadd.f32 %v434_v39, %v412_v42 }
 0x233   : > { %v411_v38 = vadd.f32 %v407_v35, %v385_v16  ;;  %v488_v2 = vsel %vm476_vm15, %v3245_v14, 0.0  ;;  %v485_v14 = vsel %vm473_vm10, %v3134_v52, 0.0  ;;  %vm499_vm6 = vcmp.eq.s32.totalorder %v3402_v44, %v3139_v53 }
 0x234   : > { %v414_v29 = vadd.f32 %v410_v37, %v388_v24  ;;  %v464_v28 = vadd.f32 %v460_v21, %v438_v5  ;;  %vm500_vm7 = vcmp.eq.s32.totalorder %v3410_v19, %v3139_v53  ;;  %v4621_v24 = vmov 40  }
 0x235   : > { %1288 = vperm.xlu1 %2386, %v2990_v4   ;;  %v3503_v18 = vpop.permute.xlu1 %991  ;;  %v435_v4 = vsel %vm423_vm4, %v3220_v25, 0.0  ;;  %v2670_v25 = vmov 51   ;;  %v437_v45 = vadd.f32 %v433_v23, %v411_v38  ;;  %vm553_vm4 = vcmp.eq.s32.totalorder %v3402_v44, %v3274_v63 }
 0x236   : > { %2412 = vset.pattern.permute.xlu0 %v2670_v25  ;;  %v439_v10 = vadd.f32 %v435_v4, %v413_v56  ;;  %v440_v20 = vadd.f32 %v436_v7, %v414_v29  ;;  %v511_v52 = vsel %vm499_vm6, %v3144_v55, 0.0  ;;  %v512_v41 = vsel %vm500_vm7, %v3144_v55, 0.0  ;;  %v3603_v4 = vld [vmem:[%s2970_s9] sm:$0xff] }
 0x237   : > { %1612 = vperm.xlu0 %2412, %v2977_v1   ;;  %v461_v1 = vsel %vm449_vm8, %v3123_v48, 0.0  ;;  %v3571_v48 = vpop.permute.xlu0 %950  ;;  %vm527_vm8 = vcmp.eq.s32.totalorder %v3402_v44, %v3156_v59  ;;  %v490_v53 = vadd.f32 %v486_v26, %v464_v28  ;;  %v513_v56 = vsel %vm501_vm0, %v3148_v57, 0.0 }
 0x238   : > { %v465_v16 = vadd.f32 %v461_v1, %v439_v10  ;;  %v466_v27 = vadd.f32 %v462_v43, %v440_v20  ;;  %v514_v55 = vsel %vm502_vm1, %v3148_v57, 0.0  ;;  %v2671_v29 = vmov 52  }
 0x239   : > { %2389 = vset.pattern.permute.xlu1 %v4620_v58  ;;  %v3518_v32 = vpop.permute.xlu1 %998  ;;  %vm528_vm9 = vcmp.eq.s32.totalorder %v3410_v19, %v3156_v59  ;;  %vm577_vm10 = vcmp.eq.s32.totalorder %v3402_v44, %v3280_v46  ;;  %v3624_v58 = vld [vmem:[%s2970_s9 + $0x8] sm:$0xff]  ;;  %v516_v9 = vadd.f32 %v512_v41, %v490_v53  ;;  %v539_v10 = vsel %vm527_vm8, %v3267_v54, 0.0 }
 0x23a   : > { %1303 = vperm.xlu1 %2389, %v2987_v3   ;;  %v459_v3 = vsel %vm447_vm12, %v3119_v47, 0.0  ;;  %v491_v37 = vadd.f32 %v487_v34, %v465_v16  ;;  %v492_v61 = vadd.f32 %v488_v2, %v466_v27  ;;  %vm605_vm12 = vcmp.eq.s32.totalorder %v3402_v44, %v3294_v49  ;;  %v4623_v27 = vld [vmem:[#allocation14_spill] sm:$0xff]  ;;  %v4625_v41 = vld [vmem:[#allocation17_spill] sm:$0xff]  ;;  %v4631_v49 = vld [vmem:[#allocation19_spill] sm:$0xff] }
 0x23b   : > { %1626 = vperm.xlu0 %2412, %v3574_v33   ;;  %v463_v35 = vadd.f32 %v459_v3, %v437_v45  ;;  %v3600_v42 = vpop.permute.xlu0 %965  ;;  %v537_v3 = vsel %vm525_vm2, %v3162_v62, 0.0  ;;  %v538_v21 = vsel %vm526_vm3, %v3162_v62, 0.0  ;;  %v540_v1 = vsel %vm528_vm9, %v3267_v54, 0.0 }
 0x23c   : > { %v517_v23 = vadd.f32 %v513_v56, %v491_v37  ;;  %v518_v39 = vadd.f32 %v514_v55, %v492_v61  ;;  %vm552_vm15 = vcmp.eq.s32.totalorder %v3410_v19, %v3168_v0  ;;  %vm629_vm0 = vcmp.eq.s32.totalorder %v3402_v44, %v3304_v36  ;;  %v4624_v37 = vld [vmem:[#allocation15_spill] sm:$0xff] }
 0x23d   : > { %v489_v7 = vadd.f32 %v485_v14, %v463_v35  ;;  %v563_v60 = vsel %vm551_vm14, %v3174_v6, 0.0  ;;  %v564_v62 = vsel %vm552_vm15, %v3174_v6, 0.0  ;;  %vm630_vm1 = vcmp.eq.s32.totalorder %v3410_v19, %v3304_v36  ;;  %v4633_v36 = vld [vmem:[#allocation20_spill] sm:$0xff] }
 0x23e   : > { %1310 = vperm.xlu1 %2389, %v3560_v50   ;;  %v3563_v47 = vpop.permute.xlu1 %1014  ;;  %v543_v43 = vadd.f32 %v539_v10, %v517_v23  ;;  %v542_v59 = vadd.f32 %v538_v21, %v516_v9  ;;  %v565_v0 = vsel %vm553_vm4, %v3180_v8, 0.0  ;;  %vm579_vm2 = vcmp.eq.s32.totalorder %v3402_v44, %v3188_v11  ;;  %v4629_v21 = vld [vmem:[#allocation18_spill] sm:$0xff] }
 0x23f   : > { %2415 = vset.pattern.permute.xlu0 %v2671_v29  ;;  %v515_v57 = vadd.f32 %v511_v52, %v489_v7  ;;  %v3658_v45 = vpop.permute.xlu0 %988  ;;  %v544_v5 = vadd.f32 %v540_v1, %v518_v39  ;;  %v566_v6 = vsel %vm554_vm5, %v3180_v8, 0.0  ;;  %vm580_vm3 = vcmp.eq.s32.totalorder %v3410_v19, %v3188_v11  ;;  %v4622_v8 = vld [vmem:[#allocation29_spill] sm:$0xff] }
 0x240   : > { %1641 = vperm.xlu0 %2415, %v3624_v58   ;;  %vm657_vm6 = vcmp.eq.s32.totalorder %v3402_v44, %v3317_v51  ;;  %v568_v35 = vadd.f32 %v564_v62, %v542_v59  ;;  %v589_v28 = vsel %vm577_vm10, %v3193_v13, 0.0  ;;  %vm658_vm4 = vcmp.eq.s32.totalorder %v3410_v19, %v3317_v51  ;;  %v4632_v59 = vld [vmem:[#allocation43_spill] sm:$0xff]  ;;  %v4640_v51 = vld [vmem:[#allocation24_spill] sm:$0xff] }
 0x241   : > { %v541_v54 = vadd.f32 %v537_v3, %v515_v57  ;;  %vm681_vm5 = vcmp.eq.s32.totalorder %v3402_v44, %v3324_v30  ;;  %v569_v63 = vadd.f32 %v565_v0, %v543_v43  ;;  %v591_v11 = vsel %vm579_vm2, %v4622_v8, 0.0  ;;  %v4628_v57 = vld [vmem:[#allocation16_spill] sm:$0xff] }
 0x242   : > { %2390 = vset.pattern.permute.xlu1 %v4621_v24  ;;  %v3594_v38 = vpop.permute.xlu1 %1024  ;;  %v590_v16 = vsel %vm578_vm11, %v3193_v13, 0.0  ;;  %vm603_vm7 = vcmp.eq.s32.totalorder %v3402_v44, %v4623_v27  ;;  %vm682_vm8 = vcmp.eq.s32.totalorder %v3410_v19, %v3324_v30  ;;  %v570_v14 = vadd.f32 %v566_v6, %v544_v5  ;;  %v4626_v13 = vld [vmem:[#allocation40_spill] sm:$0xff] }
 0x243   : > { %1326 = vperm.xlu1 %2390, %v3603_v4   ;;  %v567_v2 = vadd.f32 %v563_v60, %v541_v54  ;;  %v592_v26 = vsel %vm580_vm3, %v4622_v8, 0.0  ;;  %vm604_vm9 = vcmp.eq.s32.totalorder %v3410_v19, %v4623_v27  ;;  %v615_v61 = vsel %vm603_vm7, %v4624_v37, 0.0  ;;  %v3703_v46 = vpop.permute.xlu0 %1002  ;;  %v4630_v60 = vld [vmem:[#allocation34_spill] sm:$0xff]  ;;  %v4634_v8 = vld [vmem:[#allocation21_spill] sm:$0xff] }
 0x244   : > { %v616_v52 = vsel %vm604_vm9, %v4624_v37, 0.0  ;;  %vm631_vm10 = vcmp.eq.s32.totalorder %v3402_v44, %v4625_v41  ;;  %vm709_vm11 = vcmp.eq.s32.totalorder %v3402_v44, %v4626_v13  ;;  %v4627_v7 = vmov 41   ;;  %v4636_v37 = vld [vmem:[#allocation22_spill] sm:$0xff] }
 0x245   : > { %v593_v24 = vadd.f32 %v589_v28, %v567_v2  ;;  %v595_v56 = vadd.f32 %v591_v11, %v569_v63  ;;  %v594_v55 = vadd.f32 %v590_v16, %v568_v35  ;;  %v617_v9 = vsel %vm605_vm12, %v4628_v57, 0.0  ;;  %v4635_v16 = vld [vmem:[#allocation47_spill] sm:$0xff] }
 0x246   : > { %v3633_v20 = vpop.permute.xlu1 %1028  ;;  %vm632_vm14 = vcmp.eq.s32.totalorder %v3410_v19, %v4625_v41  ;;  %vm710_vm15 = vcmp.eq.s32.totalorder %v3410_v19, %v4626_v13  ;;  %v2672_v10 = vmov 53   ;;  %v596_v23 = vadd.f32 %v592_v26, %v570_v14 }
 0x247   : > { %1336 = vperm.xlu1 %2390, %v3560_v50   ;;  %2416 = vset.pattern.permute.xlu0 %v2672_v10  ;;  %v619_v39 = vadd.f32 %v615_v61, %v593_v24  ;;  %v618_v3 = vsel %vm606_vm13, %v4628_v57, 0.0  ;;  %v641_v1 = vsel %vm629_vm0, %v4629_v21, 0.0  ;;  %v620_v43 = vadd.f32 %v616_v52, %v594_v55  ;;  %v3748_v2 = vpop.permute.xlu0 %1017  ;;  %v4637_v52 = vld [vmem:[#allocation49_spill] sm:$0xff]  ;;  %v4638_v55 = vld [vmem:[#allocation23_spill] sm:$0xff] }
 0x248   : > { %1664 = vperm.xlu0 %2416, %v3603_v4   ;;  %v643_v62 = vsel %vm631_vm10, %v4630_v60, 0.0  ;;  %v642_v54 = vsel %vm630_vm1, %v4629_v21, 0.0  ;;  %vm655_vm12 = vcmp.eq.s32.totalorder %v3402_v44, %v4631_v49  ;;  %vm733_vm13 = vcmp.eq.s32.totalorder %v3402_v44, %v4632_v59 }
 0x249   : > { %vm734_vm0 = vcmp.eq.s32.totalorder %v3410_v19, %v4632_v59  ;;  %v621_v0 = vadd.f32 %v617_v9, %v595_v56  ;;  %v644_v5 = vsel %vm632_vm14, %v4630_v60, 0.0  ;;  %vm656_vm2 = vcmp.eq.s32.totalorder %v3410_v19, %v4631_v49  ;;  %v4639_v9 = vld [vmem:[#allocation39_spill] sm:$0xff] }
 0x24a   : > { %v667_v6 = vsel %vm655_vm12, %v4633_v36, 0.0  ;;  %v622_v35 = vadd.f32 %v618_v3, %v596_v23  ;;  %v645_v28 = vadd.f32 %v641_v1, %v619_v39  ;;  %v668_v63 = vsel %vm656_vm2, %v4633_v36, 0.0 }
 0x24b   : > { %1340 = vperm.xlu1 %2390, %v3574_v33   ;;  %v3675_v34 = vpop.permute.xlu1 %1043  ;;  %v669_v11 = vsel %vm657_vm6, %v4634_v8, 0.0  ;;  %vm761_vm1 = vcmp.eq.s32.totalorder %v3402_v44, %v4635_v16  ;;  %v647_v14 = vadd.f32 %v643_v62, %v621_v0  ;;  %v646_v26 = vadd.f32 %v642_v54, %v620_v43  ;;  %v4642_v43 = vld [vmem:[#allocation25_spill] sm:$0xff]  ;;  %v4643_v62 = vld [vmem:[#allocation27_spill] sm:$0xff]  ;;  %v3795_v54 = vpop.permute.xlu0 %1040 }
 0x24c   : > { %vm683_vm3 = vcmp.eq.s32.totalorder %v3402_v44, %v4636_v37  ;;  %vm684_vm7 = vcmp.eq.s32.totalorder %v3410_v19, %v4636_v37  ;;  %1678 = vperm.xlu0 %2416, %v3574_v33   ;;  %v648_v61 = vadd.f32 %v644_v5, %v622_v35  ;;  %v671_v24 = vadd.f32 %v667_v6, %v645_v28  ;;  %v4644_v5 = vld [vmem:[#allocation26_spill] sm:$0xff] }
 0x24d   : > { %vm762_vm6 = vcmp.eq.s32.totalorder %v3410_v19, %v4635_v16  ;;  %vm785_vm9 = vcmp.eq.s32.totalorder %v3402_v44, %v4637_v52  ;;  %v672_v41 = vadd.f32 %v668_v63, %v646_v26  ;;  %v673_v56 = vadd.f32 %v669_v11, %v647_v14  ;;  %v4645_v6 = vld [vmem:[#allocation54_spill] sm:$0xff]  ;;  %v4646_v26 = vld [vmem:[#allocation45_spill] sm:$0xff] }
 0x24e   : > { %v693_v57 = vsel %vm681_vm5, %v4638_v55, 0.0  ;;  %vm786_vm10 = vcmp.eq.s32.totalorder %v3410_v19, %v4637_v52  ;;  %v695_v23 = vsel %vm683_vm3, %v4639_v9, 0.0  ;;  %v696_v39 = vsel %vm684_vm7, %v4639_v9, 0.0 }
 0x24f   : > { %2393 = vset.pattern.permute.xlu1 %v4627_v7  ;;  %v3706_v53 = vpop.permute.xlu1 %1050  ;;  %v670_v7 = vsel %vm658_vm4, %v4634_v8, 0.0  ;;  %v694_v3 = vsel %vm682_vm8, %v4638_v55, 0.0  ;;  %vm707_vm4 = vcmp.eq.s32.totalorder %v3402_v44, %v4640_v51  ;;  %v4641_v21 = vmov 42  }
 0x250   : > { %1355 = vperm.xlu1 %2393, %v3624_v58   ;;  %vm708_vm5 = vcmp.eq.s32.totalorder %v3410_v19, %v4640_v51  ;;  %v719_v60 = vsel %vm707_vm4, %v4642_v43, 0.0  ;;  %vm735_vm14 = vcmp.eq.s32.totalorder %v3402_v44, %v4643_v62  ;;  %v674_v30 = vadd.f32 %v670_v7, %v648_v61  ;;  %v4647_v61 = vld [vmem:[#allocation56_spill] sm:$0xff] }
 0x251   : > { %v697_v49 = vadd.f32 %v693_v57, %v671_v24  ;;  %v720_v0 = vsel %vm708_vm5, %v4642_v43, 0.0  ;;  %v721_v36 = vsel %vm709_vm11, %v4644_v5, 0.0  ;;  %vm813_vm8 = vcmp.eq.s32.totalorder %v3402_v44, %v4645_v6  ;;  %v4648_v7 = vld [vmem:[#allocation28_spill] sm:$0xff] }
 0x252   : > { %v2673_v35 = vmov 54   ;;  %v699_v28 = vadd.f32 %v695_v23, %v673_v56  ;;  %v698_v63 = vadd.f32 %v694_v3, %v672_v41  ;;  %v722_v8 = vsel %vm710_vm15, %v4644_v5, 0.0  ;;  %v4649_v23 = vld [vmem:[#allocation30_spill] sm:$0xff]  ;;  %v4650_v3 = vld [vmem:[#allocation31_spill] sm:$0xff]  ;;  %v4653_v5 = vld [vmem:[#allocation33_spill] sm:$0xff] }
 0x253   : > { %2419 = vset.pattern.permute.xlu0 %v2673_v35  ;;  %vm736_vm12 = vcmp.eq.s32.totalorder %v3410_v19, %v4643_v62  ;;  %vm814_vm2 = vcmp.eq.s32.totalorder %v3410_v19, %v4645_v6  ;;  %v700_v11 = vadd.f32 %v696_v39, %v674_v30  ;;  %v723_v14 = vadd.f32 %v719_v60, %v697_v49  ;;  %v4652_v60 = vld [vmem:[#allocation60_spill] sm:$0xff]  ;;  %v3847_v62 = vpop.permute.xlu0 %1054 }
 0x254   : > { %1362 = vperm.xlu1 %2393, %v3560_v50   ;;  %v3758_v27 = vpop.permute.xlu1 %1066  ;;  %1693 = vperm.xlu0 %2419, %v3624_v58   ;;  %v747_v37 = vsel %vm735_vm14, %v4646_v26, 0.0  ;;  %vm837_vm11 = vcmp.eq.s32.totalorder %v3402_v44, %v4647_v61  ;;  %v724_v24 = vadd.f32 %v720_v0, %v698_v63  ;;  %v725_v41 = vadd.f32 %v721_v36, %v699_v28  ;;  %v4654_v28 = vld [vmem:[#allocation35_spill] sm:$0xff] }
 0x255   : > { %v745_v56 = vsel %vm733_vm13, %v4648_v7, 0.0  ;;  %v746_v55 = vsel %vm734_vm0, %v4648_v7, 0.0  ;;  %vm838_vm15 = vcmp.eq.s32.totalorder %v3410_v19, %v4647_v61  ;;  %v726_v57 = vadd.f32 %v722_v8, %v700_v11  ;;  %v4655_v8 = vld [vmem:[#allocation63_spill] sm:$0xff] }
 0x256   : > { %v748_v9 = vsel %vm736_vm12, %v4646_v26, 0.0  ;;  %vm759_vm3 = vcmp.eq.s32.totalorder %v3402_v44, %v4649_v23  ;;  %vm760_vm7 = vcmp.eq.s32.totalorder %v3410_v19, %v4649_v23  ;;  %v751_v39 = vadd.f32 %v747_v37, %v725_v41  ;;  %v4656_v41 = vld [vmem:[#allocation52_spill] sm:$0xff] }
 0x257   : > { %v771_v51 = vsel %vm759_vm3, %v4650_v3, 0.0  ;;  %v772_v59 = vsel %vm760_vm7, %v4650_v3, 0.0  ;;  %vm865_vm13 = vcmp.eq.s32.totalorder %v3402_v44, %v4652_v60  ;;  %v749_v30 = vadd.f32 %v745_v56, %v723_v14  ;;  %v4657_v56 = vld [vmem:[#allocation36_spill] sm:$0xff] }
 0x258   : > { %2394 = vset.pattern.permute.xlu1 %v4641_v21  ;;  %v3788_v1 = vpop.permute.xlu1 %1076  ;;  %v4651_v21 = vld [vmem:[#allocation32_spill] sm:$0xff]  ;;  %v750_v49 = vadd.f32 %v746_v55, %v724_v24  ;;  %vm787_vm0 = vcmp.eq.s32.totalorder %v3402_v44, %v4653_v5  ;;  %v752_v36 = vadd.f32 %v748_v9, %v726_v57  ;;  %vm788_vm4 = vcmp.eq.s32.totalorder %v3410_v19, %v4653_v5  ;;  %v3879_v55 = vpop.permute.xlu0 %1069  ;;  %v4658_v9 = vld [vmem:[#allocation37_spill] sm:$0xff] }
 0x259   : > { %1378 = vperm.xlu1 %2394, %v3603_v4   ;;  %v773_v43 = vsel %vm761_vm1, %v4651_v21, 0.0  ;;  %v774_v0 = vsel %vm762_vm6, %v4651_v21, 0.0  ;;  %v797_v63 = vsel %vm785_vm9, %v4654_v28, 0.0  ;;  %vm866_vm1 = vcmp.eq.s32.totalorder %v3410_v19, %v4652_v60  ;;  %v4660_v21 = vld [vmem:[#allocation41_spill] sm:$0xff] }
 0x25a   : > { %vm889_vm5 = vcmp.eq.s32.totalorder %v3402_v44, %v4655_v8  ;;  %v775_v11 = vadd.f32 %v771_v51, %v749_v30  ;;  %v776_v14 = vadd.f32 %v772_v59, %v750_v49  ;;  %v777_v26 = vadd.f32 %v773_v43, %v751_v39  ;;  %v4659_v51 = vld [vmem:[#allocation38_spill] sm:$0xff] }
 0x25b   : > { %v798_v37 = vsel %vm786_vm10, %v4654_v28, 0.0  ;;  %vm890_vm6 = vcmp.eq.s32.totalorder %v3410_v19, %v4655_v8  ;;  %v778_v24 = vadd.f32 %v774_v0, %v752_v36  ;;  %v799_v7 = vsel %vm787_vm0, %v4656_v41, 0.0 }
 0x25c   : > { %v3821_v13 = vpop.permute.xlu1 %1080  ;;  %vm811_vm9 = vcmp.eq.s32.totalorder %v3402_v44, %v4657_v56  ;;  %vm812_vm14 = vcmp.eq.s32.totalorder %v3410_v19, %v4657_v56  ;;  %v800_v52 = vsel %vm788_vm4, %v4656_v41, 0.0  ;;  %v801_v57 = vadd.f32 %v797_v63, %v775_v11  ;;  %v4662_v11 = vld [vmem:[#allocation42_spill] sm:$0xff]  ;;  %v4664_v41 = vld [vmem:[#allocation44_spill] sm:$0xff]  ;;  %v3934_v61 = vpop.permute.xlu0 %1092 }
 0x25d   : > { %1388 = vperm.xlu1 %2394, %v3560_v50   ;;  %v823_v23 = vsel %vm811_vm9, %v4658_v9, 0.0  ;;  %v824_v39 = vsel %vm812_vm14, %v4658_v9, 0.0  ;;  %v802_v3 = vadd.f32 %v798_v37, %v776_v14  ;;  %v825_v59 = vsel %vm813_vm8, %v4659_v51, 0.0 }
 0x25e   : > { %vm839_vm10 = vcmp.eq.s32.totalorder %v3402_v44, %v4660_v21  ;;  %vm917_vm12 = vcmp.eq.s32.totalorder %v3402_v44, %v3488_v12  ;;  %v4661_v43 = vmov 43   ;;  %v803_v49 = vadd.f32 %v799_v7, %v777_v26  ;;  %v4663_v26 = vld [vmem:[#allocation58_spill] sm:$0xff] }
 0x25f   : > { %v826_v0 = vsel %vm814_vm2, %v4659_v51, 0.0  ;;  %vm840_vm3 = vcmp.eq.s32.totalorder %v3410_v19, %v4660_v21  ;;  %vm918_vm8 = vcmp.eq.s32.totalorder %v3410_v19, %v3488_v12  ;;  %v2674_v5 = vmov 55   ;;  %v4667_v51 = vld [vmem:[#allocation50_spill] sm:$0xff] }
 0x260   : > { %2420 = vset.pattern.permute.xlu0 %v2674_v5  ;;  %v804_v36 = vadd.f32 %v800_v52, %v778_v24  ;;  %v827_v28 = vadd.f32 %v823_v23, %v801_v57  ;;  %v828_v63 = vadd.f32 %v824_v39, %v802_v3  ;;  %v849_v6 = vsel %vm837_vm11, %v4662_v11, 0.0  ;;  %v4665_v52 = vld [vmem:[#allocation46_spill] sm:$0xff]  ;;  %v4666_v39 = vld [vmem:[#allocation48_spill] sm:$0xff] }
 0x261   : > { %1392 = vperm.xlu1 %2394, %v3574_v33   ;;  %v3866_v16 = vpop.permute.xlu1 %1095  ;;  %1716 = vperm.xlu0 %2420, %v3603_v4   ;;  %v829_v14 = vadd.f32 %v825_v59, %v803_v49  ;;  %v851_v37 = vsel %vm839_vm10, %v4663_v26, 0.0  ;;  %v850_v24 = vsel %vm838_vm15, %v4662_v11, 0.0  ;;  %vm863_vm2 = vcmp.eq.s32.totalorder %v3402_v44, %v4664_v41 }
 0x262   : > { %vm941_vm7 = vcmp.eq.s32.totalorder %v3402_v44, %v3515_v40  ;;  %v830_v7 = vadd.f32 %v826_v0, %v804_v36  ;;  %v852_v56 = vsel %vm840_vm3, %v4663_v26, 0.0  ;;  %vm864_vm11 = vcmp.eq.s32.totalorder %v3410_v19, %v4664_v41 }
 0x263   : > { %v875_v57 = vsel %vm863_vm2, %v4665_v52, 0.0  ;;  %vm942_vm15 = vcmp.eq.s32.totalorder %v3410_v19, %v3515_v40  ;;  %v853_v9 = vadd.f32 %v849_v6, %v827_v28  ;;  %v876_v23 = vsel %vm864_vm11, %v4665_v52, 0.0  ;;  %v4668_v28 = vld [vmem:[#allocation51_spill] sm:$0xff] }
 0x264   : > { %v877_v3 = vsel %vm865_vm13, %v4666_v39, 0.0  ;;  %vm891_vm0 = vcmp.eq.s32.totalorder %v3402_v44, %v4667_v51  ;;  %vm969_vm4 = vcmp.eq.s32.totalorder %v3402_v44, %v3600_v42  ;;  %v855_v21 = vadd.f32 %v851_v37, %v829_v14  ;;  %v4671_v52 = vld [vmem:[#allocation55_spill] sm:$0xff] }
 0x265   : > { %2397 = vset.pattern.permute.xlu1 %v4661_v43  ;;  %v3896_v30 = vpop.permute.xlu1 %1102  ;;  %v854_v43 = vadd.f32 %v850_v24, %v828_v63  ;;  %vm892_vm9 = vcmp.eq.s32.totalorder %v3410_v19, %v4667_v51  ;;  %vm970_vm14 = vcmp.eq.s32.totalorder %v3410_v19, %v3600_v42  ;;  %1730 = vperm.xlu0 %2420, %v3574_v33   ;;  %v878_v36 = vsel %vm866_vm1, %v4666_v39, 0.0  ;;  %v4669_v24 = vld [vmem:[#allocation53_spill] sm:$0xff] }
 0x266   : > { %1407 = vperm.xlu1 %2397, %v3624_v58   ;;  %v856_v49 = vadd.f32 %v852_v56, %v830_v7  ;;  %v879_v0 = vadd.f32 %v875_v57, %v853_v9  ;;  %v901_v63 = vsel %vm889_vm5, %v4668_v28, 0.0  ;;  %v881_v6 = vadd.f32 %v877_v3, %v855_v21  ;;  %v4672_v39 = vld [vmem:[#allocation57_spill] sm:$0xff]  ;;  %v4673_v21 = vld [vmem:[#allocation59_spill] sm:$0xff] }
 0x267   : > { %v880_v11 = vadd.f32 %v876_v23, %v854_v43  ;;  %v903_v14 = vsel %vm891_vm0, %v3468_v17, 0.0  ;;  %v902_v26 = vsel %vm890_vm6, %v4668_v28, 0.0  ;;  %v904_v37 = vsel %vm892_vm9, %v3468_v17, 0.0  ;;  %v3978_v17 = vpop.permute.xlu0 %1106 }
 0x268   : > { %vm915_vm13 = vcmp.eq.s32.totalorder %v3402_v44, %v4669_v24  ;;  %vm916_vm1 = vcmp.eq.s32.totalorder %v3410_v19, %v4669_v24  ;;  %vm993_vm5 = vcmp.eq.s32.totalorder %v3402_v44, %v3658_v45  ;;  %v4670_v60 = vmov 44  }
 0x269   : > { %v882_v7 = vadd.f32 %v878_v36, %v856_v49  ;;  %v905_v56 = vadd.f32 %v901_v63, %v879_v0  ;;  %v927_v8 = vsel %vm915_vm13, %v4671_v52, 0.0  ;;  %v928_v57 = vsel %vm916_vm1, %v4671_v52, 0.0 }
 0x26a   : > { %1414 = vperm.xlu1 %2397, %v3560_v50   ;;  %v3946_v59 = vpop.permute.xlu1 %1118  ;;  %v2675_v9 = vmov 56   ;;  %v906_v23 = vadd.f32 %v902_v26, %v880_v11  ;;  %v929_v3 = vsel %vm917_vm12, %v4672_v39, 0.0  ;;  %v930_v51 = vsel %vm918_vm8, %v4672_v39, 0.0 }
 0x26b   : > { %2423 = vset.pattern.permute.xlu0 %v2675_v9  ;;  %vm943_vm6 = vcmp.eq.s32.totalorder %v3402_v44, %v4673_v21  ;;  %v907_v43 = vadd.f32 %v903_v14, %v881_v6  ;;  %v908_v49 = vadd.f32 %v904_v37, %v882_v7  ;;  %vm944_vm10 = vcmp.eq.s32.totalorder %v3410_v19, %v4673_v21  ;;  %v4674_v6 = vld [vmem:[#allocation61_spill] sm:$0xff]  ;;  %v4010_v26 = vpop.permute.xlu0 %1121 }
 0x26c   : > { %1745 = vperm.xlu0 %2423, %v3624_v58   ;;  %vm994_vm3 = vcmp.eq.s32.totalorder %v3410_v19, %v3658_v45  ;;  %v931_v0 = vadd.f32 %v927_v8, %v905_v56  ;;  %v932_v36 = vadd.f32 %v928_v57, %v906_v23  ;;  %vm1021_vm12 = vcmp.eq.s32.totalorder %v3402_v44, %v3748_v2 }
 0x26d   : > { %vm1022_vm8 = vcmp.eq.s32.totalorder %v3410_v19, %v3748_v2  ;;  %v933_v28 = vadd.f32 %v929_v3, %v907_v43  ;;  %v934_v63 = vadd.f32 %v930_v51, %v908_v49  ;;  %v955_v11 = vsel %vm943_vm6, %v3571_v48, 0.0 }
 0x26e   : > { %2398 = vset.pattern.permute.xlu1 %v4670_v60  ;;  %v3974_v41 = vpop.permute.xlu1 %1128  ;;  %v953_v14 = vsel %vm941_vm7, %v4674_v6, 0.0  ;;  %vm1045_vm2 = vcmp.eq.s32.totalorder %v3402_v44, %v3795_v54  ;;  %v956_v37 = vsel %vm944_vm10, %v3571_v48, 0.0  ;;  %v954_v24 = vsel %vm942_vm15, %v4674_v6, 0.0  ;;  %v4675_v60 = vld [vmem:[#allocation62_spill] sm:$0xff] }
 0x26f   : > { %1430 = vperm.xlu1 %2398, %v3603_v4   ;;  %vm967_vm11 = vcmp.eq.s32.totalorder %v3402_v44, %v4675_v60  ;;  %vm995_vm7 = vcmp.eq.s32.totalorder %v3402_v44, %v3503_v18  ;;  %vm968_vm0 = vcmp.eq.s32.totalorder %v3410_v19, %v4675_v60  ;;  %v981_v48 = vsel %vm969_vm4, %v3475_v31, 0.0  ;;  %v4055_v49 = vpop.permute.xlu0 %1144 }
 0x270   : > { %v979_v7 = vsel %vm967_vm11, %v3447_v22, 0.0  ;;  %vm996_vm9 = vcmp.eq.s32.totalorder %v3410_v19, %v3503_v18  ;;  %v959_v40 = vadd.f32 %v955_v11, %v933_v28  ;;  %v957_v56 = vadd.f32 %v953_v14, %v931_v0 }
 0x271   : > { %v980_v52 = vsel %vm968_vm0, %v3447_v22, 0.0  ;;  %v982_v8 = vsel %vm970_vm14, %v3475_v31, 0.0  ;;  %vm1046_vm15 = vcmp.eq.s32.totalorder %v3410_v19, %v3795_v54  ;;  %v960_v57 = vadd.f32 %v956_v37, %v934_v63 }
 0x272   : > { %v4001_v12 = vpop.permute.xlu1 %1132  ;;  %v958_v23 = vadd.f32 %v954_v24, %v932_v36  ;;  %v1007_v39 = vsel %vm995_vm7, %v3703_v46, 0.0  ;;  %vm1073_vm4 = vcmp.eq.s32.totalorder %v3402_v44, %v3879_v55  ;;  %v983_v22 = vadd.f32 %v979_v7, %v957_v56 }
 0x273   : > { %1440 = vperm.xlu1 %2398, %v3560_v50   ;;  %v985_v3 = vadd.f32 %v981_v48, %v959_v40  ;;  %v1008_v51 = vsel %vm996_vm9, %v3703_v46, 0.0  ;;  %vm1074_vm14 = vcmp.eq.s32.totalorder %v3410_v19, %v3879_v55  ;;  %v986_v42 = vadd.f32 %v982_v8, %v960_v57  ;;  %v1159_v7 = vpop.permute.xlu0 %1158 }
 0x274   : > { %v984_v31 = vadd.f32 %v980_v52, %v958_v23  ;;  %v1005_v21 = vsel %vm993_vm5, %v3518_v32, 0.0  ;;  %v1006_v43 = vsel %vm994_vm3, %v3518_v32, 0.0  ;;  %v1033_v46 = vsel %vm1021_vm12, %v3633_v20, 0.0 }
 0x275   : > { %v1011_v0 = vadd.f32 %v1007_v39, %v985_v3  ;;  %vm1047_vm13 = vcmp.eq.s32.totalorder %v3402_v44, %v3675_v34  ;;  %vm1048_vm1 = vcmp.eq.s32.totalorder %v3410_v19, %v3675_v34  ;;  %v1012_v36 = vadd.f32 %v1008_v51, %v986_v42 }
 0x276   : > { %vm1019_vm5 = vcmp.eq.s32.totalorder %v3402_v44, %v3563_v47  ;;  %v1034_v32 = vsel %vm1022_vm8, %v3633_v20, 0.0  ;;  %v4676_v45 = vmov 45   ;;  %v1009_v63 = vadd.f32 %v1005_v21, %v983_v22 }
 0x277   : > { %1444 = vperm.xlu1 %2398, %v3574_v33   ;;  %v4042_v18 = vpop.permute.xlu1 %1147  ;;  %v1010_v11 = vadd.f32 %v1006_v43, %v984_v31  ;;  %vm1020_vm6 = vcmp.eq.s32.totalorder %v3410_v19, %v3563_v47  ;;  %v1031_v6 = vsel %vm1019_vm5, %v3594_v38, 0.0  ;;  %v2676_v14 = vmov 57  }
 0x278   : > { %2424 = vset.pattern.permute.xlu0 %v2676_v14  ;;  %v1032_v37 = vsel %vm1020_vm6, %v3594_v38, 0.0  ;;  %v1037_v2 = vadd.f32 %v1033_v46, %v1011_v0  ;;  %v1059_v20 = vsel %vm1047_vm13, %v3847_v62, 0.0  ;;  %v1060_v47 = vsel %vm1048_vm1, %v3847_v62, 0.0 }
 0x279   : > { %vm1097_vm10 = vcmp.eq.s32.totalorder %v3402_v44, %v3934_v61  ;;  %vm1098_vm3 = vcmp.eq.s32.totalorder %v3410_v19, %v3934_v61  ;;  %1768 = vperm.xlu0 %2424, %v3603_v4   ;;  %v1038_v38 = vadd.f32 %v1034_v32, %v1012_v36  ;;  %v1057_v24 = vsel %vm1045_vm2, %v3706_v53, 0.0 }
 0x27a   : > { %vm1099_vm12 = vcmp.eq.s32.totalorder %v3402_v44, %v3866_v16  ;;  %vm1100_vm8 = vcmp.eq.s32.totalorder %v3410_v19, %v3866_v16  ;;  %v1035_v34 = vadd.f32 %v1031_v6, %v1009_v63  ;;  %v1085_v62 = vsel %vm1073_vm4, %v3821_v13, 0.0 }
 0x27b   : > { %2401 = vset.pattern.permute.xlu1 %v4676_v45  ;;  %v4072_v28 = vpop.permute.xlu1 %1154  ;;  %v1086_v60 = vsel %vm1074_vm14, %v3821_v13, 0.0  ;;  %vm1125_vm2 = vcmp.eq.s32.totalorder %v3402_v44, %v4010_v26  ;;  %v1036_v48 = vadd.f32 %v1032_v37, %v1010_v11  ;;  %v1063_v40 = vadd.f32 %v1059_v20, %v1037_v2 }
 0x27c   : > { %1459 = vperm.xlu1 %2401, %v3624_v58   ;;  %v1064_v56 = vadd.f32 %v1060_v47, %v1038_v38  ;;  %vm1126_vm11 = vcmp.eq.s32.totalorder %v3410_v19, %v4010_v26  ;;  %v1058_v52 = vsel %vm1046_vm15, %v3706_v53, 0.0  ;;  %v1061_v55 = vadd.f32 %v1057_v24, %v1035_v34 }
 0x27d   : > { %v1111_v13 = vsel %vm1099_vm12, %v3978_v17, 0.0  ;;  %v1112_v8 = vsel %vm1100_vm8, %v3978_v17, 0.0  ;;  %1782 = vperm.xlu0 %2424, %v3574_v33   ;;  %v1089_v57 = vadd.f32 %v1085_v62, %v1063_v40  ;;  %vm1151_vm7 = vcmp.eq.s32.totalorder %v3402_v44, %v4042_v18  ;;  %v1174_v17 = vpop.permute.xlu0 %1173 }
 0x27e   : > { %v1090_v23 = vadd.f32 %v1086_v60, %v1064_v56  ;;  %vm1152_vm0 = vcmp.eq.s32.totalorder %v3410_v19, %v4042_v18  ;;  %vm1071_vm9 = vcmp.eq.s32.totalorder %v3402_v44, %v3758_v27  ;;  %vm1072_vm15 = vcmp.eq.s32.totalorder %v3410_v19, %v3758_v27 }
 0x27f   : > { %v1137_v53 = vsel %vm1125_vm2, %v4001_v12, 0.0  ;;  %v1138_v54 = vsel %vm1126_vm11, %v4001_v12, 0.0  ;;  %v1083_v39 = vsel %vm1071_vm9, %v3788_v1, 0.0  ;;  %v1084_v22 = vsel %vm1072_vm15, %v3788_v1, 0.0 }
 0x280   : > { %1466 = vperm.xlu1 %2401, %v3560_v50   ;;  %v1171_v16 = vpop.permute.xlu1 %1170  ;;  %v1115_v3 = vadd.f32 %v1111_v13, %v1089_v57  ;;  %v1116_v18 = vadd.f32 %v1112_v8, %v1090_v23  ;;  %v4677_v51 = vmov 46   ;;  %v1062_v42 = vadd.f32 %v1058_v52, %v1036_v48 }
 0x281   : > { %v1163_v21 = vsel %vm1151_vm7, %v1159_v7, 0.0  ;;  %v1164_v27 = vsel %vm1152_vm0, %v1159_v7, 0.0  ;;  %vm1177_vm4 = vcmp.eq.s32.totalorder %v3402_v44, %v1174_v17  ;;  %vm1178_vm14 = vcmp.eq.s32.totalorder %v3410_v19, %v1174_v17  ;;  %v1197_v7 = vpop.permute.xlu0 %1196 }
 0x282   : > { %v1141_v43 = vadd.f32 %v1137_v53, %v1115_v3  ;;  %v1142_v26 = vadd.f32 %v1138_v54, %v1116_v18  ;;  %v2677_v12 = vmov 58   ;;  %v1087_v1 = vadd.f32 %v1083_v39, %v1061_v55 }
 0x283   : > { %2427 = vset.pattern.permute.xlu0 %v2677_v12  ;;  %v1088_v0 = vadd.f32 %v1084_v22, %v1062_v42  ;;  %vm1149_vm13 = vcmp.eq.s32.totalorder %v3402_v44, %v4055_v49  ;;  %vm1150_vm1 = vcmp.eq.s32.totalorder %v3410_v19, %v4055_v49  ;;  %v1109_v46 = vsel %vm1097_vm10, %v3896_v30, 0.0 }
 0x284   : > { %2402 = vset.pattern.permute.xlu1 %v4677_v51  ;;  %v1181_v31 = vpop.permute.xlu1 %1180  ;;  %1797 = vperm.xlu0 %2427, %v3624_v58   ;;  %v1110_v36 = vsel %vm1098_vm3, %v3896_v30, 0.0  ;;  %v1167_v32 = vadd.f32 %v1163_v21, %v1141_v43  ;;  %v1168_v45 = vadd.f32 %v1164_v27, %v1142_v26  ;;  %vm1123_vm5 = vcmp.eq.s32.totalorder %v3402_v44, %v3946_v59 }
 0x285   : > { %1482 = vperm.xlu1 %2402, %v3603_v4   ;;  %vm1124_vm6 = vcmp.eq.s32.totalorder %v3410_v19, %v3946_v59  ;;  %v1135_v61 = vsel %vm1123_vm5, %v3974_v41, 0.0  ;;  %v1113_v20 = vadd.f32 %v1109_v46, %v1087_v1  ;;  %v1114_v47 = vadd.f32 %v1110_v36, %v1088_v0  ;;  %v1211_v23 = vpop.permute.xlu0 %1210 }
 0x286   : > { %v1136_v30 = vsel %vm1124_vm6, %v3974_v41, 0.0  ;;  %v1161_v59 = vsel %vm1149_vm13, %v4072_v28, 0.0  ;;  %v1162_v38 = vsel %vm1150_vm1, %v4072_v28, 0.0  ;;  %vm1175_vm10 = vcmp.eq.s32.totalorder %v3402_v44, %v1171_v16 }
 0x287   : > { %v1139_v24 = vadd.f32 %v1135_v61, %v1113_v20  ;;  %v1140_v34 = vadd.f32 %v1136_v30, %v1114_v47  ;;  %vm1176_vm3 = vcmp.eq.s32.totalorder %v3410_v19, %v1171_v16  ;;  %v1187_v62 = vsel %vm1175_vm10, %v1181_v31, 0.0 }
 0x288   : > { %v1185_v63 = vpop.permute.xlu1 %1184  ;;  %v1188_v60 = vsel %vm1176_vm3, %v1181_v31, 0.0  ;;  %vm1201_vm12 = vcmp.eq.s32.totalorder %v3402_v44, %v1197_v7  ;;  %vm1202_vm8 = vcmp.eq.s32.totalorder %v3410_v19, %v1197_v7  ;;  %v4678_v56 = vmov 47  }
 0x289   : > { %v1189_v11 = vsel %vm1177_vm4, %v1185_v63, 0.0  ;;  %v1190_v6 = vsel %vm1178_vm14, %v1185_v63, 0.0  ;;  %1492 = vperm.xlu1 %2402, %v3560_v50   ;;  %v1165_v48 = vadd.f32 %v1161_v59, %v1139_v24  ;;  %v1166_v40 = vadd.f32 %v1162_v38, %v1140_v34  ;;  %v1226_v54 = vpop.permute.xlu0 %1225 }
 0x28a   : > { %v1193_v37 = vadd.f32 %v1189_v11, %v1167_v32  ;;  %v1194_v2 = vadd.f32 %v1190_v6, %v1168_v45  ;;  %v2678_v16 = vmov 59   ;;  %v4679_v17 = vmov 48  }
 0x28b   : > { %v1191_v49 = vadd.f32 %v1187_v62, %v1165_v48  ;;  %v1192_v28 = vadd.f32 %v1188_v60, %v1166_v40  ;;  %2428 = vset.pattern.permute.xlu0 %v2678_v16  ;;  %vm1229_vm7 = vcmp.eq.s32.totalorder %v3402_v44, %v1226_v54  ;;  %vm1230_vm0 = vcmp.eq.s32.totalorder %v3410_v19, %v1226_v54 }
 0x28c   : > { %1820 = vperm.xlu0 %2428, %v3603_v4   ;;  %v2679_v18 = vmov 60   ;;  %v4680_v63 = vmov 49   ;;  %v2680_v30 = vmov 61  }
 0x28d   : > { %1496 = vperm.xlu1 %2402, %v3574_v33   ;;  %v1200_v41 = vpop.permute.xlu1 %1199  ;;  %v1249_v36 = vpop.permute.xlu0 %1248 }
 0x28e   : > { %vm1203_vm2 = vcmp.eq.s32.totalorder %v3402_v44, %v1200_v41  ;;  %vm1204_vm11 = vcmp.eq.s32.totalorder %v3410_v19, %v1200_v41  ;;  %vm1253_vm4 = vcmp.eq.s32.totalorder %v3402_v44, %v1249_v36  ;;  %vm1254_vm14 = vcmp.eq.s32.totalorder %v3410_v19, %v1249_v36 }
 0x28f   : > { %v1215_v22 = vsel %vm1203_vm2, %v1211_v23, 0.0  ;;  %v1216_v3 = vsel %vm1204_vm11, %v1211_v23, 0.0  ;;  %v2681_v41 = vmov 62  }
 0x290   : > { %1834 = vperm.xlu0 %2428, %v3574_v33   ;;  %v1219_v51 = vadd.f32 %v1215_v22, %v1193_v37  ;;  %v1220_v31 = vadd.f32 %v1216_v3, %v1194_v2  ;;  %v4227_v3 = vld [vmem:[%s2979_s10 + $0x8] sm:$0xff] }
 0x291   : > { %2405 = vset.pattern.permute.xlu1 %v4678_v56  ;;  %v1207_v52 = vpop.permute.xlu1 %1206  ;;  %v1263_v20 = vpop.permute.xlu0 %1262 }
 0x292   : > { %v1213_v55 = vsel %vm1201_vm12, %v1207_v52, 0.0  ;;  %v1214_v13 = vsel %vm1202_vm8, %v1207_v52, 0.0  ;;  %1511 = vperm.xlu1 %2405, %v3624_v58  }
 0x293   : > { %v1217_v8 = vadd.f32 %v1213_v55, %v1191_v49  ;;  %v1218_v57 = vadd.f32 %v1214_v13, %v1192_v28 }
 0x294   : > { %2431 = vset.pattern.permute.xlu0 %v2679_v18 }
 0x295   : > { %1849 = vperm.xlu0 %2431, %v3624_v58   ;;  %v1278_v59 = vpop.permute.xlu0 %1277 }
 0x296   : > { %1518 = vperm.xlu1 %2405, %v3560_v50   ;;  %v1223_v53 = vpop.permute.xlu1 %1222  ;;  %vm1281_vm5 = vcmp.eq.s32.totalorder %v3402_v44, %v1278_v59  ;;  %vm1282_vm6 = vcmp.eq.s32.totalorder %v3410_v19, %v1278_v59 }
 0x297   : > { %vm1227_vm9 = vcmp.eq.s32.totalorder %v3402_v44, %v1223_v53  ;;  %vm1228_vm15 = vcmp.eq.s32.totalorder %v3410_v19, %v1223_v53 }
 0x299   : > { %2432 = vset.pattern.permute.xlu0 %v2680_v30  ;;  %v1301_v55 = vpop.permute.xlu0 %1300 }
 0x29a   : > { %2406 = vset.pattern.permute.xlu1 %v4679_v17  ;;  %v1233_v39 = vpop.permute.xlu1 %1232  ;;  %1872 = vperm.xlu0 %2432, %v3603_v4   ;;  %vm1305_vm12 = vcmp.eq.s32.totalorder %v3402_v44, %v1301_v55  ;;  %vm1306_vm8 = vcmp.eq.s32.totalorder %v3410_v19, %v1301_v55 }
 0x29b   : > { %1534 = vperm.xlu1 %2406, %v3603_v4   ;;  %v1239_v0 = vsel %vm1227_vm9, %v1233_v39, 0.0  ;;  %v1240_v46 = vsel %vm1228_vm15, %v1233_v39, 0.0  ;;  %v4223_v39 = vld [vmem:[%s2979_s10] sm:$0xff] }
 0x29c   : > { %v1243_v32 = vadd.f32 %v1239_v0, %v1217_v8  ;;  %v1244_v45 = vadd.f32 %v1240_v46, %v1218_v57  ;;  %v2682_v57 = vmov 63  }
 0x29d   : > { %v1315_v17 = vpop.permute.xlu0 %1314 }
 0x29e   : > { %v1237_v42 = vpop.permute.xlu1 %1236  ;;  %1886 = vperm.xlu0 %2432, %v3574_v33  }
 0x29f   : > { %v1241_v21 = vsel %vm1229_vm7, %v1237_v42, 0.0  ;;  %v1242_v27 = vsel %vm1230_vm0, %v1237_v42, 0.0  ;;  %1544 = vperm.xlu1 %2406, %v3560_v50  }
 0x2a0   : > { %v1245_v43 = vadd.f32 %v1241_v21, %v1219_v51  ;;  %v1246_v26 = vadd.f32 %v1242_v27, %v1220_v31 }
 0x2a2   : > { %2435 = vset.pattern.permute.xlu0 %v2681_v41 }
 0x2a3   : > { %1548 = vperm.xlu1 %2406, %v3574_v33   ;;  %v1252_v1 = vpop.permute.xlu1 %1251  ;;  %1901 = vperm.xlu0 %2435, %v3624_v58  }
 0x2a4   : > { %vm1255_vm13 = vcmp.eq.s32.totalorder %v3402_v44, %v1252_v1  ;;  %vm1256_vm1 = vcmp.eq.s32.totalorder %v3410_v19, %v1252_v1 }
 0x2a5   : > { %v1267_v24 = vsel %vm1255_vm13, %v1263_v20, 0.0  ;;  %v1268_v34 = vsel %vm1256_vm1, %v1263_v20, 0.0 }
 0x2a6   : > { %v1271_v62 = vadd.f32 %v1267_v24, %v1245_v43  ;;  %v1272_v60 = vadd.f32 %v1268_v34, %v1246_v26  ;;  %v4252_v34 = vld [vmem:[%s2970_s9] sm:$0xff] }
 0x2a7   : > { %2409 = vset.pattern.permute.xlu1 %v4680_v63  ;;  %v1259_v11 = vpop.permute.xlu1 %1258  ;;  %2436 = vset.pattern.permute.xlu0 %v2682_v57 }
 0x2a8   : > { %v1265_v6 = vsel %vm1253_vm4, %v1259_v11, 0.0  ;;  %v1266_v61 = vsel %vm1254_vm14, %v1259_v11, 0.0  ;;  %1563 = vperm.xlu1 %2409, %v3624_v58   ;;  %1924 = vperm.xlu0 %2436, %v3603_v4  }
 0x2a9   : > { %v1269_v37 = vadd.f32 %v1265_v6, %v1243_v32  ;;  %v1270_v2 = vadd.f32 %v1266_v61, %v1244_v45  ;;  %v4244_v61 = vld [vmem:[%s2970_s9 + $0x8] sm:$0xff] }
 0x2ac   : > { %1570 = vperm.xlu1 %2409, %v3560_v50   ;;  %v1275_v47 = vpop.permute.xlu1 %1274  ;;  %1938 = vperm.xlu0 %2436, %v4227_v3  }
 0x2ad   : > { %vm1279_vm10 = vcmp.eq.s32.totalorder %v3402_v44, %v1275_v47  ;;  %vm1280_vm3 = vcmp.eq.s32.totalorder %v3410_v19, %v1275_v47 }
 0x2b0   : > { %2410 = vset.pattern.permute.xlu1 %v2669_v15  ;;  %v1285_v38 = vpop.permute.xlu1 %1284 }
 0x2b1   : > { %1586 = vperm.xlu1 %2410, %v3603_v4   ;;  %v1291_v56 = vsel %vm1279_vm10, %v1285_v38, 0.0  ;;  %v1292_v52 = vsel %vm1280_vm3, %v1285_v38, 0.0 }
 0x2b2   : > { %v1295_v13 = vadd.f32 %v1291_v56, %v1269_v37 }
 0x2b4   : > { %v1289_v7 = vpop.permute.xlu1 %1288 }
 0x2b5   : > { %v1293_v48 = vsel %vm1281_vm5, %v1289_v7, 0.0  ;;  %v1294_v40 = vsel %vm1282_vm6, %v1289_v7, 0.0  ;;  %1596 = vperm.xlu1 %2410, %v3560_v50   ;;  %v1296_v50 = vadd.f32 %v1292_v52, %v1270_v2 }
 0x2b6   : > { %v1297_v15 = vadd.f32 %v1293_v48, %v1271_v62  ;;  %v1298_v49 = vadd.f32 %v1294_v40, %v1272_v60 }
 0x2b9   : > { %1600 = vperm.xlu1 %2410, %v3574_v33   ;;  %v1304_v28 = vpop.permute.xlu1 %1303 }
 0x2ba   : > { %vm1307_vm2 = vcmp.eq.s32.totalorder %v3402_v44, %v1304_v28  ;;  %vm1308_vm11 = vcmp.eq.s32.totalorder %v3410_v19, %v1304_v28 }
 0x2bb   : > { %v1319_v51 = vsel %vm1307_vm2, %v1315_v17, 0.0  ;;  %v1320_v31 = vsel %vm1308_vm11, %v1315_v17, 0.0 }
 0x2bc   : > { %v1323_v42 = vadd.f32 %v1319_v51, %v1297_v15  ;;  %v1324_v21 = vadd.f32 %v1320_v31, %v1298_v49 }
 0x2bd   : > { %2413 = vset.pattern.permute.xlu1 %v2670_v25  ;;  %v1311_v8 = vpop.permute.xlu1 %1310  ;;  %v1330_v25 = vpop.permute.xlu0 %1329 }
 0x2be   : > { %v1317_v23 = vsel %vm1305_vm12, %v1311_v8, 0.0  ;;  %v1318_v33 = vsel %vm1306_vm8, %v1311_v8, 0.0  ;;  %1615 = vperm.xlu1 %2413, %v3624_v58   ;;  %vm1333_vm7 = vcmp.eq.s32.totalorder %v3402_v44, %v1330_v25  ;;  %vm1334_vm0 = vcmp.eq.s32.totalorder %v3410_v19, %v1330_v25 }
 0x2bf   : > { %v1321_v53 = vadd.f32 %v1317_v23, %v1295_v13  ;;  %v1322_v54 = vadd.f32 %v1318_v33, %v1296_v50 }
 0x2c1   : > { %v1353_v36 = vpop.permute.xlu0 %1352 }
 0x2c2   : > { %1622 = vperm.xlu1 %2413, %v4223_v39   ;;  %v1327_v22 = vpop.permute.xlu1 %1326  ;;  %vm1357_vm4 = vcmp.eq.s32.totalorder %v3402_v44, %v1353_v36  ;;  %vm1358_vm14 = vcmp.eq.s32.totalorder %v3410_v19, %v1353_v36 }
 0x2c3   : > { %vm1331_vm9 = vcmp.eq.s32.totalorder %v3402_v44, %v1327_v22  ;;  %vm1332_vm15 = vcmp.eq.s32.totalorder %v3410_v19, %v1327_v22 }
 0x2c5   : > { %v1367_v20 = vpop.permute.xlu0 %1366 }
 0x2c6   : > { %2414 = vset.pattern.permute.xlu1 %v2671_v29  ;;  %v1337_v58 = vpop.permute.xlu1 %1336 }
 0x2c7   : > { %1638 = vperm.xlu1 %2414, %v3603_v4   ;;  %v1343_v29 = vsel %vm1331_vm9, %v1337_v58, 0.0  ;;  %v1344_v46 = vsel %vm1332_vm15, %v1337_v58, 0.0 }
 0x2c8   : > { %v1347_v32 = vadd.f32 %v1343_v29, %v1321_v53  ;;  %v1348_v45 = vadd.f32 %v1344_v46, %v1322_v54 }
 0x2c9   : > { %v1382_v59 = vpop.permute.xlu0 %1381 }
 0x2ca   : > { %v1341_v27 = vpop.permute.xlu1 %1340  ;;  %vm1385_vm5 = vcmp.eq.s32.totalorder %v3402_v44, %v1382_v59  ;;  %vm1386_vm6 = vcmp.eq.s32.totalorder %v3410_v19, %v1382_v59 }
 0x2cb   : > { %v1345_v43 = vsel %vm1333_vm7, %v1341_v27, 0.0  ;;  %v1346_v26 = vsel %vm1334_vm0, %v1341_v27, 0.0  ;;  %1648 = vperm.xlu1 %2414, %v4223_v39  }
 0x2cc   : > { %v1349_v1 = vadd.f32 %v1345_v43, %v1323_v42  ;;  %v1350_v0 = vadd.f32 %v1346_v26, %v1324_v21 }
 0x2cd   : > { %v1405_v49 = vpop.permute.xlu0 %1404 }
 0x2ce   : > { %vm1409_vm12 = vcmp.eq.s32.totalorder %v3402_v44, %v1405_v49  ;;  %vm1410_vm8 = vcmp.eq.s32.totalorder %v3410_v19, %v1405_v49 }
 0x2cf   : > { %1652 = vperm.xlu1 %2414, %v4227_v3   ;;  %v1356_v4 = vpop.permute.xlu1 %1355 }
 0x2d0   : > { %vm1359_vm13 = vcmp.eq.s32.totalorder %v3402_v44, %v1356_v4  ;;  %vm1360_vm1 = vcmp.eq.s32.totalorder %v3410_v19, %v1356_v4 }
 0x2d1   : > { %v1371_v38 = vsel %vm1359_vm13, %v1367_v20, 0.0  ;;  %v1372_v24 = vsel %vm1360_vm1, %v1367_v20, 0.0  ;;  %v1419_v8 = vpop.permute.xlu0 %1418 }
 0x2d2   : > { %v1375_v62 = vadd.f32 %v1371_v38, %v1349_v1  ;;  %v1376_v60 = vadd.f32 %v1372_v24, %v1350_v0 }
 0x2d3   : > { %2417 = vset.pattern.permute.xlu1 %v2672_v10  ;;  %v1363_v63 = vpop.permute.xlu1 %1362 }
 0x2d4   : > { %v1369_v11 = vsel %vm1357_vm4, %v1363_v63, 0.0  ;;  %v1370_v6 = vsel %vm1358_vm14, %v1363_v63, 0.0  ;;  %1667 = vperm.xlu1 %2417, %v4244_v61  }
 0x2d5   : > { %v1373_v37 = vadd.f32 %v1369_v11, %v1347_v32  ;;  %v1374_v2 = vadd.f32 %v1370_v6, %v1348_v45  ;;  %v1434_v22 = vpop.permute.xlu0 %1433 }
 0x2d6   : > { %vm1437_vm9 = vcmp.eq.s32.totalorder %v3402_v44, %v1434_v22  ;;  %vm1438_vm15 = vcmp.eq.s32.totalorder %v3410_v19, %v1434_v22 }
 0x2d8   : > { %1674 = vperm.xlu1 %2417, %v4223_v39   ;;  %v1379_v47 = vpop.permute.xlu1 %1378 }
 0x2d9   : > { %vm1383_vm10 = vcmp.eq.s32.totalorder %v3402_v44, %v1379_v47  ;;  %vm1384_vm3 = vcmp.eq.s32.totalorder %v3410_v19, %v1379_v47  ;;  %v1457_v27 = vpop.permute.xlu0 %1456 }
 0x2da   : > { %vm1461_vm13 = vcmp.eq.s32.totalorder %v3402_v44, %v1457_v27  ;;  %vm1462_vm1 = vcmp.eq.s32.totalorder %v3410_v19, %v1457_v27 }
 0x2dc   : > { %2418 = vset.pattern.permute.xlu1 %v2673_v35  ;;  %v1389_v10 = vpop.permute.xlu1 %1388 }
 0x2dd   : > { %1690 = vperm.xlu1 %2418, %v4252_v34   ;;  %v1395_v56 = vsel %vm1383_vm10, %v1389_v10, 0.0  ;;  %v1396_v52 = vsel %vm1384_vm3, %v1389_v10, 0.0  ;;  %v1471_v46 = vpop.permute.xlu0 %1470 }
 0x2de   : > { %v1399_v55 = vadd.f32 %v1395_v56, %v1373_v37  ;;  %v1400_v13 = vadd.f32 %v1396_v52, %v1374_v2 }
 0x2e0   : > { %v1393_v7 = vpop.permute.xlu1 %1392 }
 0x2e1   : > { %v1397_v48 = vsel %vm1385_vm5, %v1393_v7, 0.0  ;;  %v1398_v40 = vsel %vm1386_vm6, %v1393_v7, 0.0  ;;  %1700 = vperm.xlu1 %2418, %v4223_v39   ;;  %v1486_v10 = vpop.permute.xlu0 %1485 }
 0x2e2   : > { %v1401_v15 = vadd.f32 %v1397_v48, %v1375_v62  ;;  %v1402_v35 = vadd.f32 %v1398_v40, %v1376_v60  ;;  %vm1489_vm10 = vcmp.eq.s32.totalorder %v3402_v44, %v1486_v10  ;;  %vm1490_vm3 = vcmp.eq.s32.totalorder %v3410_v19, %v1486_v10 }
 0x2e5   : > { %1704 = vperm.xlu1 %2418, %v4227_v3   ;;  %v1408_v28 = vpop.permute.xlu1 %1407  ;;  %v1509_v7 = vpop.permute.xlu0 %1508 }
 0x2e6   : > { %vm1411_vm2 = vcmp.eq.s32.totalorder %v3402_v44, %v1408_v28  ;;  %vm1412_vm11 = vcmp.eq.s32.totalorder %v3410_v19, %v1408_v28 }
 0x2e7   : > { %v1423_v25 = vsel %vm1411_vm2, %v1419_v8, 0.0  ;;  %v1424_v58 = vsel %vm1412_vm11, %v1419_v8, 0.0  ;;  %vm1513_vm2 = vcmp.eq.s32.totalorder %v3402_v44, %v1509_v7  ;;  %vm1514_vm11 = vcmp.eq.s32.totalorder %v3410_v19, %v1509_v7 }
 0x2e8   : > { %v1427_v43 = vadd.f32 %v1423_v25, %v1401_v15 }
 0x2e9   : > { %2421 = vset.pattern.permute.xlu1 %v2674_v5  ;;  %v1415_v50 = vpop.permute.xlu1 %1414 }
 0x2ea   : > { %v1421_v23 = vsel %vm1409_vm12, %v1415_v50, 0.0  ;;  %v1422_v33 = vsel %vm1410_vm8, %v1415_v50, 0.0  ;;  %1719 = vperm.xlu1 %2421, %v4244_v61  }
 0x2eb   : > { %v1425_v53 = vadd.f32 %v1421_v23, %v1399_v55  ;;  %v1426_v54 = vadd.f32 %v1422_v33, %v1400_v13 }
 0x2ee   : > { %1726 = vperm.xlu1 %2421, %v4223_v39   ;;  %v1431_v17 = vpop.permute.xlu1 %1430 }
 0x2ef   : > { %vm1435_vm7 = vcmp.eq.s32.totalorder %v3402_v44, %v1431_v17  ;;  %vm1436_vm0 = vcmp.eq.s32.totalorder %v3410_v19, %v1431_v17 }
 0x2f2   : > { %2422 = vset.pattern.permute.xlu1 %v2675_v9  ;;  %v1441_v5 = vpop.permute.xlu1 %1440  ;;  %v1428_v9 = vadd.f32 %v1424_v58, %v1402_v35 }
 0x2f3   : > { %v1447_v51 = vsel %vm1435_vm7, %v1441_v5, 0.0  ;;  %v1448_v31 = vsel %vm1436_vm0, %v1441_v5, 0.0  ;;  %1742 = vperm.xlu1 %2422, %v4252_v34  }
 0x2f4   : > { %v1451_v42 = vadd.f32 %v1447_v51, %v1425_v53  ;;  %v1452_v21 = vadd.f32 %v1448_v31, %v1426_v54 }
 0x2f6   : > { %v1445_v26 = vpop.permute.xlu1 %1444 }
 0x2f7   : > { %v1449_v1 = vsel %vm1437_vm9, %v1445_v26, 0.0  ;;  %v1450_v0 = vsel %vm1438_vm15, %v1445_v26, 0.0  ;;  %1752 = vperm.xlu1 %2422, %v4223_v39  }
 0x2f8   : > { %v1453_v4 = vadd.f32 %v1449_v1, %v1427_v43  ;;  %v1454_v29 = vadd.f32 %v1450_v0, %v1428_v9 }
 0x2fb   : > { %1756 = vperm.xlu1 %2422, %v4227_v3   ;;  %v1460_v36 = vpop.permute.xlu1 %1459 }
 0x2fc   : > { %vm1463_vm4 = vcmp.eq.s32.totalorder %v3402_v44, %v1460_v36  ;;  %vm1464_vm14 = vcmp.eq.s32.totalorder %v3410_v19, %v1460_v36 }
 0x2fd   : > { %v1475_v32 = vsel %vm1463_vm4, %v1471_v46, 0.0  ;;  %v1476_v45 = vsel %vm1464_vm14, %v1471_v46, 0.0 }
 0x2fe   : > { %v1479_v63 = vadd.f32 %v1475_v32, %v1453_v4  ;;  %v1480_v11 = vadd.f32 %v1476_v45, %v1454_v29 }
 0x2ff   : > { %2425 = vset.pattern.permute.xlu1 %v2676_v14  ;;  %v1467_v6 = vpop.permute.xlu1 %1466 }
 0x300   : > { %v1473_v37 = vsel %vm1461_vm13, %v1467_v6, 0.0  ;;  %v1474_v2 = vsel %vm1462_vm1, %v1467_v6, 0.0  ;;  %1771 = vperm.xlu1 %2425, %v4244_v61  }
 0x301   : > { %v1477_v20 = vadd.f32 %v1473_v37, %v1451_v42  ;;  %v1478_v47 = vadd.f32 %v1474_v2, %v1452_v21 }
 0x304   : > { %1778 = vperm.xlu1 %2425, %v4223_v39   ;;  %v1483_v59 = vpop.permute.xlu1 %1482 }
 0x305   : > { %vm1487_vm5 = vcmp.eq.s32.totalorder %v3402_v44, %v1483_v59  ;;  %vm1488_vm6 = vcmp.eq.s32.totalorder %v3410_v19, %v1483_v59 }
 0x308   : > { %2426 = vset.pattern.permute.xlu1 %v2677_v12  ;;  %v1493_v38 = vpop.permute.xlu1 %1492  ;;  %v1523_v12 = vpop.permute.xlu0 %1522 }
 0x309   : > { %v1499_v24 = vsel %vm1487_vm5, %v1493_v38, 0.0  ;;  %v1500_v14 = vsel %vm1488_vm6, %v1493_v38, 0.0  ;;  %1794 = vperm.xlu1 %2426, %v4252_v34  }
 0x30a   : > { %v1503_v62 = vadd.f32 %v1499_v24, %v1477_v20  ;;  %v1504_v60 = vadd.f32 %v1500_v14, %v1478_v47 }
 0x30c   : > { %v1497_v48 = vpop.permute.xlu1 %1496  ;;  %v1538_v17 = vpop.permute.xlu0 %1537 }
 0x30d   : > { %v1501_v40 = vsel %vm1489_vm10, %v1497_v48, 0.0  ;;  %v1502_v15 = vsel %vm1490_vm3, %v1497_v48, 0.0  ;;  %1804 = vperm.xlu1 %2426, %v4223_v39   ;;  %vm1541_vm9 = vcmp.eq.s32.totalorder %v3402_v44, %v1538_v17  ;;  %vm1542_vm15 = vcmp.eq.s32.totalorder %v3410_v19, %v1538_v17 }
 0x30e   : > { %v1505_v35 = vadd.f32 %v1501_v40, %v1479_v63  ;;  %v1506_v49 = vadd.f32 %v1502_v15, %v1480_v11  ;;  %v275_v40 = vld [vmem:[%s218_s2] sm:$0xff] }
 0x310   : > { %v1561_v51 = vpop.permute.xlu0 %1560 }
 0x311   : > { %1808 = vperm.xlu1 %2426, %v4227_v3   ;;  %v1512_v28 = vpop.permute.xlu1 %1511  ;;  %vm1565_vm13 = vcmp.eq.s32.totalorder %v3402_v44, %v1561_v51  ;;  %vm1566_vm1 = vcmp.eq.s32.totalorder %v3410_v19, %v1561_v51 }
 0x312   : > { %vm1515_vm12 = vcmp.eq.s32.totalorder %v3402_v44, %v1512_v28  ;;  %vm1516_vm8 = vcmp.eq.s32.totalorder %v3410_v19, %v1512_v28 }
 0x313   : > { %v1527_v56 = vsel %vm1515_vm12, %v1523_v12, 0.0  ;;  %v1528_v52 = vsel %vm1516_vm8, %v1523_v12, 0.0 }
 0x314   : > { %v1531_v55 = vadd.f32 %v1527_v56, %v1505_v35  ;;  %v1532_v13 = vadd.f32 %v1528_v52, %v1506_v49  ;;  %v1950_v35 = vcombine.high %v275_v40, %v275_v40 }
 0x315   : > { %2429 = vset.pattern.permute.xlu1 %v2678_v16  ;;  %v1519_v50 = vpop.permute.xlu1 %1518 }
 0x316   : > { %v1525_v8 = vsel %vm1513_vm2, %v1519_v50, 0.0  ;;  %v1526_v23 = vsel %vm1514_vm11, %v1519_v50, 0.0  ;;  %1823 = vperm.xlu1 %2429, %v4244_v61   ;;  %2164 = vmatprep.subr.mxu1 %v1950_v35 }
 0x317   : > { %v1529_v33 = vadd.f32 %v1525_v8, %v1503_v62  ;;  %v1530_v53 = vadd.f32 %v1526_v23, %v1504_v60  ;;  %1952 = vmatprep.subr.mxu0 %v1950_v35  ;;  %2165 = vmatpush1.xpose.msra.mxu1 %v275_v40 }
 0x318   : > { %1953 = vmatpush1.xpose.msra.mxu0 %v275_v40 }
 0x31a   : > { %1830 = vperm.xlu1 %2429, %v4223_v39   ;;  %v1535_v54 = vpop.permute.xlu1 %1534 }
 0x31b   : > { %vm1539_vm7 = vcmp.eq.s32.totalorder %v3402_v44, %v1535_v54  ;;  %vm1540_vm0 = vcmp.eq.s32.totalorder %v3410_v19, %v1535_v54 }
 0x31e   : > { %2430 = vset.pattern.permute.xlu1 %v2679_v18  ;;  %v1545_v22 = vpop.permute.xlu1 %1544  ;;  %v1575_v18 = vpop.permute.xlu0 %1574 }
 0x31f   : > { %v1551_v5 = vsel %vm1539_vm7, %v1545_v22, 0.0  ;;  %v1552_v16 = vsel %vm1540_vm0, %v1545_v22, 0.0  ;;  %1846 = vperm.xlu1 %2430, %v4252_v34  }
 0x320   : > { %v1555_v25 = vadd.f32 %v1551_v5, %v1529_v33  ;;  %v1556_v58 = vadd.f32 %v1552_v16, %v1530_v53 }
 0x322   : > { %v1549_v31 = vpop.permute.xlu1 %1548  ;;  %v1590_v11 = vpop.permute.xlu0 %1589 }
 0x323   : > { %v1553_v42 = vsel %vm1541_vm9, %v1549_v31, 0.0  ;;  %v1554_v21 = vsel %vm1542_vm15, %v1549_v31, 0.0  ;;  %1856 = vperm.xlu1 %2430, %v4223_v39   ;;  %vm1593_vm10 = vcmp.eq.s32.totalorder %v3402_v44, %v1590_v11  ;;  %vm1594_vm3 = vcmp.eq.s32.totalorder %v3410_v19, %v1590_v11 }
 0x324   : > { %v1557_v27 = vadd.f32 %v1553_v42, %v1531_v55  ;;  %v1558_v43 = vadd.f32 %v1554_v21, %v1532_v13 }
 0x326   : > { %v1613_v47 = vpop.permute.xlu0 %1612 }
 0x327   : > { %1860 = vperm.xlu1 %2430, %v4227_v3   ;;  %v1564_v9 = vpop.permute.xlu1 %1563  ;;  %vm1617_vm2 = vcmp.eq.s32.totalorder %v3402_v44, %v1613_v47  ;;  %vm1618_vm11 = vcmp.eq.s32.totalorder %v3410_v19, %v1613_v47 }
 0x328   : > { %vm1567_vm4 = vcmp.eq.s32.totalorder %v3402_v44, %v1564_v9  ;;  %vm1568_vm14 = vcmp.eq.s32.totalorder %v3410_v19, %v1564_v9 }
 0x329   : > { %v1579_v26 = vsel %vm1567_vm4, %v1575_v18, 0.0  ;;  %v1580_v1 = vsel %vm1568_vm14, %v1575_v18, 0.0 }
 0x32a   : > { %v1583_v0 = vadd.f32 %v1579_v26, %v1557_v27  ;;  %v1584_v4 = vadd.f32 %v1580_v1, %v1558_v43  ;;  %v1627_v14 = vpop.permute.xlu0 %1626 }
 0x32b   : > { %2433 = vset.pattern.permute.xlu1 %v2680_v30  ;;  %v1571_v29 = vpop.permute.xlu1 %1570 }
 0x32c   : > { %v1577_v46 = vsel %vm1565_vm13, %v1571_v29, 0.0  ;;  %v1578_v36 = vsel %vm1566_vm1, %v1571_v29, 0.0  ;;  %1875 = vperm.xlu1 %2433, %v4244_v61  }
 0x32d   : > { %v1581_v32 = vadd.f32 %v1577_v46, %v1555_v25  ;;  %v1582_v45 = vadd.f32 %v1578_v36, %v1556_v58 }
 0x32e   : > { %v1642_v52 = vpop.permute.xlu0 %1641 }
 0x32f   : > { %vm1645_vm9 = vcmp.eq.s32.totalorder %v3402_v44, %v1642_v52  ;;  %vm1646_vm15 = vcmp.eq.s32.totalorder %v3410_v19, %v1642_v52 }
 0x330   : > { %1882 = vperm.xlu1 %2433, %v4223_v39   ;;  %v1587_v63 = vpop.permute.xlu1 %1586 }
 0x331   : > { %vm1591_vm5 = vcmp.eq.s32.totalorder %v3402_v44, %v1587_v63  ;;  %vm1592_vm6 = vcmp.eq.s32.totalorder %v3410_v19, %v1587_v63 }
 0x334   : > { %2434 = vset.pattern.permute.xlu1 %v2681_v41  ;;  %v1597_v6 = vpop.permute.xlu1 %1596 }
 0x335   : > { %v1603_v37 = vsel %vm1591_vm5, %v1597_v6, 0.0  ;;  %v1604_v30 = vsel %vm1592_vm6, %v1597_v6, 0.0  ;;  %1898 = vperm.xlu1 %2434, %v4252_v34  }
 0x336   : > { %v1607_v2 = vadd.f32 %v1603_v37, %v1581_v32  ;;  %v1608_v20 = vadd.f32 %v1604_v30, %v1582_v45 }
 0x338   : > { %v1601_v59 = vpop.permute.xlu1 %1600 }
 0x339   : > { %v1605_v10 = vsel %vm1593_vm10, %v1601_v59, 0.0  ;;  %v1606_v38 = vsel %vm1594_vm3, %v1601_v59, 0.0  ;;  %1908 = vperm.xlu1 %2434, %v4223_v39  }
 0x33a   : > { %v1609_v24 = vadd.f32 %v1605_v10, %v1583_v0  ;;  %v1610_v41 = vadd.f32 %v1606_v38, %v1584_v4 }
 0x33d   : > { %1912 = vperm.xlu1 %2434, %v4227_v3   ;;  %v1616_v62 = vpop.permute.xlu1 %1615 }
 0x33e   : > { %vm1619_vm12 = vcmp.eq.s32.totalorder %v3402_v44, %v1616_v62  ;;  %vm1620_vm8 = vcmp.eq.s32.totalorder %v3410_v19, %v1616_v62 }
 0x33f   : > { %v1631_v34 = vsel %vm1619_vm12, %v1627_v14, 0.0  ;;  %v1632_v60 = vsel %vm1620_vm8, %v1627_v14, 0.0 }
 0x340   : > { %v1635_v7 = vadd.f32 %v1631_v34, %v1609_v24  ;;  %v1636_v48 = vadd.f32 %v1632_v60, %v1610_v41 }
 0x341   : > { %2437 = vset.pattern.permute.xlu1 %v2682_v57  ;;  %v1623_v15 = vpop.permute.xlu1 %1622 }
 0x342   : > { %v1629_v3 = vsel %vm1617_vm2, %v1623_v15, 0.0  ;;  %v1630_v49 = vsel %vm1618_vm11, %v1623_v15, 0.0  ;;  %1927 = vperm.xlu1 %2437, %v4244_v61   ;;  %v1665_v61 = vpop.permute.xlu0 %1664 }
 0x343   : > { %v1633_v12 = vadd.f32 %v1629_v3, %v1607_v2  ;;  %v1634_v28 = vadd.f32 %v1630_v49, %v1608_v20  ;;  %vm1669_vm13 = vcmp.eq.s32.totalorder %v3402_v44, %v1665_v61  ;;  %vm1670_vm1 = vcmp.eq.s32.totalorder %v3410_v19, %v1665_v61 }
 0x346   : > { %1934 = vperm.xlu1 %2437, %v4223_v39   ;;  %v1639_v56 = vpop.permute.xlu1 %1638  ;;  %v1679_v17 = vpop.permute.xlu0 %1678 }
 0x347   : > { %vm1643_vm7 = vcmp.eq.s32.totalorder %v3402_v44, %v1639_v56  ;;  %vm1644_vm0 = vcmp.eq.s32.totalorder %v3410_v19, %v1639_v56 }
 0x34a   : > { %v1649_v57 = vpop.permute.xlu1 %1648  ;;  %v1694_v18 = vpop.permute.xlu0 %1693 }
 0x34b   : > { %v1655_v55 = vsel %vm1643_vm7, %v1649_v57, 0.0  ;;  %v1656_v13 = vsel %vm1644_vm0, %v1649_v57, 0.0  ;;  %vm1697_vm10 = vcmp.eq.s32.totalorder %v3402_v44, %v1694_v18  ;;  %vm1698_vm3 = vcmp.eq.s32.totalorder %v3410_v19, %v1694_v18 }
 0x34c   : > { %v1659_v50 = vadd.f32 %v1655_v55, %v1633_v12  ;;  %v1660_v8 = vadd.f32 %v1656_v13, %v1634_v28 }
 0x34e   : > { %v1653_v23 = vpop.permute.xlu1 %1652  ;;  %v1717_v29 = vpop.permute.xlu0 %1716 }
 0x34f   : > { %v1657_v33 = vsel %vm1645_vm9, %v1653_v23, 0.0  ;;  %v1658_v53 = vsel %vm1646_vm15, %v1653_v23, 0.0  ;;  %vm1721_vm2 = vcmp.eq.s32.totalorder %v3402_v44, %v1717_v29  ;;  %vm1722_vm11 = vcmp.eq.s32.totalorder %v3410_v19, %v1717_v29 }
 0x350   : > { %v1661_v39 = vadd.f32 %v1657_v33, %v1635_v7  ;;  %v1662_v54 = vadd.f32 %v1658_v53, %v1636_v48 }
 0x352   : > { %v1731_v11 = vpop.permute.xlu0 %1730 }
 0x353   : > { %v1668_v22 = vpop.permute.xlu1 %1667 }
 0x354   : > { %vm1671_vm4 = vcmp.eq.s32.totalorder %v3402_v44, %v1668_v22  ;;  %vm1672_vm14 = vcmp.eq.s32.totalorder %v3410_v19, %v1668_v22 }
 0x355   : > { %v1683_v5 = vsel %vm1671_vm4, %v1679_v17, 0.0  ;;  %v1684_v16 = vsel %vm1672_vm14, %v1679_v17, 0.0 }
 0x356   : > { %v1687_v25 = vadd.f32 %v1683_v5, %v1661_v39  ;;  %v1688_v58 = vadd.f32 %v1684_v16, %v1662_v54  ;;  %v1746_v60 = vpop.permute.xlu0 %1745 }
 0x357   : > { %v1675_v51 = vpop.permute.xlu1 %1674  ;;  %vm1749_vm7 = vcmp.eq.s32.totalorder %v3402_v44, %v1746_v60  ;;  %vm1750_vm0 = vcmp.eq.s32.totalorder %v3410_v19, %v1746_v60 }
 0x358   : > { %v1681_v31 = vsel %vm1669_vm13, %v1675_v51, 0.0  ;;  %v1682_v42 = vsel %vm1670_vm1, %v1675_v51, 0.0 }
 0x359   : > { %v1685_v21 = vadd.f32 %v1681_v31, %v1659_v50  ;;  %v1686_v27 = vadd.f32 %v1682_v42, %v1660_v8 }
 0x35a   : > { %v1769_v40 = vpop.permute.xlu0 %1768 }
 0x35b   : > { %vm1773_vm9 = vcmp.eq.s32.totalorder %v3402_v44, %v1769_v40  ;;  %vm1774_vm15 = vcmp.eq.s32.totalorder %v3410_v19, %v1769_v40 }
 0x35c   : > { %v1691_v43 = vpop.permute.xlu1 %1690 }
 0x35d   : > { %vm1695_vm5 = vcmp.eq.s32.totalorder %v3402_v44, %v1691_v43  ;;  %vm1696_vm6 = vcmp.eq.s32.totalorder %v3410_v19, %v1691_v43 }
 0x35e   : > { %v1783_v35 = vpop.permute.xlu0 %1782 }
 0x360   : > { %v1701_v9 = vpop.permute.xlu1 %1700 }
 0x361   : > { %v1707_v26 = vsel %vm1695_vm5, %v1701_v9, 0.0  ;;  %v1708_v1 = vsel %vm1696_vm6, %v1701_v9, 0.0 }
 0x362   : > { %v1711_v0 = vadd.f32 %v1707_v26, %v1685_v21  ;;  %v1712_v4 = vadd.f32 %v1708_v1, %v1686_v27  ;;  %v1798_v49 = vpop.permute.xlu0 %1797 }
 0x363   : > { %vm1801_vm13 = vcmp.eq.s32.totalorder %v3402_v44, %v1798_v49  ;;  %vm1802_vm1 = vcmp.eq.s32.totalorder %v3410_v19, %v1798_v49 }
 0x364   : > { %v1705_v46 = vpop.permute.xlu1 %1704 }
 0x365   : > { %v1709_v36 = vsel %vm1697_vm10, %v1705_v46, 0.0  ;;  %v1710_v32 = vsel %vm1698_vm3, %v1705_v46, 0.0 }
 0x366   : > { %v1713_v45 = vadd.f32 %v1709_v36, %v1687_v25  ;;  %v1714_v63 = vadd.f32 %v1710_v32, %v1688_v58  ;;  %v4346_v28 = vpop.permute.xlu0 %1820 }
 0x367   : > { %vm1825_vm10 = vcmp.eq.s32.totalorder %v3402_v44, %v4346_v28  ;;  %vm1826_vm3 = vcmp.eq.s32.totalorder %v3410_v19, %v4346_v28 }
 0x369   : > { %v1720_v6 = vpop.permute.xlu1 %1719 }
 0x36a   : > { %vm1723_vm12 = vcmp.eq.s32.totalorder %v3402_v44, %v1720_v6  ;;  %vm1724_vm8 = vcmp.eq.s32.totalorder %v3410_v19, %v1720_v6  ;;  %v1835_v57 = vpop.permute.xlu0 %1834 }
 0x36b   : > { %v1735_v37 = vsel %vm1723_vm12, %v1731_v11, 0.0  ;;  %v1736_v30 = vsel %vm1724_vm8, %v1731_v11, 0.0 }
 0x36c   : > { %v1739_v2 = vadd.f32 %v1735_v37, %v1713_v45  ;;  %v1740_v20 = vadd.f32 %v1736_v30, %v1714_v63 }
 0x36d   : > { %v1727_v47 = vpop.permute.xlu1 %1726 }
 0x36e   : > { %v1733_v59 = vsel %vm1721_vm2, %v1727_v47, 0.0  ;;  %v1734_v10 = vsel %vm1722_vm11, %v1727_v47, 0.0  ;;  %v1850_v13 = vpop.permute.xlu0 %1849 }
 0x36f   : > { %v1737_v38 = vadd.f32 %v1733_v59, %v1711_v0  ;;  %v1738_v24 = vadd.f32 %v1734_v10, %v1712_v4  ;;  %vm1853_vm12 = vcmp.eq.s32.totalorder %v3402_v44, %v1850_v13  ;;  %vm1854_vm8 = vcmp.eq.s32.totalorder %v3410_v19, %v1850_v13 }
 0x372   : > { %v1743_v41 = vpop.permute.xlu1 %1742  ;;  %v4354_v8 = vpop.permute.xlu0 %1872 }
 0x373   : > { %vm1747_vm5 = vcmp.eq.s32.totalorder %v3402_v44, %v1743_v41  ;;  %vm1748_vm6 = vcmp.eq.s32.totalorder %v3410_v19, %v1743_v41 }
 0x376   : > { %v1753_v14 = vpop.permute.xlu1 %1752  ;;  %v1887_v23 = vpop.permute.xlu0 %1886 }
 0x377   : > { %v1759_v54 = vsel %vm1747_vm5, %v1753_v14, 0.0  ;;  %v1760_v17 = vsel %vm1748_vm6, %v1753_v14, 0.0 }
 0x378   : > { %v1763_v31 = vadd.f32 %v1759_v54, %v1737_v38  ;;  %v1764_v42 = vadd.f32 %v1760_v17, %v1738_v24 }
 0x37a   : > { %v1757_v62 = vpop.permute.xlu1 %1756  ;;  %v1902_v16 = vpop.permute.xlu0 %1901 }
 0x37b   : > { %v1761_v53 = vsel %vm1749_vm7, %v1757_v62, 0.0  ;;  %v1762_v39 = vsel %vm1750_vm0, %v1757_v62, 0.0  ;;  %vm1905_vm2 = vcmp.eq.s32.totalorder %v3402_v44, %v1902_v16  ;;  %vm1906_vm11 = vcmp.eq.s32.totalorder %v3410_v19, %v1902_v16 }
 0x37c   : > { %v1765_v25 = vadd.f32 %v1761_v53, %v1739_v2  ;;  %v1766_v58 = vadd.f32 %v1762_v39, %v1740_v20 }
 0x37e   : > { %v1925_v37 = vpop.permute.xlu0 %1924 }
 0x37f   : > { %v1772_v34 = vpop.permute.xlu1 %1771 }
 0x380   : > { %vm1775_vm4 = vcmp.eq.s32.totalorder %v3402_v44, %v1772_v34  ;;  %vm1776_vm14 = vcmp.eq.s32.totalorder %v3410_v19, %v1772_v34 }
 0x381   : > { %v1787_v22 = vsel %vm1775_vm4, %v1783_v35, 0.0  ;;  %v1788_v5 = vsel %vm1776_vm14, %v1783_v35, 0.0  ;;  %vm1877_vm4 = vcmp.eq.s32.totalorder %v3402_v44, %v4354_v8  ;;  %vm1878_vm14 = vcmp.eq.s32.totalorder %v3410_v19, %v4354_v8 }
 0x382   : > { %v1791_v21 = vadd.f32 %v1787_v22, %v1765_v25  ;;  %v1792_v27 = vadd.f32 %v1788_v5, %v1766_v58  ;;  %v1939_v28 = vpop.permute.xlu0 %1938 }
 0x383   : > { %v1779_v7 = vpop.permute.xlu1 %1778 }
 0x384   : > { %v1785_v9 = vsel %vm1773_vm9, %v1779_v7, 0.0  ;;  %v1786_v26 = vsel %vm1774_vm15, %v1779_v7, 0.0 }
 0x385   : > { %v1789_v45 = vadd.f32 %v1785_v9, %v1763_v31  ;;  %v1790_v63 = vadd.f32 %v1786_v26, %v1764_v42 }
 0x388   : > { %v1795_v48 = vpop.permute.xlu1 %1794 }
 0x389   : > { %vm1799_vm5 = vcmp.eq.s32.totalorder %v3402_v44, %v1795_v48  ;;  %vm1800_vm6 = vcmp.eq.s32.totalorder %v3410_v19, %v1795_v48 }
 0x38c   : > { %v1805_v15 = vpop.permute.xlu1 %1804 }
 0x38d   : > { %v1811_v1 = vsel %vm1799_vm5, %v1805_v15, 0.0  ;;  %v1812_v0 = vsel %vm1800_vm6, %v1805_v15, 0.0 }
 0x38e   : > { %v1815_v59 = vadd.f32 %v1811_v1, %v1789_v45  ;;  %v1816_v10 = vadd.f32 %v1812_v0, %v1790_v63 }
 0x390   : > { %v1809_v3 = vpop.permute.xlu1 %1808 }
 0x391   : > { %v1813_v43 = vsel %vm1801_vm13, %v1809_v3, 0.0  ;;  %v1814_v18 = vsel %vm1802_vm1, %v1809_v3, 0.0 }
 0x392   : > { %v1817_v36 = vadd.f32 %v1813_v43, %v1791_v21  ;;  %v1818_v32 = vadd.f32 %v1814_v18, %v1792_v27 }
 0x395   : > { %v1824_v12 = vpop.permute.xlu1 %1823 }
 0x396   : > { %vm1827_vm7 = vcmp.eq.s32.totalorder %v3402_v44, %v1824_v12  ;;  %vm1828_vm0 = vcmp.eq.s32.totalorder %v3410_v19, %v1824_v12 }
 0x397   : > { %v1839_v4 = vsel %vm1827_vm7, %v1835_v57, 0.0  ;;  %v1840_v29 = vsel %vm1828_vm0, %v1835_v57, 0.0  ;;  %vm2027_vm7 = vcmask 31744  }
 0x398   : > { %v1843_v30 = vadd.f32 %v1839_v4, %v1817_v36  ;;  %v1844_v2 = vadd.f32 %v1840_v29, %v1818_v32 }
 0x399   : > { %v4348_v56 = vpop.permute.xlu1 %1830 }
 0x39a   : > { %v1837_v20 = vsel %vm1825_vm10, %v4348_v56, 0.0  ;;  %v1838_v47 = vsel %vm1826_vm3, %v4348_v56, 0.0 }
 0x39b   : > { %v1841_v34 = vadd.f32 %v1837_v20, %v1815_v59  ;;  %v1842_v60 = vadd.f32 %v1838_v47, %v1816_v10 }
 0x39e   : > { %v4350_v52 = vpop.permute.xlu1 %1846 }
 0x39f   : > { %vm1851_vm15 = vcmp.eq.s32.totalorder %v3402_v44, %v4350_v52  ;;  %vm1852_vm1 = vcmp.eq.s32.totalorder %v3410_v19, %v4350_v52 }
 0x3a2   : > { %v4352_v55 = vpop.permute.xlu1 %1856 }
 0x3a3   : > { %v1863_v7 = vsel %vm1851_vm15, %v4352_v55, 0.0  ;;  %v1864_v48 = vsel %vm1852_vm1, %v4352_v55, 0.0 }
 0x3a4   : > { %v1867_v56 = vadd.f32 %v1863_v7, %v1841_v34  ;;  %v1868_v52 = vadd.f32 %v1864_v48, %v1842_v60 }
 0x3a6   : > { %v1861_v50 = vpop.permute.xlu1 %1860 }
 0x3a7   : > { %v1865_v11 = vsel %vm1853_vm12, %v1861_v50, 0.0  ;;  %v1866_v6 = vsel %vm1854_vm8, %v1861_v50, 0.0 }
 0x3a8   : > { %v1869_v14 = vadd.f32 %v1865_v11, %v1843_v30  ;;  %v1870_v62 = vadd.f32 %v1866_v6, %v1844_v2 }
 0x3ab   : > { %v4356_v61 = vpop.permute.xlu1 %1875 }
 0x3ac   : > { %vm1879_vm13 = vcmp.eq.s32.totalorder %v3402_v44, %v4356_v61  ;;  %vm1880_vm9 = vcmp.eq.s32.totalorder %v3410_v19, %v4356_v61 }
 0x3ad   : > { %v1891_v38 = vsel %vm1879_vm13, %v1887_v23, 0.0  ;;  %v1892_v24 = vsel %vm1880_vm9, %v1887_v23, 0.0 }
 0x3ae   : > { %v1895_v40 = vadd.f32 %v1891_v38, %v1869_v14  ;;  %v1896_v15 = vadd.f32 %v1892_v24, %v1870_v62 }
 0x3af   : > { %v4362_v33 = vpop.permute.xlu1 %1882 }
 0x3b0   : > { %v1889_v49 = vsel %vm1877_vm4, %v4362_v33, 0.0  ;;  %v1890_v12 = vsel %vm1878_vm14, %v4362_v33, 0.0 }
 0x3b1   : > { %v1893_v23 = vadd.f32 %v1889_v49, %v1867_v56  ;;  %v1894_v53 = vadd.f32 %v1890_v12, %v1868_v52 }
 0x3b4   : > { %v1899_v51 = vpop.permute.xlu1 %1898 }
 0x3b5   : > { %vm1903_vm10 = vcmp.eq.s32.totalorder %v3402_v44, %v1899_v51  ;;  %vm1904_vm3 = vcmp.eq.s32.totalorder %v3410_v19, %v1899_v51 }
 0x3b8   : > { %v1909_v46 = vpop.permute.xlu1 %1908 }
 0x3b9   : > { %v1915_v57 = vsel %vm1903_vm10, %v1909_v46, 0.0  ;;  %v1916_v55 = vsel %vm1904_vm3, %v1909_v46, 0.0 }
 0x3ba   : > { %v1919_v17 = vadd.f32 %v1915_v57, %v1893_v23  ;;  %v1920_v5 = vadd.f32 %v1916_v55, %v1894_v53 }
 0x3bc   : > { %v1913_v41 = vpop.permute.xlu1 %1912 }
 0x3bd   : > { %v1917_v35 = vsel %vm1905_vm2, %v1913_v41, 0.0  ;;  %v1918_v3 = vsel %vm1906_vm11, %v1913_v41, 0.0  ;;  %vm1929_vm2 = vcmp.eq.s32.totalorder %v3402_v44, %v1925_v37  ;;  %vm1930_vm11 = vcmp.eq.s32.totalorder %v3410_v19, %v1925_v37 }
 0x3be   : > { %v1921_v50 = vadd.f32 %v1917_v35, %v1895_v40  ;;  %v1922_v61 = vadd.f32 %v1918_v3, %v1896_v15 }
 0x3c1   : > { %v1928_v13 = vpop.permute.xlu1 %1927 }
 0x3c2   : > { %vm1931_vm12 = vcmp.eq.s32.totalorder %v3402_v44, %v1928_v13  ;;  %vm1932_vm8 = vcmp.eq.s32.totalorder %v3410_v19, %v1928_v13 }
 0x3c3   : > { %v1943_v8 = vsel %vm1931_vm12, %v1939_v28, 0.0  ;;  %v1944_v33 = vsel %vm1932_vm8, %v1939_v28, 0.0 }
 0x3c4   : > { %v1947_v39 = vadd.f32 %v1943_v8, %v1921_v50  ;;  %v1948_v54 = vadd.f32 %v1944_v33, %v1922_v61 }
 0x3c5   : > { %v1935_v22 = vpop.permute.xlu1 %1934 }
 0x3c6   : > { %v1941_v16 = vsel %vm1929_vm2, %v1935_v22, 0.0  ;;  %v1942_v25 = vsel %vm1930_vm11, %v1935_v22, 0.0  ;;  %2021 = vmatprep.mubr.f32.mxu1 %v1948_v54 }
 0x3c7   : > { %v1945_v58 = vadd.f32 %v1941_v16, %v1919_v17  ;;  %2022 = vmatmul.mubr.f32.vlgmr.msra.gmra.mrb[0].mxu1 %v1947_v39  ;;  %v1946_v51 = vadd.f32 %v1942_v25, %v1920_v5 }
 0x3c9   : > { %2016 = vmatprep.mubr.f32.mxu0 %v1946_v51 }
 0x3ca   : > { %2017 = vmatmul.mubr.f32.vlgmr.msra.gmra.mrb[0].mxu0 %v1945_v58 }
 0x49a   : > { %v2023_v44 = vpop.f32.mrb[0].mxu1 }
 0x49b   : > { %2029 = vst.msk [vmem:[%s274_s7 + $0x8] sm:$0xff] %vm2027_vm7, %v2023_v44  ;;  %v2025_v19 = vpop.f32.mrb[1].mxu1 }
 0x49d   : > { %v2018_v31 = vpop.f32.mrb[0].mxu0 }
 0x49e   : > { %2028 = vst.msk [vmem:[%s274_s7] sm:$0xff] %vm2027_vm7, %v2018_v31  ;;  %v2020_v42 = vpop.f32.mrb[1].mxu0 }
 0x49f PF: > { %p21_p2 = scmp.ge.s32.totalorder %s2756_s5, 6   ;;  %s4681_s25 = smov %s2591_s26 }
 0x4a0   : > { %s4682_s26 = smov %s2595_s27  ;;  %s4683_s27 = smov %s2765_s8 }
 0x4a1   : > { %s4684_s28 = smov %s2603_s29  ;;  %s4685_s29 = smov %s2607_s30 }
 0x4a2   : > { %s4686_s30 = smov %s2884_s6  ;;  %s4687_s0 = smov %s2756_s5 }
 0x4a3   :  { %23 = sbr.rel (!%p21_p2) target bundleno = 19 (0x13), region = 96 }
 0x4aa   :  { %2051 = vsyncpa [#allocation5], 1 }
 0x4ab   :  { %2053 = vsyncpa [#allocation5 + $0x1], 1 }
 0x4ac   :  { %2054 = vsyncpa [#allocation7], 1 }
 0x4ad   :  { %2056 = vsyncpa [#allocation7 + $0x1], 1 }

</bundles_post_ra>
